<compile_context>
chip_gen: v5e
topology: v5e:2x2
jax: 0.10.0
libtpu: 0.0.40
codegen_flags: <defaults>
</compile_context>

<pallas_src>
import functools
import math

import jax
import jax.numpy as jnp
import numpy as np
from jax.experimental import pallas as pl
from jax.experimental.pallas import tpu as pltpu

EPS = 1e-6

# Row layout of the packed f32 vector/bias/norm table (`vecs`, width 5*D).
R_A1_BIAS = 0    # [bq | bq_swap | bk | bk_swap | bv]            width 5D
R_A1_NORM = 1    # [nq*sc | nq_swap*sc | nk | nk_swap]           width 4D
R_PIN_B = 2      # proj_in bias                                   width D
R_A1_BO = 3      # attn1 out-proj bias
R_N2_W = 4       # norm2 weight
R_N2_B = 5       # norm2 bias
R_A2_BQ = 6      # attn2 q bias
R_A2_BKV = 7     # [bk | bv]                                      width 2D
R_A2_NQ = 8      # attn2 q rms weight * sc
R_A2_NK = 9      # attn2 k rms weight
R_A2_BO = 10     # attn2 out-proj bias
R_FFN_B1 = 11    # ffn first bias                                 width F
R_FFN_B2 = 12    # ffn second bias
R_POUT_B = 13    # proj_out bias
R_SST = 14       # rows 14..19: scale_shift_table (6, D)
N_VEC_ROWS = R_SST + 6


# ------------------------- fused Pallas kernel -------------------------

def _wan_vace_block_kernel(hidden_ref, control_ref, enc_ref, temb_ref,
                           rope_ref, vecs_ref, wb_ref, wf_ref, w2_ref,
                           out_ref, *, B, S, SE, D, F, heads, eps):
  f32 = jnp.float32
  bf16 = jnp.bfloat16
  hd = D // heads

  def vrow(r, width):                                   # (1, width) f32
    return vecs_ref[r:r + 1, 0:width]

  def bmm(x, w):                                        # bf16 MXU, f32 acc
    return jnp.dot(x.astype(bf16), w, preferred_element_type=f32)

  def layer_norm(x):
    mu = jnp.mean(x, axis=-1, keepdims=True)
    var = jnp.mean(jnp.square(x - mu), axis=-1, keepdims=True)
    return (x - mu) * jax.lax.rsqrt(var + eps)

  def softmax(s):                                       # exact divide
    s = s - jnp.max(s, axis=-1, keepdims=True)
    p = jnp.exp(s)
    return p / jnp.sum(p, axis=-1, keepdims=True)

  def attention(q, k, v, wo, bo, s_q, s_kv):
    # q:(B*s_q, D)  k,v:(B*s_kv, D), all f32.  Static per-(batch, head)
    # score/softmax/PV; heads and batches re-assembled with cheap in-register
    # concatenation so the out-projection is ONE full-width bf16 matmul.
    dn = (((1,), (1,)), ((), ()))
    batch_rows = []
    for b in range(B):
      qb = q[b * s_q:(b + 1) * s_q, :]
      kb = k[b * s_kv:(b + 1) * s_kv, :]
      vb = v[b * s_kv:(b + 1) * s_kv, :]
      head_cols = []
      for h in range(heads):
        sl = slice(h * hd, (h + 1) * hd)
        sc = jax.lax.dot_general(qb[:, sl], kb[:, sl], dn,
                                 preferred_element_type=f32)
        head_cols.append(jnp.dot(softmax(sc), vb[:, sl],
                                 preferred_element_type=f32))
      batch_rows.append(jnp.concatenate(head_cols, axis=-1))
    o = jnp.concatenate(batch_rows, axis=0)             # (B*s_q, D)
    return bmm(o, wo) + bo

  def expand_mod(j):
    # AdaLN row j (scale_shift_table[j] + temb[b, j]) broadcast over batch b's
    # S rows of the folded slab.
    parts = []
    for b in range(B):
      m = (temb_ref[b * 6 + j:b * 6 + j + 1, :]
           + vecs_ref[R_SST + j:R_SST + j + 1, 0:D])
      parts.append(jnp.broadcast_to(m, (S, D)))
    return jnp.concatenate(parts, axis=0)               # (B*S, D)

  hidden = hidden_ref[...]
  control = control_ref[...]
  enc = enc_ref[...]
  cos_t = rope_ref[:, 0:D]
  sin_t = rope_ref[:, D:2 * D]

  shift_msa = expand_mod(0)
  scale_msa = expand_mod(1)
  gate_msa = expand_mod(2)
  c_shift = expand_mod(3)
  c_scale = expand_mod(4)
  c_gate = expand_mod(5)

  # ---- proj_in + residual (f32: sits directly on the residual path) ----
  c = (jnp.dot(control, wf_ref[:, 0:D], preferred_element_type=f32)
       + vrow(R_PIN_B, D) + hidden)

  # ---- self-attention (AdaLN modulation; RoPE swap folded into weights) ----
  nh = layer_norm(c) * (1.0 + scale_msa) + shift_msa
  qkv = bmm(nh, wb_ref[:, 0:5 * D]) + vrow(R_A1_BIAS, 5 * D)
  q_raw, qs_raw = qkv[:, 0:D], qkv[:, D:2 * D]
  k_raw, ks_raw = qkv[:, 2 * D:3 * D], qkv[:, 3 * D:4 * D]
  v = qkv[:, 4 * D:5 * D]
  # rms(x) is invariant under the signed pair swap, so one rsqrt serves both
  # the plain and the pre-swapped projections.
  inv_q = jax.lax.rsqrt(jnp.mean(q_raw * q_raw, axis=-1, keepdims=True) + eps)
  inv_k = jax.lax.rsqrt(jnp.mean(k_raw * k_raw, axis=-1, keepdims=True) + eps)
  nq = vecs_ref[R_A1_NORM:R_A1_NORM + 1, 0:D]
  nqs = vecs_ref[R_A1_NORM:R_A1_NORM + 1, D:2 * D]
  nk = vecs_ref[R_A1_NORM:R_A1_NORM + 1, 2 * D:3 * D]
  nks = vecs_ref[R_A1_NORM:R_A1_NORM + 1, 3 * D:4 * D]
  q_rot = (q_raw * nq * cos_t + qs_raw * nqs * sin_t) * inv_q   # 1/sqrt(hd) in nq
  k_rot = (k_raw * nk * cos_t + ks_raw * nks * sin_t) * inv_k
  attn = attention(q_rot, k_rot, v, wb_ref[:, 5 * D:6 * D],
                   vrow(R_A1_BO, D), S, S)
  c = c + attn * gate_msa

  # ---- cross-attention ----
  nh = layer_norm(c) * vrow(R_N2_W, D) + vrow(R_N2_B, D)
  q_raw = bmm(nh, wb_ref[:, 6 * D:7 * D]) + vrow(R_A2_BQ, D)
  kv = bmm(enc, wb_ref[:, 7 * D:9 * D]) + vrow(R_A2_BKV, 2 * D)
  k_raw, v2 = kv[:, 0:D], kv[:, D:2 * D]
  q2 = (q_raw * jax.lax.rsqrt(jnp.mean(q_raw * q_raw, axis=-1, keepdims=True)
                              + eps) * vrow(R_A2_NQ, D))
  k2 = (k_raw * jax.lax.rsqrt(jnp.mean(k_raw * k_raw, axis=-1, keepdims=True)
                              + eps) * vrow(R_A2_NK, D))
  attn = attention(q2, k2, v2, wb_ref[:, 9 * D:10 * D],
                   vrow(R_A2_BO, D), S, SE)
  c = c + attn

  # ---- FFN (gelu-approximate) ----
  nh = layer_norm(c) * (1.0 + c_scale) + c_shift
  h = bmm(nh, wb_ref[:, 10 * D:10 * D + F]) + vrow(R_FFN_B1, F)
  h = 0.5 * h * (1.0 + jnp.tanh(0.7978845608028654
                                * (h + 0.044715 * (h * h * h))))
  y = bmm(h, w2_ref[...]) + vrow(R_FFN_B2, D)
  c = c + y * c_gate

  # ---- proj_out (f32) + single merged lane-dense store [ctrl | cond] ----
  cond = (jnp.dot(c, wf_ref[:, D:2 * D], preferred_element_type=f32)
          + vrow(R_POUT_B, D))
  out_ref[...] = jnp.concatenate([c, cond], axis=1)


# ------------------------- one-time parameter packing -------------------------

def pack_params(p, rope_cos, rope_sin, B, S, heads):
  """Hoisted per-call constant prep: packed weight slabs, bias/norm table,
  pre-expanded rope tables, RoPE pair-swap and 1/sqrt(hd) folded in."""
  D = p["proj_in_w"].shape[0]
  F = p["ffn_w1"].shape[1]
  hd = D // heads
  sc = 1.0 / math.sqrt(hd)
  np32 = lambda x: np.asarray(x, np.float32)

  def swap_signed(w):      # out[..., 2i] = -w[..., 2i+1]; out[..., 2i+1] = w[..., 2i]
    w = np32(w)
    wr = w.reshape(w.shape[:-1] + (D // 2, 2))
    return np.stack([-wr[..., 1], wr[..., 0]], axis=-1).reshape(w.shape)

  def swap_unsigned(w):
    w = np32(w)
    wr = w.reshape(w.shape[:-1] + (D // 2, 2))
    return np.stack([wr[..., 1], wr[..., 0]], axis=-1).reshape(w.shape)

  a1, a2 = p["attn1"], p["attn2"]

  # bf16 weight slab: [a1_q | a1_qswap | a1_k | a1_kswap | a1_v | a1_wo |
  #                    a2_wq | a2_wk | a2_wv | a2_wo | ffn_w1]
  wb = np.concatenate([
      np32(a1["wq"]), swap_signed(a1["wq"]),
      np32(a1["wk"]), swap_signed(a1["wk"]),
      np32(a1["wv"]),
      np32(a1["wo"]),
      np32(a2["wq"]),
      np32(a2["wk"]), np32(a2["wv"]),
      np32(a2["wo"]),
      np32(p["ffn_w1"]),
  ], axis=1)                                             # (D, 10D + F)

  # f32 slab kept at full precision: [proj_in | proj_out]
  wf = np.concatenate([np32(p["proj_in_w"]), np32(p["proj_out_w"])], axis=1)

  vecs = np.zeros((N_VEC_ROWS, 5 * D), np.float32)
  vecs[R_A1_BIAS, 0:5 * D] = np.concatenate([
      np32(a1["bq"]), swap_signed(a1["bq"]),
      np32(a1["bk"]), swap_signed(a1["bk"]),
      np32(a1["bv"])])
  vecs[R_A1_NORM, 0:4 * D] = np.concatenate([
      np32(a1["nq"]) * sc, swap_unsigned(a1["nq"]) * sc,
      np32(a1["nk"]), swap_unsigned(a1["nk"])])
  vecs[R_PIN_B, 0:D] = np32(p["proj_in_b"])
  vecs[R_A1_BO, 0:D] = np32(a1["bo"])
  vecs[R_N2_W, 0:D] = np32(p["norm2_w"])
  vecs[R_N2_B, 0:D] = np32(p["norm2_b"])
  vecs[R_A2_BQ, 0:D] = np32(a2["bq"])
  vecs[R_A2_BKV, 0:2 * D] = np.concatenate([np32(a2["bk"]), np32(a2["bv"])])
  vecs[R_A2_NQ, 0:D] = np32(a2["nq"]) * sc
  vecs[R_A2_NK, 0:D] = np32(a2["nk"])
  vecs[R_A2_BO, 0:D] = np32(a2["bo"])
  vecs[R_FFN_B1, 0:F] = np32(p["ffn_b1"])
  vecs[R_FFN_B2, 0:D] = np32(p["ffn_b2"])
  vecs[R_POUT_B, 0:D] = np32(p["proj_out_b"])
  vecs[R_SST:R_SST + 6, 0:D] = np32(p["scale_shift_table"]).reshape(6, D)

  # Rope tables pre-expanded to the folded (B*S, 2D) layout: [cos | sin].
  cos_full = np.tile(np.repeat(np32(rope_cos), 2, axis=-1), (1, heads))  # (S, D)
  sin_full = np.tile(np.repeat(np32(rope_sin), 2, axis=-1), (1, heads))
  rope = np.tile(np.concatenate([cos_full, sin_full], axis=1), (B, 1))   # (B*S, 2D)

  return dict(
      wb=jnp.asarray(wb).astype(jnp.bfloat16),
      wf=jnp.asarray(wf, dtype=jnp.float32),
      w2=jnp.asarray(np32(p["ffn_w2"])).astype(jnp.bfloat16),
      vecs=jnp.asarray(vecs, dtype=jnp.float32),
      rope=jnp.asarray(rope, dtype=jnp.float32),
  )


# ------------------------- wrapper (single gridless pallas_call) -------------------------

@functools.partial(jax.jit, static_argnames=("heads",))
def wan_vace_block_forward(packed, hidden, enc, control, temb, *, heads):
  B, S, D = hidden.shape
  SE = enc.shape[1]
  F = packed["w2"].shape[0]

  hidden2 = hidden.reshape(B * S, D).astype(jnp.float32)
  control2 = control.reshape(B * S, D).astype(jnp.float32)
  enc2 = enc.reshape(B * SE, D).astype(jnp.float32)
  temb2 = temb.reshape(B * 6, D).astype(jnp.float32)

  kernel = functools.partial(_wan_vace_block_kernel, B=B, S=S, SE=SE, D=D,
                             F=F, heads=heads, eps=EPS)
  vmem = lambda: pl.BlockSpec(memory_space=pltpu.MemorySpace.VMEM)
  out = pl.pallas_call(
      kernel,
      out_shape=jax.ShapeDtypeStruct((B * S, 2 * D), jnp.float32),
      in_specs=[vmem() for _ in range(9)],
      out_specs=vmem(),
  )(hidden2, control2, enc2, temb2,
    packed["rope"], packed["vecs"], packed["wb"], packed["wf"], packed["w2"])

  ctrl = out[:, 0:D].reshape(B, S, D)
  cond = out[:, D:2 * D].reshape(B, S, D)
  return cond, ctrl


# ------------------------- pure-JAX reference -------------------------

def reference_forward(p, hidden, enc, control, temb, cos, sin, heads, eps=EPS):
  def lin(x, w, b):
    return x @ w + b

  def ln(x):
    mu = jnp.mean(x, -1, keepdims=True)
    var = jnp.mean(jnp.square(x - mu), -1, keepdims=True)
    return (x - mu) * jax.lax.rsqrt(var + eps)

  def rms(x, w):
    return x * jax.lax.rsqrt(jnp.mean(x * x, -1, keepdims=True) + eps) * w

  def attn(xq, xkv, ap, rope):
    B, Sq, D = xq.shape
    Sk = xkv.shape[1]
    hd = D // heads
    q = rms(lin(xq, ap["wq"], ap["bq"]), ap["nq"])
    k = rms(lin(xkv, ap["wk"], ap["bk"]), ap["nk"])
    v = lin(xkv, ap["wv"], ap["bv"])
    q = q.reshape(B, Sq, heads, hd).transpose(0, 2, 1, 3)
    k = k.reshape(B, Sk, heads, hd).transpose(0, 2, 1, 3)
    v = v.reshape(B, Sk, heads, hd).transpose(0, 2, 1, 3)
    if rope is not None:
      c_, s_ = rope
      def rot(x):
        x1, x2 = x[..., 0::2], x[..., 1::2]
        return jnp.stack([x1 * c_ - x2 * s_, x1 * s_ + x2 * c_], -1).reshape(x.shape)
      q, k = rot(q), rot(k)
    sc = jnp.einsum("bhqd,bhkd->bhqk", q, k) / math.sqrt(hd)
    sc = sc - jnp.max(sc, -1, keepdims=True)
    pw = jnp.exp(sc)
    pw = pw / jnp.sum(pw, -1, keepdims=True)
    o = jnp.einsum("bhqk,bhkd->bhqd", pw, v)
    return o.transpose(0, 2, 1, 3).reshape(B, Sq, D)

  c = lin(control, p["proj_in_w"], p["proj_in_b"]) + hidden
  mods = p["scale_shift_table"] + temb
  shift_msa, scale_msa, gate_msa, c_shift, c_scale, c_gate = jnp.split(mods, 6, axis=1)
  nh = ln(c) * (1.0 + scale_msa) + shift_msa
  a1 = lin(attn(nh, nh, p["attn1"], (cos, sin)), p["attn1"]["wo"], p["attn1"]["bo"])
  c = c + a1 * gate_msa
  nh = ln(c) * p["norm2_w"] + p["norm2_b"]
  a2 = lin(attn(nh, enc, p["attn2"], None), p["attn2"]["wo"], p["attn2"]["bo"])
  c = c + a2
  nh = ln(c) * (1.0 + c_scale) + c_shift
  h = lin(nh, p["ffn_w1"], p["ffn_b1"])
  h = 0.5 * h * (1.0 + jnp.tanh(0.7978845608028654 * (h + 0.044715 * h ** 3)))
  c = c + lin(h, p["ffn_w2"], p["ffn_b2"]) * c_gate
  cond = lin(c, p["proj_out_w"], p["proj_out_b"])
  return cond, c


# ------------------------- deterministic parameter init -------------------------

def init_params(key, D, F):
  ks = iter(jax.random.split(key, 64))

  def w(shape, scale=0.1):
    return (scale * jax.random.normal(next(ks), shape)).astype(jnp.float32)

  def near_one(shape):
    return (1.0 + 0.05 * jax.random.normal(next(ks), shape)).astype(jnp.float32)

  def attn_params():
    return dict(
        wq=w((D, D)), bq=w((D,), 0.02),
        wk=w((D, D)), bk=w((D,), 0.02),
        wv=w((D, D)), bv=w((D,), 0.02),
        wo=w((D, D)), bo=w((D,), 0.02),
        nq=near_one((D,)), nk=near_one((D,)),
    )

  return dict(
      proj_in_w=w((D, D)), proj_in_b=w((D,), 0.02),
      attn1=attn_params(), attn2=attn_params(),
      norm2_w=near_one((D,)), norm2_b=w((D,), 0.02),
      ffn_w1=w((D, F)), ffn_b1=w((F,), 0.02),
      ffn_w2=w((F, D)), ffn_b2=w((D,), 0.02),
      proj_out_w=w((D, D)), proj_out_b=w((D,), 0.02),
      scale_shift_table=(jax.random.normal(next(ks), (1, 6, D)) / math.sqrt(D)).astype(jnp.float32),
  )


# ------------------------- main -------------------------

if __name__ == "__main__":
  B, S, SE, D, H, F = 2, 16, 8, 32, 4, 64
  hd = D // H

  key = jax.random.PRNGKey(0)
  kp, k1, k2, k3, k4 = jax.random.split(key, 5)
  params = init_params(kp, D, F)

  hidden = jax.random.normal(k1, (B, S, D), jnp.float32)
  enc = jax.random.normal(k2, (B, SE, D), jnp.float32)
  control = jax.random.normal(k3, (B, S, D), jnp.float32)
  temb = 0.1 * jax.random.normal(k4, (B, 6, D), jnp.float32)

  pos = jnp.arange(S, dtype=jnp.float32)
  inv_freq = 1.0 / (10000.0 ** (jnp.arange(0, hd, 2, dtype=jnp.float32) / hd))
  angles = pos[:, None] * inv_freq[None, :]
  rope_cos = jnp.cos(angles)   # (S, hd//2)
  rope_sin = jnp.sin(angles)   # (S, hd//2)

  # One-time constant packing (hoisted out of the per-call forward).
  packed = pack_params(params, rope_cos, rope_sin, B, S, H)

  cond, ctrl = jax.block_until_ready(
      wan_vace_block_forward(packed, hidden, enc, control, temb, heads=H))

  ref_cond, ref_ctrl = reference_forward(params, hidden, enc, control, temb,
                                         rope_cos, rope_sin, H)
  np.testing.assert_allclose(np.asarray(ctrl), np.asarray(ref_ctrl), rtol=5e-3, atol=5e-3)
  np.testing.assert_allclose(np.asarray(cond), np.asarray(ref_cond), rtol=5e-3, atol=5e-3)

  print("KERNEL_OK")
</pallas_src>

<mosaic_0001>
module attributes {stable_mosaic.version = 11 : i64} {
  func.func @_wan_vace_block_kernel(%arg0: memref<32x32xf32, #tpu.memory_space<vmem>>, %arg1: memref<32x32xf32, #tpu.memory_space<vmem>>, %arg2: memref<16x32xf32, #tpu.memory_space<vmem>>, %arg3: memref<12x32xf32, #tpu.memory_space<vmem>>, %arg4: memref<32x64xf32, #tpu.memory_space<vmem>>, %arg5: memref<20x160xf32, #tpu.memory_space<vmem>>, %arg6: memref<32x384xbf16, #tpu.memory_space<vmem>>, %arg7: memref<32x64xf32, #tpu.memory_space<vmem>>, %arg8: memref<64x32xbf16, #tpu.memory_space<vmem>>, %arg9: memref<32x64xf32, #tpu.memory_space<vmem>>) attributes {dimension_semantics = [], scalar_prefetch = 0 : i64, scratch_operands = 0 : i64, tpu.core_type = #tpu.core_type<tc>} {
    %c0 = arith.constant 0 : index
    %c0_0 = arith.constant 0 : index
    %0 = vector.load %arg0[%c0, %c0_0] : memref<32x32xf32, #tpu.memory_space<vmem>>, vector<32x32xf32>
    %c0_1 = arith.constant 0 : index
    %c0_2 = arith.constant 0 : index
    %1 = vector.load %arg1[%c0_1, %c0_2] : memref<32x32xf32, #tpu.memory_space<vmem>>, vector<32x32xf32>
    %c0_3 = arith.constant 0 : index
    %c0_4 = arith.constant 0 : index
    %2 = vector.load %arg2[%c0_3, %c0_4] : memref<16x32xf32, #tpu.memory_space<vmem>>, vector<16x32xf32>
    %c0_5 = arith.constant 0 : index
    %c0_6 = arith.constant 0 : index
    %3 = vector.load %arg4[%c0_5, %c0_6] : memref<32x64xf32, #tpu.memory_space<vmem>>, vector<32x32xf32>
    %c0_7 = arith.constant 0 : index
    %c32 = arith.constant 32 : index
    %4 = vector.load %arg4[%c0_7, %c32] : memref<32x64xf32, #tpu.memory_space<vmem>>, vector<32x32xf32>
    %c0_8 = arith.constant 0 : index
    %c0_9 = arith.constant 0 : index
    %5 = vector.load %arg3[%c0_8, %c0_9] : memref<12x32xf32, #tpu.memory_space<vmem>>, vector<1x32xf32>
    %c14 = arith.constant 14 : index
    %c0_10 = arith.constant 0 : index
    %6 = vector.load %arg5[%c14, %c0_10] : memref<20x160xf32, #tpu.memory_space<vmem>>, vector<1x32xf32>
    %7 = arith.addf %5, %6 : vector<1x32xf32>
    %8 = vector.shape_cast %7 : vector<1x32xf32> to vector<1x32xf32>
    %9 = vector.broadcast %8 : vector<1x32xf32> to vector<16x32xf32>
    %c6 = arith.constant 6 : index
    %c0_11 = arith.constant 0 : index
    %10 = vector.load %arg3[%c6, %c0_11] : memref<12x32xf32, #tpu.memory_space<vmem>>, vector<1x32xf32>
    %c14_12 = arith.constant 14 : index
    %c0_13 = arith.constant 0 : index
    %11 = vector.load %arg5[%c14_12, %c0_13] : memref<20x160xf32, #tpu.memory_space<vmem>>, vector<1x32xf32>
    %12 = arith.addf %10, %11 : vector<1x32xf32>
    %13 = vector.shape_cast %12 : vector<1x32xf32> to vector<1x32xf32>
    %14 = vector.broadcast %13 : vector<1x32xf32> to vector<16x32xf32>
    %15 = tpu.concatenate %9, %14 in 0 : vector<16x32xf32>, vector<16x32xf32> -> vector<32x32xf32>
    %c1 = arith.constant 1 : index
    %c0_14 = arith.constant 0 : index
    %16 = vector.load %arg3[%c1, %c0_14] : memref<12x32xf32, #tpu.memory_space<vmem>>, vector<1x32xf32>
    %c15 = arith.constant 15 : index
    %c0_15 = arith.constant 0 : index
    %17 = vector.load %arg5[%c15, %c0_15] : memref<20x160xf32, #tpu.memory_space<vmem>>, vector<1x32xf32>
    %18 = arith.addf %16, %17 : vector<1x32xf32>
    %19 = vector.shape_cast %18 : vector<1x32xf32> to vector<1x32xf32>
    %20 = vector.broadcast %19 : vector<1x32xf32> to vector<16x32xf32>
    %c7 = arith.constant 7 : index
    %c0_16 = arith.constant 0 : index
    %21 = vector.load %arg3[%c7, %c0_16] : memref<12x32xf32, #tpu.memory_space<vmem>>, vector<1x32xf32>
    %c15_17 = arith.constant 15 : index
    %c0_18 = arith.constant 0 : index
    %22 = vector.load %arg5[%c15_17, %c0_18] : memref<20x160xf32, #tpu.memory_space<vmem>>, vector<1x32xf32>
    %23 = arith.addf %21, %22 : vector<1x32xf32>
    %24 = vector.shape_cast %23 : vector<1x32xf32> to vector<1x32xf32>
    %25 = vector.broadcast %24 : vector<1x32xf32> to vector<16x32xf32>
    %26 = tpu.concatenate %20, %25 in 0 : vector<16x32xf32>, vector<16x32xf32> -> vector<32x32xf32>
    %c2 = arith.constant 2 : index
    %c0_19 = arith.constant 0 : index
    %27 = vector.load %arg3[%c2, %c0_19] : memref<12x32xf32, #tpu.memory_space<vmem>>, vector<1x32xf32>
    %c16 = arith.constant 16 : index
    %c0_20 = arith.constant 0 : index
    %28 = vector.load %arg5[%c16, %c0_20] : memref<20x160xf32, #tpu.memory_space<vmem>>, vector<1x32xf32>
    %29 = arith.addf %27, %28 : vector<1x32xf32>
    %30 = vector.shape_cast %29 : vector<1x32xf32> to vector<1x32xf32>
    %31 = vector.broadcast %30 : vector<1x32xf32> to vector<16x32xf32>
    %c8 = arith.constant 8 : index
    %c0_21 = arith.constant 0 : index
    %32 = vector.load %arg3[%c8, %c0_21] : memref<12x32xf32, #tpu.memory_space<vmem>>, vector<1x32xf32>
    %c16_22 = arith.constant 16 : index
    %c0_23 = arith.constant 0 : index
    %33 = vector.load %arg5[%c16_22, %c0_23] : memref<20x160xf32, #tpu.memory_space<vmem>>, vector<1x32xf32>
    %34 = arith.addf %32, %33 : vector<1x32xf32>
    %35 = vector.shape_cast %34 : vector<1x32xf32> to vector<1x32xf32>
    %36 = vector.broadcast %35 : vector<1x32xf32> to vector<16x32xf32>
    %37 = tpu.concatenate %31, %36 in 0 : vector<16x32xf32>, vector<16x32xf32> -> vector<32x32xf32>
    %c3 = arith.constant 3 : index
    %c0_24 = arith.constant 0 : index
    %38 = vector.load %arg3[%c3, %c0_24] : memref<12x32xf32, #tpu.memory_space<vmem>>, vector<1x32xf32>
    %c17 = arith.constant 17 : index
    %c0_25 = arith.constant 0 : index
    %39 = vector.load %arg5[%c17, %c0_25] : memref<20x160xf32, #tpu.memory_space<vmem>>, vector<1x32xf32>
    %40 = arith.addf %38, %39 : vector<1x32xf32>
    %41 = vector.shape_cast %40 : vector<1x32xf32> to vector<1x32xf32>
    %42 = vector.broadcast %41 : vector<1x32xf32> to vector<16x32xf32>
    %c9 = arith.constant 9 : index
    %c0_26 = arith.constant 0 : index
    %43 = vector.load %arg3[%c9, %c0_26] : memref<12x32xf32, #tpu.memory_space<vmem>>, vector<1x32xf32>
    %c17_27 = arith.constant 17 : index
    %c0_28 = arith.constant 0 : index
    %44 = vector.load %arg5[%c17_27, %c0_28] : memref<20x160xf32, #tpu.memory_space<vmem>>, vector<1x32xf32>
    %45 = arith.addf %43, %44 : vector<1x32xf32>
    %46 = vector.shape_cast %45 : vector<1x32xf32> to vector<1x32xf32>
    %47 = vector.broadcast %46 : vector<1x32xf32> to vector<16x32xf32>
    %48 = tpu.concatenate %42, %47 in 0 : vector<16x32xf32>, vector<16x32xf32> -> vector<32x32xf32>
    %c4 = arith.constant 4 : index
    %c0_29 = arith.constant 0 : index
    %49 = vector.load %arg3[%c4, %c0_29] : memref<12x32xf32, #tpu.memory_space<vmem>>, vector<1x32xf32>
    %c18 = arith.constant 18 : index
    %c0_30 = arith.constant 0 : index
    %50 = vector.load %arg5[%c18, %c0_30] : memref<20x160xf32, #tpu.memory_space<vmem>>, vector<1x32xf32>
    %51 = arith.addf %49, %50 : vector<1x32xf32>
    %52 = vector.shape_cast %51 : vector<1x32xf32> to vector<1x32xf32>
    %53 = vector.broadcast %52 : vector<1x32xf32> to vector<16x32xf32>
    %c10 = arith.constant 10 : index
    %c0_31 = arith.constant 0 : index
    %54 = vector.load %arg3[%c10, %c0_31] : memref<12x32xf32, #tpu.memory_space<vmem>>, vector<1x32xf32>
    %c18_32 = arith.constant 18 : index
    %c0_33 = arith.constant 0 : index
    %55 = vector.load %arg5[%c18_32, %c0_33] : memref<20x160xf32, #tpu.memory_space<vmem>>, vector<1x32xf32>
    %56 = arith.addf %54, %55 : vector<1x32xf32>
    %57 = vector.shape_cast %56 : vector<1x32xf32> to vector<1x32xf32>
    %58 = vector.broadcast %57 : vector<1x32xf32> to vector<16x32xf32>
    %59 = tpu.concatenate %53, %58 in 0 : vector<16x32xf32>, vector<16x32xf32> -> vector<32x32xf32>
    %c5 = arith.constant 5 : index
    %c0_34 = arith.constant 0 : index
    %60 = vector.load %arg3[%c5, %c0_34] : memref<12x32xf32, #tpu.memory_space<vmem>>, vector<1x32xf32>
    %c19 = arith.constant 19 : index
    %c0_35 = arith.constant 0 : index
    %61 = vector.load %arg5[%c19, %c0_35] : memref<20x160xf32, #tpu.memory_space<vmem>>, vector<1x32xf32>
    %62 = arith.addf %60, %61 : vector<1x32xf32>
    %63 = vector.shape_cast %62 : vector<1x32xf32> to vector<1x32xf32>
    %64 = vector.broadcast %63 : vector<1x32xf32> to vector<16x32xf32>
    %c11 = arith.constant 11 : index
    %c0_36 = arith.constant 0 : index
    %65 = vector.load %arg3[%c11, %c0_36] : memref<12x32xf32, #tpu.memory_space<vmem>>, vector<1x32xf32>
    %c19_37 = arith.constant 19 : index
    %c0_38 = arith.constant 0 : index
    %66 = vector.load %arg5[%c19_37, %c0_38] : memref<20x160xf32, #tpu.memory_space<vmem>>, vector<1x32xf32>
    %67 = arith.addf %65, %66 : vector<1x32xf32>
    %68 = vector.shape_cast %67 : vector<1x32xf32> to vector<1x32xf32>
    %69 = vector.broadcast %68 : vector<1x32xf32> to vector<16x32xf32>
    %70 = tpu.concatenate %64, %69 in 0 : vector<16x32xf32>, vector<16x32xf32> -> vector<32x32xf32>
    %c0_39 = arith.constant 0 : index
    %c0_40 = arith.constant 0 : index
    %71 = vector.load %arg7[%c0_39, %c0_40] : memref<32x64xf32, #tpu.memory_space<vmem>>, vector<32x32xf32>
    %cst = arith.constant dense<0.000000e+00> : vector<32x32xf32>
    %72 = tpu.matmul %1, %71, %cst {dimension_numbers = #tpu.dot_dimension_numbers<[1], [0], [0], [1], [0, 0, 1, 1], [], []>} : vector<32x32xf32>, vector<32x32xf32>, vector<32x32xf32> -> vector<32x32xf32>
    %c2_41 = arith.constant 2 : index
    %c0_42 = arith.constant 0 : index
    %73 = vector.load %arg5[%c2_41, %c0_42] : memref<20x160xf32, #tpu.memory_space<vmem>>, vector<1x32xf32>
    %74 = vector.broadcast %73 : vector<1x32xf32> to vector<32x32xf32>
    %75 = arith.addf %72, %74 : vector<32x32xf32>
    %76 = arith.addf %75, %0 : vector<32x32xf32>
    %cst_43 = arith.constant dense<0.000000e+00> : vector<32xf32>
    %77 = vector.multi_reduction <add>, %76, %cst_43 [1] : vector<32x32xf32> to vector<32xf32>
    %78 = vector.shape_cast %77 : vector<32xf32> to vector<32x1xf32>
    %cst_44 = arith.constant 3.200000e+01 : f32
    %79 = vector.broadcast %cst_44 : f32 to vector<32x1xf32>
    %80 = arith.divf %78, %79 : vector<32x1xf32>
    %81 = vector.broadcast %80 : vector<32x1xf32> to vector<32x32xf32>
    %82 = arith.subf %76, %81 : vector<32x32xf32>
    %83 = arith.mulf %82, %82 : vector<32x32xf32>
    %cst_45 = arith.constant dense<0.000000e+00> : vector<32xf32>
    %84 = vector.multi_reduction <add>, %83, %cst_45 [1] : vector<32x32xf32> to vector<32xf32>
    %85 = vector.shape_cast %84 : vector<32xf32> to vector<32x1xf32>
    %cst_46 = arith.constant 3.200000e+01 : f32
    %86 = vector.broadcast %cst_46 : f32 to vector<32x1xf32>
    %87 = arith.divf %85, %86 : vector<32x1xf32>
    %88 = vector.broadcast %80 : vector<32x1xf32> to vector<32x32xf32>
    %89 = arith.subf %76, %88 : vector<32x32xf32>
    %cst_47 = arith.constant 9.99999997E-7 : f32
    %90 = vector.broadcast %cst_47 : f32 to vector<32x1xf32>
    %91 = arith.addf %87, %90 : vector<32x1xf32>
    %92 = math.rsqrt %91 : vector<32x1xf32>
    %93 = vector.broadcast %92 : vector<32x1xf32> to vector<32x32xf32>
    %94 = arith.mulf %89, %93 : vector<32x32xf32>
    %cst_48 = arith.constant 1.000000e+00 : f32
    %95 = vector.broadcast %cst_48 : f32 to vector<32x32xf32>
    %96 = arith.addf %95, %26 : vector<32x32xf32>
    %97 = arith.mulf %94, %96 : vector<32x32xf32>
    %98 = arith.addf %97, %15 : vector<32x32xf32>
    %c0_49 = arith.constant 0 : index
    %c0_50 = arith.constant 0 : index
    %99 = vector.load %arg6[%c0_49, %c0_50] : memref<32x384xbf16, #tpu.memory_space<vmem>>, vector<32x160xbf16>
    %100 = arith.truncf %98 : vector<32x32xf32> to vector<32x32xbf16>
    %cst_51 = arith.constant dense<0.000000e+00> : vector<32x160xf32>
    %101 = tpu.matmul %100, %99, %cst_51 {dimension_numbers = #tpu.dot_dimension_numbers<[1], [0], [0], [1], [0, 0, 1, 1], [], []>} : vector<32x32xbf16>, vector<32x160xbf16>, vector<32x160xf32> -> vector<32x160xf32>
    %c0_52 = arith.constant 0 : index
    %c0_53 = arith.constant 0 : index
    %102 = vector.load %arg5[%c0_52, %c0_53] : memref<20x160xf32, #tpu.memory_space<vmem>>, vector<1x160xf32>
    %103 = vector.broadcast %102 : vector<1x160xf32> to vector<32x160xf32>
    %104 = arith.addf %101, %103 : vector<32x160xf32>
    %105 = vector.extract_strided_slice %104 {offsets = [0, 0], sizes = [32, 32], strides = [1, 1]} : vector<32x160xf32> to vector<32x32xf32>
    %106 = vector.extract_strided_slice %104 {offsets = [0, 32], sizes = [32, 32], strides = [1, 1]} : vector<32x160xf32> to vector<32x32xf32>
    %107 = vector.extract_strided_slice %104 {offsets = [0, 64], sizes = [32, 32], strides = [1, 1]} : vector<32x160xf32> to vector<32x32xf32>
    %108 = vector.extract_strided_slice %104 {offsets = [0, 96], sizes = [32, 32], strides = [1, 1]} : vector<32x160xf32> to vector<32x32xf32>
    %109 = vector.extract_strided_slice %104 {offsets = [0, 128], sizes = [32, 32], strides = [1, 1]} : vector<32x160xf32> to vector<32x32xf32>
    %110 = arith.mulf %105, %105 : vector<32x32xf32>
    %cst_54 = arith.constant dense<0.000000e+00> : vector<32xf32>
    %111 = vector.multi_reduction <add>, %110, %cst_54 [1] : vector<32x32xf32> to vector<32xf32>
    %112 = vector.shape_cast %111 : vector<32xf32> to vector<32x1xf32>
    %cst_55 = arith.constant 3.200000e+01 : f32
    %113 = vector.broadcast %cst_55 : f32 to vector<32x1xf32>
    %114 = arith.divf %112, %113 : vector<32x1xf32>
    %cst_56 = arith.constant 9.99999997E-7 : f32
    %115 = vector.broadcast %cst_56 : f32 to vector<32x1xf32>
    %116 = arith.addf %114, %115 : vector<32x1xf32>
    %117 = math.rsqrt %116 : vector<32x1xf32>
    %118 = arith.mulf %107, %107 : vector<32x32xf32>
    %cst_57 = arith.constant dense<0.000000e+00> : vector<32xf32>
    %119 = vector.multi_reduction <add>, %118, %cst_57 [1] : vector<32x32xf32> to vector<32xf32>
    %120 = vector.shape_cast %119 : vector<32xf32> to vector<32x1xf32>
    %cst_58 = arith.constant 3.200000e+01 : f32
    %121 = vector.broadcast %cst_58 : f32 to vector<32x1xf32>
    %122 = arith.divf %120, %121 : vector<32x1xf32>
    %cst_59 = arith.constant 9.99999997E-7 : f32
    %123 = vector.broadcast %cst_59 : f32 to vector<32x1xf32>
    %124 = arith.addf %122, %123 : vector<32x1xf32>
    %125 = math.rsqrt %124 : vector<32x1xf32>
    %c1_60 = arith.constant 1 : index
    %c0_61 = arith.constant 0 : index
    %126 = vector.load %arg5[%c1_60, %c0_61] : memref<20x160xf32, #tpu.memory_space<vmem>>, vector<1x32xf32>
    %c1_62 = arith.constant 1 : index
    %c32_63 = arith.constant 32 : index
    %127 = vector.load %arg5[%c1_62, %c32_63] : memref<20x160xf32, #tpu.memory_space<vmem>>, vector<1x32xf32>
    %c1_64 = arith.constant 1 : index
    %c64 = arith.constant 64 : index
    %128 = vector.load %arg5[%c1_64, %c64] : memref<20x160xf32, #tpu.memory_space<vmem>>, vector<1x32xf32>
    %c1_65 = arith.constant 1 : index
    %c96 = arith.constant 96 : index
    %129 = vector.load %arg5[%c1_65, %c96] : memref<20x160xf32, #tpu.memory_space<vmem>>, vector<1x32xf32>
    %130 = vector.broadcast %126 : vector<1x32xf32> to vector<32x32xf32>
    %131 = arith.mulf %105, %130 : vector<32x32xf32>
    %132 = arith.mulf %131, %3 : vector<32x32xf32>
    %133 = vector.broadcast %127 : vector<1x32xf32> to vector<32x32xf32>
    %134 = arith.mulf %106, %133 : vector<32x32xf32>
    %135 = arith.mulf %134, %4 : vector<32x32xf32>
    %136 = arith.addf %132, %135 : vector<32x32xf32>
    %137 = vector.broadcast %117 : vector<32x1xf32> to vector<32x32xf32>
    %138 = arith.mulf %136, %137 : vector<32x32xf32>
    %139 = vector.broadcast %128 : vector<1x32xf32> to vector<32x32xf32>
    %140 = arith.mulf %107, %139 : vector<32x32xf32>
    %141 = arith.mulf %140, %3 : vector<32x32xf32>
    %142 = vector.broadcast %129 : vector<1x32xf32> to vector<32x32xf32>
    %143 = arith.mulf %108, %142 : vector<32x32xf32>
    %144 = arith.mulf %143, %4 : vector<32x32xf32>
    %145 = arith.addf %141, %144 : vector<32x32xf32>
    %146 = vector.broadcast %125 : vector<32x1xf32> to vector<32x32xf32>
    %147 = arith.mulf %145, %146 : vector<32x32xf32>
    %c0_66 = arith.constant 0 : index
    %c160 = arith.constant 160 : index
    %148 = vector.load %arg6[%c0_66, %c160] : memref<32x384xbf16, #tpu.memory_space<vmem>>, vector<32x32xbf16>
    %c3_67 = arith.constant 3 : index
    %c0_68 = arith.constant 0 : index
    %149 = vector.load %arg5[%c3_67, %c0_68] : memref<20x160xf32, #tpu.memory_space<vmem>>, vector<1x32xf32>
    %150 = vector.extract_strided_slice %138 {offsets = [0, 0], sizes = [16, 32], strides = [1, 1]} : vector<32x32xf32> to vector<16x32xf32>
    %151 = vector.extract_strided_slice %147 {offsets = [0, 0], sizes = [16, 32], strides = [1, 1]} : vector<32x32xf32> to vector<16x32xf32>
    %152 = vector.extract_strided_slice %109 {offsets = [0, 0], sizes = [16, 32], strides = [1, 1]} : vector<32x32xf32> to vector<16x32xf32>
    %153 = vector.extract_strided_slice %150 {offsets = [0, 0], sizes = [16, 8], strides = [1, 1]} : vector<16x32xf32> to vector<16x8xf32>
    %154 = vector.extract_strided_slice %151 {offsets = [0, 0], sizes = [16, 8], strides = [1, 1]} : vector<16x32xf32> to vector<16x8xf32>
    %cst_69 = arith.constant dense<0.000000e+00> : vector<16x16xf32>
    %155 = tpu.matmul %153, %154, %cst_69 {dimension_numbers = #tpu.dot_dimension_numbers<[1], [1], [0], [0], [0, 0, 1, 0], [], []>} : vector<16x8xf32>, vector<16x8xf32>, vector<16x16xf32> -> vector<16x16xf32>
    %cst_70 = arith.constant dense<0xFF800000> : vector<16xf32>
    %156 = vector.multi_reduction <maximumf>, %155, %cst_70 [1] : vector<16x16xf32> to vector<16xf32>
    %157 = vector.shape_cast %156 : vector<16xf32> to vector<16x1xf32>
    %158 = vector.broadcast %157 : vector<16x1xf32> to vector<16x16xf32>
    %159 = arith.subf %155, %158 : vector<16x16xf32>
    %160 = math.exp %159 : vector<16x16xf32>
    %cst_71 = arith.constant dense<0.000000e+00> : vector<16xf32>
    %161 = vector.multi_reduction <add>, %160, %cst_71 [1] : vector<16x16xf32> to vector<16xf32>
    %162 = vector.shape_cast %161 : vector<16xf32> to vector<16x1xf32>
    %163 = vector.broadcast %162 : vector<16x1xf32> to vector<16x16xf32>
    %164 = arith.divf %160, %163 : vector<16x16xf32>
    %165 = vector.extract_strided_slice %152 {offsets = [0, 0], sizes = [16, 8], strides = [1, 1]} : vector<16x32xf32> to vector<16x8xf32>
    %cst_72 = arith.constant dense<0.000000e+00> : vector<16x8xf32>
    %166 = tpu.matmul %164, %165, %cst_72 {dimension_numbers = #tpu.dot_dimension_numbers<[1], [0], [0], [1], [0, 0, 1, 1], [], []>} : vector<16x16xf32>, vector<16x8xf32>, vector<16x8xf32> -> vector<16x8xf32>
    %167 = vector.extract_strided_slice %150 {offsets = [0, 8], sizes = [16, 8], strides = [1, 1]} : vector<16x32xf32> to vector<16x8xf32>
    %168 = vector.extract_strided_slice %151 {offsets = [0, 8], sizes = [16, 8], strides = [1, 1]} : vector<16x32xf32> to vector<16x8xf32>
    %cst_73 = arith.constant dense<0.000000e+00> : vector<16x16xf32>
    %169 = tpu.matmul %167, %168, %cst_73 {dimension_numbers = #tpu.dot_dimension_numbers<[1], [1], [0], [0], [0, 0, 1, 0], [], []>} : vector<16x8xf32>, vector<16x8xf32>, vector<16x16xf32> -> vector<16x16xf32>
    %cst_74 = arith.constant dense<0xFF800000> : vector<16xf32>
    %170 = vector.multi_reduction <maximumf>, %169, %cst_74 [1] : vector<16x16xf32> to vector<16xf32>
    %171 = vector.shape_cast %170 : vector<16xf32> to vector<16x1xf32>
    %172 = vector.broadcast %171 : vector<16x1xf32> to vector<16x16xf32>
    %173 = arith.subf %169, %172 : vector<16x16xf32>
    %174 = math.exp %173 : vector<16x16xf32>
    %cst_75 = arith.constant dense<0.000000e+00> : vector<16xf32>
    %175 = vector.multi_reduction <add>, %174, %cst_75 [1] : vector<16x16xf32> to vector<16xf32>
    %176 = vector.shape_cast %175 : vector<16xf32> to vector<16x1xf32>
    %177 = vector.broadcast %176 : vector<16x1xf32> to vector<16x16xf32>
    %178 = arith.divf %174, %177 : vector<16x16xf32>
    %179 = vector.extract_strided_slice %152 {offsets = [0, 8], sizes = [16, 8], strides = [1, 1]} : vector<16x32xf32> to vector<16x8xf32>
    %cst_76 = arith.constant dense<0.000000e+00> : vector<16x8xf32>
    %180 = tpu.matmul %178, %179, %cst_76 {dimension_numbers = #tpu.dot_dimension_numbers<[1], [0], [0], [1], [0, 0, 1, 1], [], []>} : vector<16x16xf32>, vector<16x8xf32>, vector<16x8xf32> -> vector<16x8xf32>
    %181 = vector.extract_strided_slice %150 {offsets = [0, 16], sizes = [16, 8], strides = [1, 1]} : vector<16x32xf32> to vector<16x8xf32>
    %182 = vector.extract_strided_slice %151 {offsets = [0, 16], sizes = [16, 8], strides = [1, 1]} : vector<16x32xf32> to vector<16x8xf32>
    %cst_77 = arith.constant dense<0.000000e+00> : vector<16x16xf32>
    %183 = tpu.matmul %181, %182, %cst_77 {dimension_numbers = #tpu.dot_dimension_numbers<[1], [1], [0], [0], [0, 0, 1, 0], [], []>} : vector<16x8xf32>, vector<16x8xf32>, vector<16x16xf32> -> vector<16x16xf32>
    %cst_78 = arith.constant dense<0xFF800000> : vector<16xf32>
    %184 = vector.multi_reduction <maximumf>, %183, %cst_78 [1] : vector<16x16xf32> to vector<16xf32>
    %185 = vector.shape_cast %184 : vector<16xf32> to vector<16x1xf32>
    %186 = vector.broadcast %185 : vector<16x1xf32> to vector<16x16xf32>
    %187 = arith.subf %183, %186 : vector<16x16xf32>
    %188 = math.exp %187 : vector<16x16xf32>
    %cst_79 = arith.constant dense<0.000000e+00> : vector<16xf32>
    %189 = vector.multi_reduction <add>, %188, %cst_79 [1] : vector<16x16xf32> to vector<16xf32>
    %190 = vector.shape_cast %189 : vector<16xf32> to vector<16x1xf32>
    %191 = vector.broadcast %190 : vector<16x1xf32> to vector<16x16xf32>
    %192 = arith.divf %188, %191 : vector<16x16xf32>
    %193 = vector.extract_strided_slice %152 {offsets = [0, 16], sizes = [16, 8], strides = [1, 1]} : vector<16x32xf32> to vector<16x8xf32>
    %cst_80 = arith.constant dense<0.000000e+00> : vector<16x8xf32>
    %194 = tpu.matmul %192, %193, %cst_80 {dimension_numbers = #tpu.dot_dimension_numbers<[1], [0], [0], [1], [0, 0, 1, 1], [], []>} : vector<16x16xf32>, vector<16x8xf32>, vector<16x8xf32> -> vector<16x8xf32>
    %195 = vector.extract_strided_slice %150 {offsets = [0, 24], sizes = [16, 8], strides = [1, 1]} : vector<16x32xf32> to vector<16x8xf32>
    %196 = vector.extract_strided_slice %151 {offsets = [0, 24], sizes = [16, 8], strides = [1, 1]} : vector<16x32xf32> to vector<16x8xf32>
    %cst_81 = arith.constant dense<0.000000e+00> : vector<16x16xf32>
    %197 = tpu.matmul %195, %196, %cst_81 {dimension_numbers = #tpu.dot_dimension_numbers<[1], [1], [0], [0], [0, 0, 1, 0], [], []>} : vector<16x8xf32>, vector<16x8xf32>, vector<16x16xf32> -> vector<16x16xf32>
    %cst_82 = arith.constant dense<0xFF800000> : vector<16xf32>
    %198 = vector.multi_reduction <maximumf>, %197, %cst_82 [1] : vector<16x16xf32> to vector<16xf32>
    %199 = vector.shape_cast %198 : vector<16xf32> to vector<16x1xf32>
    %200 = vector.broadcast %199 : vector<16x1xf32> to vector<16x16xf32>
    %201 = arith.subf %197, %200 : vector<16x16xf32>
    %202 = math.exp %201 : vector<16x16xf32>
    %cst_83 = arith.constant dense<0.000000e+00> : vector<16xf32>
    %203 = vector.multi_reduction <add>, %202, %cst_83 [1] : vector<16x16xf32> to vector<16xf32>
    %204 = vector.shape_cast %203 : vector<16xf32> to vector<16x1xf32>
    %205 = vector.broadcast %204 : vector<16x1xf32> to vector<16x16xf32>
    %206 = arith.divf %202, %205 : vector<16x16xf32>
    %207 = vector.extract_strided_slice %152 {offsets = [0, 24], sizes = [16, 8], strides = [1, 1]} : vector<16x32xf32> to vector<16x8xf32>
    %cst_84 = arith.constant dense<0.000000e+00> : vector<16x8xf32>
    %208 = tpu.matmul %206, %207, %cst_84 {dimension_numbers = #tpu.dot_dimension_numbers<[1], [0], [0], [1], [0, 0, 1, 1], [], []>} : vector<16x16xf32>, vector<16x8xf32>, vector<16x8xf32> -> vector<16x8xf32>
    %209 = tpu.concatenate %166, %180, %194, %208 in 1 : vector<16x8xf32>, vector<16x8xf32>, vector<16x8xf32>, vector<16x8xf32> -> vector<16x32xf32>
    %210 = vector.extract_strided_slice %138 {offsets = [16, 0], sizes = [16, 32], strides = [1, 1]} : vector<32x32xf32> to vector<16x32xf32>
    %211 = vector.extract_strided_slice %147 {offsets = [16, 0], sizes = [16, 32], strides = [1, 1]} : vector<32x32xf32> to vector<16x32xf32>
    %212 = vector.extract_strided_slice %109 {offsets = [16, 0], sizes = [16, 32], strides = [1, 1]} : vector<32x32xf32> to vector<16x32xf32>
    %213 = vector.extract_strided_slice %210 {offsets = [0, 0], sizes = [16, 8], strides = [1, 1]} : vector<16x32xf32> to vector<16x8xf32>
    %214 = vector.extract_strided_slice %211 {offsets = [0, 0], sizes = [16, 8], strides = [1, 1]} : vector<16x32xf32> to vector<16x8xf32>
    %cst_85 = arith.constant dense<0.000000e+00> : vector<16x16xf32>
    %215 = tpu.matmul %213, %214, %cst_85 {dimension_numbers = #tpu.dot_dimension_numbers<[1], [1], [0], [0], [0, 0, 1, 0], [], []>} : vector<16x8xf32>, vector<16x8xf32>, vector<16x16xf32> -> vector<16x16xf32>
    %cst_86 = arith.constant dense<0xFF800000> : vector<16xf32>
    %216 = vector.multi_reduction <maximumf>, %215, %cst_86 [1] : vector<16x16xf32> to vector<16xf32>
    %217 = vector.shape_cast %216 : vector<16xf32> to vector<16x1xf32>
    %218 = vector.broadcast %217 : vector<16x1xf32> to vector<16x16xf32>
    %219 = arith.subf %215, %218 : vector<16x16xf32>
    %220 = math.exp %219 : vector<16x16xf32>
    %cst_87 = arith.constant dense<0.000000e+00> : vector<16xf32>
    %221 = vector.multi_reduction <add>, %220, %cst_87 [1] : vector<16x16xf32> to vector<16xf32>
    %222 = vector.shape_cast %221 : vector<16xf32> to vector<16x1xf32>
    %223 = vector.broadcast %222 : vector<16x1xf32> to vector<16x16xf32>
    %224 = arith.divf %220, %223 : vector<16x16xf32>
    %225 = vector.extract_strided_slice %212 {offsets = [0, 0], sizes = [16, 8], strides = [1, 1]} : vector<16x32xf32> to vector<16x8xf32>
    %cst_88 = arith.constant dense<0.000000e+00> : vector<16x8xf32>
    %226 = tpu.matmul %224, %225, %cst_88 {dimension_numbers = #tpu.dot_dimension_numbers<[1], [0], [0], [1], [0, 0, 1, 1], [], []>} : vector<16x16xf32>, vector<16x8xf32>, vector<16x8xf32> -> vector<16x8xf32>
    %227 = vector.extract_strided_slice %210 {offsets = [0, 8], sizes = [16, 8], strides = [1, 1]} : vector<16x32xf32> to vector<16x8xf32>
    %228 = vector.extract_strided_slice %211 {offsets = [0, 8], sizes = [16, 8], strides = [1, 1]} : vector<16x32xf32> to vector<16x8xf32>
    %cst_89 = arith.constant dense<0.000000e+00> : vector<16x16xf32>
    %229 = tpu.matmul %227, %228, %cst_89 {dimension_numbers = #tpu.dot_dimension_numbers<[1], [1], [0], [0], [0, 0, 1, 0], [], []>} : vector<16x8xf32>, vector<16x8xf32>, vector<16x16xf32> -> vector<16x16xf32>
    %cst_90 = arith.constant dense<0xFF800000> : vector<16xf32>
    %230 = vector.multi_reduction <maximumf>, %229, %cst_90 [1] : vector<16x16xf32> to vector<16xf32>
    %231 = vector.shape_cast %230 : vector<16xf32> to vector<16x1xf32>
    %232 = vector.broadcast %231 : vector<16x1xf32> to vector<16x16xf32>
    %233 = arith.subf %229, %232 : vector<16x16xf32>
    %234 = math.exp %233 : vector<16x16xf32>
    %cst_91 = arith.constant dense<0.000000e+00> : vector<16xf32>
    %235 = vector.multi_reduction <add>, %234, %cst_91 [1] : vector<16x16xf32> to vector<16xf32>
    %236 = vector.shape_cast %235 : vector<16xf32> to vector<16x1xf32>
    %237 = vector.broadcast %236 : vector<16x1xf32> to vector<16x16xf32>
    %238 = arith.divf %234, %237 : vector<16x16xf32>
    %239 = vector.extract_strided_slice %212 {offsets = [0, 8], sizes = [16, 8], strides = [1, 1]} : vector<16x32xf32> to vector<16x8xf32>
    %cst_92 = arith.constant dense<0.000000e+00> : vector<16x8xf32>
    %240 = tpu.matmul %238, %239, %cst_92 {dimension_numbers = #tpu.dot_dimension_numbers<[1], [0], [0], [1], [0, 0, 1, 1], [], []>} : vector<16x16xf32>, vector<16x8xf32>, vector<16x8xf32> -> vector<16x8xf32>
    %241 = vector.extract_strided_slice %210 {offsets = [0, 16], sizes = [16, 8], strides = [1, 1]} : vector<16x32xf32> to vector<16x8xf32>
    %242 = vector.extract_strided_slice %211 {offsets = [0, 16], sizes = [16, 8], strides = [1, 1]} : vector<16x32xf32> to vector<16x8xf32>
    %cst_93 = arith.constant dense<0.000000e+00> : vector<16x16xf32>
    %243 = tpu.matmul %241, %242, %cst_93 {dimension_numbers = #tpu.dot_dimension_numbers<[1], [1], [0], [0], [0, 0, 1, 0], [], []>} : vector<16x8xf32>, vector<16x8xf32>, vector<16x16xf32> -> vector<16x16xf32>
    %cst_94 = arith.constant dense<0xFF800000> : vector<16xf32>
    %244 = vector.multi_reduction <maximumf>, %243, %cst_94 [1] : vector<16x16xf32> to vector<16xf32>
    %245 = vector.shape_cast %244 : vector<16xf32> to vector<16x1xf32>
    %246 = vector.broadcast %245 : vector<16x1xf32> to vector<16x16xf32>
    %247 = arith.subf %243, %246 : vector<16x16xf32>
    %248 = math.exp %247 : vector<16x16xf32>
    %cst_95 = arith.constant dense<0.000000e+00> : vector<16xf32>
    %249 = vector.multi_reduction <add>, %248, %cst_95 [1] : vector<16x16xf32> to vector<16xf32>
    %250 = vector.shape_cast %249 : vector<16xf32> to vector<16x1xf32>
    %251 = vector.broadcast %250 : vector<16x1xf32> to vector<16x16xf32>
    %252 = arith.divf %248, %251 : vector<16x16xf32>
    %253 = vector.extract_strided_slice %212 {offsets = [0, 16], sizes = [16, 8], strides = [1, 1]} : vector<16x32xf32> to vector<16x8xf32>
    %cst_96 = arith.constant dense<0.000000e+00> : vector<16x8xf32>
    %254 = tpu.matmul %252, %253, %cst_96 {dimension_numbers = #tpu.dot_dimension_numbers<[1], [0], [0], [1], [0, 0, 1, 1], [], []>} : vector<16x16xf32>, vector<16x8xf32>, vector<16x8xf32> -> vector<16x8xf32>
    %255 = vector.extract_strided_slice %210 {offsets = [0, 24], sizes = [16, 8], strides = [1, 1]} : vector<16x32xf32> to vector<16x8xf32>
    %256 = vector.extract_strided_slice %211 {offsets = [0, 24], sizes = [16, 8], strides = [1, 1]} : vector<16x32xf32> to vector<16x8xf32>
    %cst_97 = arith.constant dense<0.000000e+00> : vector<16x16xf32>
    %257 = tpu.matmul %255, %256, %cst_97 {dimension_numbers = #tpu.dot_dimension_numbers<[1], [1], [0], [0], [0, 0, 1, 0], [], []>} : vector<16x8xf32>, vector<16x8xf32>, vector<16x16xf32> -> vector<16x16xf32>
    %cst_98 = arith.constant dense<0xFF800000> : vector<16xf32>
    %258 = vector.multi_reduction <maximumf>, %257, %cst_98 [1] : vector<16x16xf32> to vector<16xf32>
    %259 = vector.shape_cast %258 : vector<16xf32> to vector<16x1xf32>
    %260 = vector.broadcast %259 : vector<16x1xf32> to vector<16x16xf32>
    %261 = arith.subf %257, %260 : vector<16x16xf32>
    %262 = math.exp %261 : vector<16x16xf32>
    %cst_99 = arith.constant dense<0.000000e+00> : vector<16xf32>
    %263 = vector.multi_reduction <add>, %262, %cst_99 [1] : vector<16x16xf32> to vector<16xf32>
    %264 = vector.shape_cast %263 : vector<16xf32> to vector<16x1xf32>
    %265 = vector.broadcast %264 : vector<16x1xf32> to vector<16x16xf32>
    %266 = arith.divf %262, %265 : vector<16x16xf32>
    %267 = vector.extract_strided_slice %212 {offsets = [0, 24], sizes = [16, 8], strides = [1, 1]} : vector<16x32xf32> to vector<16x8xf32>
    %cst_100 = arith.constant dense<0.000000e+00> : vector<16x8xf32>
    %268 = tpu.matmul %266, %267, %cst_100 {dimension_numbers = #tpu.dot_dimension_numbers<[1], [0], [0], [1], [0, 0, 1, 1], [], []>} : vector<16x16xf32>, vector<16x8xf32>, vector<16x8xf32> -> vector<16x8xf32>
    %269 = tpu.concatenate %226, %240, %254, %268 in 1 : vector<16x8xf32>, vector<16x8xf32>, vector<16x8xf32>, vector<16x8xf32> -> vector<16x32xf32>
    %270 = tpu.concatenate %209, %269 in 0 : vector<16x32xf32>, vector<16x32xf32> -> vector<32x32xf32>
    %271 = arith.truncf %270 : vector<32x32xf32> to vector<32x32xbf16>
    %cst_101 = arith.constant dense<0.000000e+00> : vector<32x32xf32>
    %272 = tpu.matmul %271, %148, %cst_101 {dimension_numbers = #tpu.dot_dimension_numbers<[1], [0], [0], [1], [0, 0, 1, 1], [], []>} : vector<32x32xbf16>, vector<32x32xbf16>, vector<32x32xf32> -> vector<32x32xf32>
    %273 = vector.broadcast %149 : vector<1x32xf32> to vector<32x32xf32>
    %274 = arith.addf %272, %273 : vector<32x32xf32>
    %275 = arith.mulf %274, %37 : vector<32x32xf32>
    %276 = arith.addf %76, %275 : vector<32x32xf32>
    %cst_102 = arith.constant dense<0.000000e+00> : vector<32xf32>
    %277 = vector.multi_reduction <add>, %276, %cst_102 [1] : vector<32x32xf32> to vector<32xf32>
    %278 = vector.shape_cast %277 : vector<32xf32> to vector<32x1xf32>
    %cst_103 = arith.constant 3.200000e+01 : f32
    %279 = vector.broadcast %cst_103 : f32 to vector<32x1xf32>
    %280 = arith.divf %278, %279 : vector<32x1xf32>
    %281 = vector.broadcast %280 : vector<32x1xf32> to vector<32x32xf32>
    %282 = arith.subf %276, %281 : vector<32x32xf32>
    %283 = arith.mulf %282, %282 : vector<32x32xf32>
    %cst_104 = arith.constant dense<0.000000e+00> : vector<32xf32>
    %284 = vector.multi_reduction <add>, %283, %cst_104 [1] : vector<32x32xf32> to vector<32xf32>
    %285 = vector.shape_cast %284 : vector<32xf32> to vector<32x1xf32>
    %cst_105 = arith.constant 3.200000e+01 : f32
    %286 = vector.broadcast %cst_105 : f32 to vector<32x1xf32>
    %287 = arith.divf %285, %286 : vector<32x1xf32>
    %288 = vector.broadcast %280 : vector<32x1xf32> to vector<32x32xf32>
    %289 = arith.subf %276, %288 : vector<32x32xf32>
    %cst_106 = arith.constant 9.99999997E-7 : f32
    %290 = vector.broadcast %cst_106 : f32 to vector<32x1xf32>
    %291 = arith.addf %287, %290 : vector<32x1xf32>
    %292 = math.rsqrt %291 : vector<32x1xf32>
    %293 = vector.broadcast %292 : vector<32x1xf32> to vector<32x32xf32>
    %294 = arith.mulf %289, %293 : vector<32x32xf32>
    %c4_107 = arith.constant 4 : index
    %c0_108 = arith.constant 0 : index
    %295 = vector.load %arg5[%c4_107, %c0_108] : memref<20x160xf32, #tpu.memory_space<vmem>>, vector<1x32xf32>
    %296 = vector.broadcast %295 : vector<1x32xf32> to vector<32x32xf32>
    %297 = arith.mulf %294, %296 : vector<32x32xf32>
    %c5_109 = arith.constant 5 : index
    %c0_110 = arith.constant 0 : index
    %298 = vector.load %arg5[%c5_109, %c0_110] : memref<20x160xf32, #tpu.memory_space<vmem>>, vector<1x32xf32>
    %299 = vector.broadcast %298 : vector<1x32xf32> to vector<32x32xf32>
    %300 = arith.addf %297, %299 : vector<32x32xf32>
    %c0_111 = arith.constant 0 : index
    %c192 = arith.constant 192 : index
    %301 = vector.load %arg6[%c0_111, %c192] : memref<32x384xbf16, #tpu.memory_space<vmem>>, vector<32x32xbf16>
    %302 = arith.truncf %300 : vector<32x32xf32> to vector<32x32xbf16>
    %cst_112 = arith.constant dense<0.000000e+00> : vector<32x32xf32>
    %303 = tpu.matmul %302, %301, %cst_112 {dimension_numbers = #tpu.dot_dimension_numbers<[1], [0], [0], [1], [0, 0, 1, 1], [], []>} : vector<32x32xbf16>, vector<32x32xbf16>, vector<32x32xf32> -> vector<32x32xf32>
    %c6_113 = arith.constant 6 : index
    %c0_114 = arith.constant 0 : index
    %304 = vector.load %arg5[%c6_113, %c0_114] : memref<20x160xf32, #tpu.memory_space<vmem>>, vector<1x32xf32>
    %305 = vector.broadcast %304 : vector<1x32xf32> to vector<32x32xf32>
    %306 = arith.addf %303, %305 : vector<32x32xf32>
    %c0_115 = arith.constant 0 : index
    %c224 = arith.constant 224 : index
    %307 = vector.load %arg6[%c0_115, %c224] : memref<32x384xbf16, #tpu.memory_space<vmem>>, vector<32x64xbf16>
    %308 = arith.truncf %2 : vector<16x32xf32> to vector<16x32xbf16>
    %cst_116 = arith.constant dense<0.000000e+00> : vector<16x64xf32>
    %309 = tpu.matmul %308, %307, %cst_116 {dimension_numbers = #tpu.dot_dimension_numbers<[1], [0], [0], [1], [0, 0, 1, 1], [], []>} : vector<16x32xbf16>, vector<32x64xbf16>, vector<16x64xf32> -> vector<16x64xf32>
    %c7_117 = arith.constant 7 : index
    %c0_118 = arith.constant 0 : index
    %310 = vector.load %arg5[%c7_117, %c0_118] : memref<20x160xf32, #tpu.memory_space<vmem>>, vector<1x64xf32>
    %311 = vector.broadcast %310 : vector<1x64xf32> to vector<16x64xf32>
    %312 = arith.addf %309, %311 : vector<16x64xf32>
    %313 = vector.extract_strided_slice %312 {offsets = [0, 0], sizes = [16, 32], strides = [1, 1]} : vector<16x64xf32> to vector<16x32xf32>
    %314 = vector.extract_strided_slice %312 {offsets = [0, 32], sizes = [16, 32], strides = [1, 1]} : vector<16x64xf32> to vector<16x32xf32>
    %315 = arith.mulf %306, %306 : vector<32x32xf32>
    %cst_119 = arith.constant dense<0.000000e+00> : vector<32xf32>
    %316 = vector.multi_reduction <add>, %315, %cst_119 [1] : vector<32x32xf32> to vector<32xf32>
    %317 = vector.shape_cast %316 : vector<32xf32> to vector<32x1xf32>
    %cst_120 = arith.constant 3.200000e+01 : f32
    %318 = vector.broadcast %cst_120 : f32 to vector<32x1xf32>
    %319 = arith.divf %317, %318 : vector<32x1xf32>
    %cst_121 = arith.constant 9.99999997E-7 : f32
    %320 = vector.broadcast %cst_121 : f32 to vector<32x1xf32>
    %321 = arith.addf %319, %320 : vector<32x1xf32>
    %322 = math.rsqrt %321 : vector<32x1xf32>
    %323 = vector.broadcast %322 : vector<32x1xf32> to vector<32x32xf32>
    %324 = arith.mulf %306, %323 : vector<32x32xf32>
    %c8_122 = arith.constant 8 : index
    %c0_123 = arith.constant 0 : index
    %325 = vector.load %arg5[%c8_122, %c0_123] : memref<20x160xf32, #tpu.memory_space<vmem>>, vector<1x32xf32>
    %326 = vector.broadcast %325 : vector<1x32xf32> to vector<32x32xf32>
    %327 = arith.mulf %324, %326 : vector<32x32xf32>
    %328 = arith.mulf %313, %313 : vector<16x32xf32>
    %cst_124 = arith.constant dense<0.000000e+00> : vector<16xf32>
    %329 = vector.multi_reduction <add>, %328, %cst_124 [1] : vector<16x32xf32> to vector<16xf32>
    %330 = vector.shape_cast %329 : vector<16xf32> to vector<16x1xf32>
    %cst_125 = arith.constant 3.200000e+01 : f32
    %331 = vector.broadcast %cst_125 : f32 to vector<16x1xf32>
    %332 = arith.divf %330, %331 : vector<16x1xf32>
    %cst_126 = arith.constant 9.99999997E-7 : f32
    %333 = vector.broadcast %cst_126 : f32 to vector<16x1xf32>
    %334 = arith.addf %332, %333 : vector<16x1xf32>
    %335 = math.rsqrt %334 : vector<16x1xf32>
    %336 = vector.broadcast %335 : vector<16x1xf32> to vector<16x32xf32>
    %337 = arith.mulf %313, %336 : vector<16x32xf32>
    %c9_127 = arith.constant 9 : index
    %c0_128 = arith.constant 0 : index
    %338 = vector.load %arg5[%c9_127, %c0_128] : memref<20x160xf32, #tpu.memory_space<vmem>>, vector<1x32xf32>
    %339 = vector.broadcast %338 : vector<1x32xf32> to vector<16x32xf32>
    %340 = arith.mulf %337, %339 : vector<16x32xf32>
    %c0_129 = arith.constant 0 : index
    %c288 = arith.constant 288 : index
    %341 = vector.load %arg6[%c0_129, %c288] : memref<32x384xbf16, #tpu.memory_space<vmem>>, vector<32x32xbf16>
    %c10_130 = arith.constant 10 : index
    %c0_131 = arith.constant 0 : index
    %342 = vector.load %arg5[%c10_130, %c0_131] : memref<20x160xf32, #tpu.memory_space<vmem>>, vector<1x32xf32>
    %343 = vector.extract_strided_slice %327 {offsets = [0, 0], sizes = [16, 32], strides = [1, 1]} : vector<32x32xf32> to vector<16x32xf32>
    %344 = vector.extract_strided_slice %340 {offsets = [0, 0], sizes = [8, 32], strides = [1, 1]} : vector<16x32xf32> to vector<8x32xf32>
    %345 = vector.extract_strided_slice %314 {offsets = [0, 0], sizes = [8, 32], strides = [1, 1]} : vector<16x32xf32> to vector<8x32xf32>
    %346 = vector.extract_strided_slice %343 {offsets = [0, 0], sizes = [16, 8], strides = [1, 1]} : vector<16x32xf32> to vector<16x8xf32>
    %347 = vector.extract_strided_slice %344 {offsets = [0, 0], sizes = [8, 8], strides = [1, 1]} : vector<8x32xf32> to vector<8x8xf32>
    %cst_132 = arith.constant dense<0.000000e+00> : vector<16x8xf32>
    %348 = tpu.matmul %346, %347, %cst_132 {dimension_numbers = #tpu.dot_dimension_numbers<[1], [1], [0], [0], [0, 0, 1, 0], [], []>} : vector<16x8xf32>, vector<8x8xf32>, vector<16x8xf32> -> vector<16x8xf32>
    %cst_133 = arith.constant dense<0xFF800000> : vector<16xf32>
    %349 = vector.multi_reduction <maximumf>, %348, %cst_133 [1] : vector<16x8xf32> to vector<16xf32>
    %350 = vector.shape_cast %349 : vector<16xf32> to vector<16x1xf32>
    %351 = vector.broadcast %350 : vector<16x1xf32> to vector<16x8xf32>
    %352 = arith.subf %348, %351 : vector<16x8xf32>
    %353 = math.exp %352 : vector<16x8xf32>
    %cst_134 = arith.constant dense<0.000000e+00> : vector<16xf32>
    %354 = vector.multi_reduction <add>, %353, %cst_134 [1] : vector<16x8xf32> to vector<16xf32>
    %355 = vector.shape_cast %354 : vector<16xf32> to vector<16x1xf32>
    %356 = vector.broadcast %355 : vector<16x1xf32> to vector<16x8xf32>
    %357 = arith.divf %353, %356 : vector<16x8xf32>
    %358 = vector.extract_strided_slice %345 {offsets = [0, 0], sizes = [8, 8], strides = [1, 1]} : vector<8x32xf32> to vector<8x8xf32>
    %cst_135 = arith.constant dense<0.000000e+00> : vector<16x8xf32>
    %359 = tpu.matmul %357, %358, %cst_135 {dimension_numbers = #tpu.dot_dimension_numbers<[1], [0], [0], [1], [0, 0, 1, 1], [], []>} : vector<16x8xf32>, vector<8x8xf32>, vector<16x8xf32> -> vector<16x8xf32>
    %360 = vector.extract_strided_slice %343 {offsets = [0, 8], sizes = [16, 8], strides = [1, 1]} : vector<16x32xf32> to vector<16x8xf32>
    %361 = vector.extract_strided_slice %344 {offsets = [0, 8], sizes = [8, 8], strides = [1, 1]} : vector<8x32xf32> to vector<8x8xf32>
    %cst_136 = arith.constant dense<0.000000e+00> : vector<16x8xf32>
    %362 = tpu.matmul %360, %361, %cst_136 {dimension_numbers = #tpu.dot_dimension_numbers<[1], [1], [0], [0], [0, 0, 1, 0], [], []>} : vector<16x8xf32>, vector<8x8xf32>, vector<16x8xf32> -> vector<16x8xf32>
    %cst_137 = arith.constant dense<0xFF800000> : vector<16xf32>
    %363 = vector.multi_reduction <maximumf>, %362, %cst_137 [1] : vector<16x8xf32> to vector<16xf32>
    %364 = vector.shape_cast %363 : vector<16xf32> to vector<16x1xf32>
    %365 = vector.broadcast %364 : vector<16x1xf32> to vector<16x8xf32>
    %366 = arith.subf %362, %365 : vector<16x8xf32>
    %367 = math.exp %366 : vector<16x8xf32>
    %cst_138 = arith.constant dense<0.000000e+00> : vector<16xf32>
    %368 = vector.multi_reduction <add>, %367, %cst_138 [1] : vector<16x8xf32> to vector<16xf32>
    %369 = vector.shape_cast %368 : vector<16xf32> to vector<16x1xf32>
    %370 = vector.broadcast %369 : vector<16x1xf32> to vector<16x8xf32>
    %371 = arith.divf %367, %370 : vector<16x8xf32>
    %372 = vector.extract_strided_slice %345 {offsets = [0, 8], sizes = [8, 8], strides = [1, 1]} : vector<8x32xf32> to vector<8x8xf32>
    %cst_139 = arith.constant dense<0.000000e+00> : vector<16x8xf32>
    %373 = tpu.matmul %371, %372, %cst_139 {dimension_numbers = #tpu.dot_dimension_numbers<[1], [0], [0], [1], [0, 0, 1, 1], [], []>} : vector<16x8xf32>, vector<8x8xf32>, vector<16x8xf32> -> vector<16x8xf32>
    %374 = vector.extract_strided_slice %343 {offsets = [0, 16], sizes = [16, 8], strides = [1, 1]} : vector<16x32xf32> to vector<16x8xf32>
    %375 = vector.extract_strided_slice %344 {offsets = [0, 16], sizes = [8, 8], strides = [1, 1]} : vector<8x32xf32> to vector<8x8xf32>
    %cst_140 = arith.constant dense<0.000000e+00> : vector<16x8xf32>
    %376 = tpu.matmul %374, %375, %cst_140 {dimension_numbers = #tpu.dot_dimension_numbers<[1], [1], [0], [0], [0, 0, 1, 0], [], []>} : vector<16x8xf32>, vector<8x8xf32>, vector<16x8xf32> -> vector<16x8xf32>
    %cst_141 = arith.constant dense<0xFF800000> : vector<16xf32>
    %377 = vector.multi_reduction <maximumf>, %376, %cst_141 [1] : vector<16x8xf32> to vector<16xf32>
    %378 = vector.shape_cast %377 : vector<16xf32> to vector<16x1xf32>
    %379 = vector.broadcast %378 : vector<16x1xf32> to vector<16x8xf32>
    %380 = arith.subf %376, %379 : vector<16x8xf32>
    %381 = math.exp %380 : vector<16x8xf32>
    %cst_142 = arith.constant dense<0.000000e+00> : vector<16xf32>
    %382 = vector.multi_reduction <add>, %381, %cst_142 [1] : vector<16x8xf32> to vector<16xf32>
    %383 = vector.shape_cast %382 : vector<16xf32> to vector<16x1xf32>
    %384 = vector.broadcast %383 : vector<16x1xf32> to vector<16x8xf32>
    %385 = arith.divf %381, %384 : vector<16x8xf32>
    %386 = vector.extract_strided_slice %345 {offsets = [0, 16], sizes = [8, 8], strides = [1, 1]} : vector<8x32xf32> to vector<8x8xf32>
    %cst_143 = arith.constant dense<0.000000e+00> : vector<16x8xf32>
    %387 = tpu.matmul %385, %386, %cst_143 {dimension_numbers = #tpu.dot_dimension_numbers<[1], [0], [0], [1], [0, 0, 1, 1], [], []>} : vector<16x8xf32>, vector<8x8xf32>, vector<16x8xf32> -> vector<16x8xf32>
    %388 = vector.extract_strided_slice %343 {offsets = [0, 24], sizes = [16, 8], strides = [1, 1]} : vector<16x32xf32> to vector<16x8xf32>
    %389 = vector.extract_strided_slice %344 {offsets = [0, 24], sizes = [8, 8], strides = [1, 1]} : vector<8x32xf32> to vector<8x8xf32>
    %cst_144 = arith.constant dense<0.000000e+00> : vector<16x8xf32>
    %390 = tpu.matmul %388, %389, %cst_144 {dimension_numbers = #tpu.dot_dimension_numbers<[1], [1], [0], [0], [0, 0, 1, 0], [], []>} : vector<16x8xf32>, vector<8x8xf32>, vector<16x8xf32> -> vector<16x8xf32>
    %cst_145 = arith.constant dense<0xFF800000> : vector<16xf32>
    %391 = vector.multi_reduction <maximumf>, %390, %cst_145 [1] : vector<16x8xf32> to vector<16xf32>
    %392 = vector.shape_cast %391 : vector<16xf32> to vector<16x1xf32>
    %393 = vector.broadcast %392 : vector<16x1xf32> to vector<16x8xf32>
    %394 = arith.subf %390, %393 : vector<16x8xf32>
    %395 = math.exp %394 : vector<16x8xf32>
    %cst_146 = arith.constant dense<0.000000e+00> : vector<16xf32>
    %396 = vector.multi_reduction <add>, %395, %cst_146 [1] : vector<16x8xf32> to vector<16xf32>
    %397 = vector.shape_cast %396 : vector<16xf32> to vector<16x1xf32>
    %398 = vector.broadcast %397 : vector<16x1xf32> to vector<16x8xf32>
    %399 = arith.divf %395, %398 : vector<16x8xf32>
    %400 = vector.extract_strided_slice %345 {offsets = [0, 24], sizes = [8, 8], strides = [1, 1]} : vector<8x32xf32> to vector<8x8xf32>
    %cst_147 = arith.constant dense<0.000000e+00> : vector<16x8xf32>
    %401 = tpu.matmul %399, %400, %cst_147 {dimension_numbers = #tpu.dot_dimension_numbers<[1], [0], [0], [1], [0, 0, 1, 1], [], []>} : vector<16x8xf32>, vector<8x8xf32>, vector<16x8xf32> -> vector<16x8xf32>
    %402 = tpu.concatenate %359, %373, %387, %401 in 1 : vector<16x8xf32>, vector<16x8xf32>, vector<16x8xf32>, vector<16x8xf32> -> vector<16x32xf32>
    %403 = vector.extract_strided_slice %327 {offsets = [16, 0], sizes = [16, 32], strides = [1, 1]} : vector<32x32xf32> to vector<16x32xf32>
    %404 = vector.extract_strided_slice %340 {offsets = [8, 0], sizes = [8, 32], strides = [1, 1]} : vector<16x32xf32> to vector<8x32xf32>
    %405 = vector.extract_strided_slice %314 {offsets = [8, 0], sizes = [8, 32], strides = [1, 1]} : vector<16x32xf32> to vector<8x32xf32>
    %406 = vector.extract_strided_slice %403 {offsets = [0, 0], sizes = [16, 8], strides = [1, 1]} : vector<16x32xf32> to vector<16x8xf32>
    %407 = vector.extract_strided_slice %404 {offsets = [0, 0], sizes = [8, 8], strides = [1, 1]} : vector<8x32xf32> to vector<8x8xf32>
    %cst_148 = arith.constant dense<0.000000e+00> : vector<16x8xf32>
    %408 = tpu.matmul %406, %407, %cst_148 {dimension_numbers = #tpu.dot_dimension_numbers<[1], [1], [0], [0], [0, 0, 1, 0], [], []>} : vector<16x8xf32>, vector<8x8xf32>, vector<16x8xf32> -> vector<16x8xf32>
    %cst_149 = arith.constant dense<0xFF800000> : vector<16xf32>
    %409 = vector.multi_reduction <maximumf>, %408, %cst_149 [1] : vector<16x8xf32> to vector<16xf32>
    %410 = vector.shape_cast %409 : vector<16xf32> to vector<16x1xf32>
    %411 = vector.broadcast %410 : vector<16x1xf32> to vector<16x8xf32>
    %412 = arith.subf %408, %411 : vector<16x8xf32>
    %413 = math.exp %412 : vector<16x8xf32>
    %cst_150 = arith.constant dense<0.000000e+00> : vector<16xf32>
    %414 = vector.multi_reduction <add>, %413, %cst_150 [1] : vector<16x8xf32> to vector<16xf32>
    %415 = vector.shape_cast %414 : vector<16xf32> to vector<16x1xf32>
    %416 = vector.broadcast %415 : vector<16x1xf32> to vector<16x8xf32>
    %417 = arith.divf %413, %416 : vector<16x8xf32>
    %418 = vector.extract_strided_slice %405 {offsets = [0, 0], sizes = [8, 8], strides = [1, 1]} : vector<8x32xf32> to vector<8x8xf32>
    %cst_151 = arith.constant dense<0.000000e+00> : vector<16x8xf32>
    %419 = tpu.matmul %417, %418, %cst_151 {dimension_numbers = #tpu.dot_dimension_numbers<[1], [0], [0], [1], [0, 0, 1, 1], [], []>} : vector<16x8xf32>, vector<8x8xf32>, vector<16x8xf32> -> vector<16x8xf32>
    %420 = vector.extract_strided_slice %403 {offsets = [0, 8], sizes = [16, 8], strides = [1, 1]} : vector<16x32xf32> to vector<16x8xf32>
    %421 = vector.extract_strided_slice %404 {offsets = [0, 8], sizes = [8, 8], strides = [1, 1]} : vector<8x32xf32> to vector<8x8xf32>
    %cst_152 = arith.constant dense<0.000000e+00> : vector<16x8xf32>
    %422 = tpu.matmul %420, %421, %cst_152 {dimension_numbers = #tpu.dot_dimension_numbers<[1], [1], [0], [0], [0, 0, 1, 0], [], []>} : vector<16x8xf32>, vector<8x8xf32>, vector<16x8xf32> -> vector<16x8xf32>
    %cst_153 = arith.constant dense<0xFF800000> : vector<16xf32>
    %423 = vector.multi_reduction <maximumf>, %422, %cst_153 [1] : vector<16x8xf32> to vector<16xf32>
    %424 = vector.shape_cast %423 : vector<16xf32> to vector<16x1xf32>
    %425 = vector.broadcast %424 : vector<16x1xf32> to vector<16x8xf32>
    %426 = arith.subf %422, %425 : vector<16x8xf32>
    %427 = math.exp %426 : vector<16x8xf32>
    %cst_154 = arith.constant dense<0.000000e+00> : vector<16xf32>
    %428 = vector.multi_reduction <add>, %427, %cst_154 [1] : vector<16x8xf32> to vector<16xf32>
    %429 = vector.shape_cast %428 : vector<16xf32> to vector<16x1xf32>
    %430 = vector.broadcast %429 : vector<16x1xf32> to vector<16x8xf32>
    %431 = arith.divf %427, %430 : vector<16x8xf32>
    %432 = vector.extract_strided_slice %405 {offsets = [0, 8], sizes = [8, 8], strides = [1, 1]} : vector<8x32xf32> to vector<8x8xf32>
    %cst_155 = arith.constant dense<0.000000e+00> : vector<16x8xf32>
    %433 = tpu.matmul %431, %432, %cst_155 {dimension_numbers = #tpu.dot_dimension_numbers<[1], [0], [0], [1], [0, 0, 1, 1], [], []>} : vector<16x8xf32>, vector<8x8xf32>, vector<16x8xf32> -> vector<16x8xf32>
    %434 = vector.extract_strided_slice %403 {offsets = [0, 16], sizes = [16, 8], strides = [1, 1]} : vector<16x32xf32> to vector<16x8xf32>
    %435 = vector.extract_strided_slice %404 {offsets = [0, 16], sizes = [8, 8], strides = [1, 1]} : vector<8x32xf32> to vector<8x8xf32>
    %cst_156 = arith.constant dense<0.000000e+00> : vector<16x8xf32>
    %436 = tpu.matmul %434, %435, %cst_156 {dimension_numbers = #tpu.dot_dimension_numbers<[1], [1], [0], [0], [0, 0, 1, 0], [], []>} : vector<16x8xf32>, vector<8x8xf32>, vector<16x8xf32> -> vector<16x8xf32>
    %cst_157 = arith.constant dense<0xFF800000> : vector<16xf32>
    %437 = vector.multi_reduction <maximumf>, %436, %cst_157 [1] : vector<16x8xf32> to vector<16xf32>
    %438 = vector.shape_cast %437 : vector<16xf32> to vector<16x1xf32>
    %439 = vector.broadcast %438 : vector<16x1xf32> to vector<16x8xf32>
    %440 = arith.subf %436, %439 : vector<16x8xf32>
    %441 = math.exp %440 : vector<16x8xf32>
    %cst_158 = arith.constant dense<0.000000e+00> : vector<16xf32>
    %442 = vector.multi_reduction <add>, %441, %cst_158 [1] : vector<16x8xf32> to vector<16xf32>
    %443 = vector.shape_cast %442 : vector<16xf32> to vector<16x1xf32>
    %444 = vector.broadcast %443 : vector<16x1xf32> to vector<16x8xf32>
    %445 = arith.divf %441, %444 : vector<16x8xf32>
    %446 = vector.extract_strided_slice %405 {offsets = [0, 16], sizes = [8, 8], strides = [1, 1]} : vector<8x32xf32> to vector<8x8xf32>
    %cst_159 = arith.constant dense<0.000000e+00> : vector<16x8xf32>
    %447 = tpu.matmul %445, %446, %cst_159 {dimension_numbers = #tpu.dot_dimension_numbers<[1], [0], [0], [1], [0, 0, 1, 1], [], []>} : vector<16x8xf32>, vector<8x8xf32>, vector<16x8xf32> -> vector<16x8xf32>
    %448 = vector.extract_strided_slice %403 {offsets = [0, 24], sizes = [16, 8], strides = [1, 1]} : vector<16x32xf32> to vector<16x8xf32>
    %449 = vector.extract_strided_slice %404 {offsets = [0, 24], sizes = [8, 8], strides = [1, 1]} : vector<8x32xf32> to vector<8x8xf32>
    %cst_160 = arith.constant dense<0.000000e+00> : vector<16x8xf32>
    %450 = tpu.matmul %448, %449, %cst_160 {dimension_numbers = #tpu.dot_dimension_numbers<[1], [1], [0], [0], [0, 0, 1, 0], [], []>} : vector<16x8xf32>, vector<8x8xf32>, vector<16x8xf32> -> vector<16x8xf32>
    %cst_161 = arith.constant dense<0xFF800000> : vector<16xf32>
    %451 = vector.multi_reduction <maximumf>, %450, %cst_161 [1] : vector<16x8xf32> to vector<16xf32>
    %452 = vector.shape_cast %451 : vector<16xf32> to vector<16x1xf32>
    %453 = vector.broadcast %452 : vector<16x1xf32> to vector<16x8xf32>
    %454 = arith.subf %450, %453 : vector<16x8xf32>
    %455 = math.exp %454 : vector<16x8xf32>
    %cst_162 = arith.constant dense<0.000000e+00> : vector<16xf32>
    %456 = vector.multi_reduction <add>, %455, %cst_162 [1] : vector<16x8xf32> to vector<16xf32>
    %457 = vector.shape_cast %456 : vector<16xf32> to vector<16x1xf32>
    %458 = vector.broadcast %457 : vector<16x1xf32> to vector<16x8xf32>
    %459 = arith.divf %455, %458 : vector<16x8xf32>
    %460 = vector.extract_strided_slice %405 {offsets = [0, 24], sizes = [8, 8], strides = [1, 1]} : vector<8x32xf32> to vector<8x8xf32>
    %cst_163 = arith.constant dense<0.000000e+00> : vector<16x8xf32>
    %461 = tpu.matmul %459, %460, %cst_163 {dimension_numbers = #tpu.dot_dimension_numbers<[1], [0], [0], [1], [0, 0, 1, 1], [], []>} : vector<16x8xf32>, vector<8x8xf32>, vector<16x8xf32> -> vector<16x8xf32>
    %462 = tpu.concatenate %419, %433, %447, %461 in 1 : vector<16x8xf32>, vector<16x8xf32>, vector<16x8xf32>, vector<16x8xf32> -> vector<16x32xf32>
    %463 = tpu.concatenate %402, %462 in 0 : vector<16x32xf32>, vector<16x32xf32> -> vector<32x32xf32>
    %464 = arith.truncf %463 : vector<32x32xf32> to vector<32x32xbf16>
    %cst_164 = arith.constant dense<0.000000e+00> : vector<32x32xf32>
    %465 = tpu.matmul %464, %341, %cst_164 {dimension_numbers = #tpu.dot_dimension_numbers<[1], [0], [0], [1], [0, 0, 1, 1], [], []>} : vector<32x32xbf16>, vector<32x32xbf16>, vector<32x32xf32> -> vector<32x32xf32>
    %466 = vector.broadcast %342 : vector<1x32xf32> to vector<32x32xf32>
    %467 = arith.addf %465, %466 : vector<32x32xf32>
    %468 = arith.addf %276, %467 : vector<32x32xf32>
    %cst_165 = arith.constant dense<0.000000e+00> : vector<32xf32>
    %469 = vector.multi_reduction <add>, %468, %cst_165 [1] : vector<32x32xf32> to vector<32xf32>
    %470 = vector.shape_cast %469 : vector<32xf32> to vector<32x1xf32>
    %cst_166 = arith.constant 3.200000e+01 : f32
    %471 = vector.broadcast %cst_166 : f32 to vector<32x1xf32>
    %472 = arith.divf %470, %471 : vector<32x1xf32>
    %473 = vector.broadcast %472 : vector<32x1xf32> to vector<32x32xf32>
    %474 = arith.subf %468, %473 : vector<32x32xf32>
    %475 = arith.mulf %474, %474 : vector<32x32xf32>
    %cst_167 = arith.constant dense<0.000000e+00> : vector<32xf32>
    %476 = vector.multi_reduction <add>, %475, %cst_167 [1] : vector<32x32xf32> to vector<32xf32>
    %477 = vector.shape_cast %476 : vector<32xf32> to vector<32x1xf32>
    %cst_168 = arith.constant 3.200000e+01 : f32
    %478 = vector.broadcast %cst_168 : f32 to vector<32x1xf32>
    %479 = arith.divf %477, %478 : vector<32x1xf32>
    %480 = vector.broadcast %472 : vector<32x1xf32> to vector<32x32xf32>
    %481 = arith.subf %468, %480 : vector<32x32xf32>
    %cst_169 = arith.constant 9.99999997E-7 : f32
    %482 = vector.broadcast %cst_169 : f32 to vector<32x1xf32>
    %483 = arith.addf %479, %482 : vector<32x1xf32>
    %484 = math.rsqrt %483 : vector<32x1xf32>
    %485 = vector.broadcast %484 : vector<32x1xf32> to vector<32x32xf32>
    %486 = arith.mulf %481, %485 : vector<32x32xf32>
    %cst_170 = arith.constant 1.000000e+00 : f32
    %487 = vector.broadcast %cst_170 : f32 to vector<32x32xf32>
    %488 = arith.addf %487, %59 : vector<32x32xf32>
    %489 = arith.mulf %486, %488 : vector<32x32xf32>
    %490 = arith.addf %489, %48 : vector<32x32xf32>
    %c0_171 = arith.constant 0 : index
    %c320 = arith.constant 320 : index
    %491 = vector.load %arg6[%c0_171, %c320] : memref<32x384xbf16, #tpu.memory_space<vmem>>, vector<32x64xbf16>
    %492 = arith.truncf %490 : vector<32x32xf32> to vector<32x32xbf16>
    %cst_172 = arith.constant dense<0.000000e+00> : vector<32x64xf32>
    %493 = tpu.matmul %492, %491, %cst_172 {dimension_numbers = #tpu.dot_dimension_numbers<[1], [0], [0], [1], [0, 0, 1, 1], [], []>} : vector<32x32xbf16>, vector<32x64xbf16>, vector<32x64xf32> -> vector<32x64xf32>
    %c11_173 = arith.constant 11 : index
    %c0_174 = arith.constant 0 : index
    %494 = vector.load %arg5[%c11_173, %c0_174] : memref<20x160xf32, #tpu.memory_space<vmem>>, vector<1x64xf32>
    %495 = vector.broadcast %494 : vector<1x64xf32> to vector<32x64xf32>
    %496 = arith.addf %493, %495 : vector<32x64xf32>
    %cst_175 = arith.constant 5.000000e-01 : f32
    %497 = vector.broadcast %cst_175 : f32 to vector<32x64xf32>
    %498 = arith.mulf %497, %496 : vector<32x64xf32>
    %499 = arith.mulf %496, %496 : vector<32x64xf32>
    %500 = arith.mulf %499, %496 : vector<32x64xf32>
    %cst_176 = arith.constant 4.471500e-02 : f32
    %501 = vector.broadcast %cst_176 : f32 to vector<32x64xf32>
    %502 = arith.mulf %501, %500 : vector<32x64xf32>
    %503 = arith.addf %496, %502 : vector<32x64xf32>
    %cst_177 = arith.constant 0.797884583 : f32
    %504 = vector.broadcast %cst_177 : f32 to vector<32x64xf32>
    %505 = arith.mulf %504, %503 : vector<32x64xf32>
    %506 = math.tanh %505 : vector<32x64xf32>
    %cst_178 = arith.constant 1.000000e+00 : f32
    %507 = vector.broadcast %cst_178 : f32 to vector<32x64xf32>
    %508 = arith.addf %507, %506 : vector<32x64xf32>
    %509 = arith.mulf %498, %508 : vector<32x64xf32>
    %c0_179 = arith.constant 0 : index
    %c0_180 = arith.constant 0 : index
    %510 = vector.load %arg8[%c0_179, %c0_180] : memref<64x32xbf16, #tpu.memory_space<vmem>>, vector<64x32xbf16>
    %511 = arith.truncf %509 : vector<32x64xf32> to vector<32x64xbf16>
    %cst_181 = arith.constant dense<0.000000e+00> : vector<32x32xf32>
    %512 = tpu.matmul %511, %510, %cst_181 {dimension_numbers = #tpu.dot_dimension_numbers<[1], [0], [0], [1], [0, 0, 1, 1], [], []>} : vector<32x64xbf16>, vector<64x32xbf16>, vector<32x32xf32> -> vector<32x32xf32>
    %c12 = arith.constant 12 : index
    %c0_182 = arith.constant 0 : index
    %513 = vector.load %arg5[%c12, %c0_182] : memref<20x160xf32, #tpu.memory_space<vmem>>, vector<1x32xf32>
    %514 = vector.broadcast %513 : vector<1x32xf32> to vector<32x32xf32>
    %515 = arith.addf %512, %514 : vector<32x32xf32>
    %516 = arith.mulf %515, %70 : vector<32x32xf32>
    %517 = arith.addf %468, %516 : vector<32x32xf32>
    %c0_183 = arith.constant 0 : index
    %c32_184 = arith.constant 32 : index
    %518 = vector.load %arg7[%c0_183, %c32_184] : memref<32x64xf32, #tpu.memory_space<vmem>>, vector<32x32xf32>
    %cst_185 = arith.constant dense<0.000000e+00> : vector<32x32xf32>
    %519 = tpu.matmul %517, %518, %cst_185 {dimension_numbers = #tpu.dot_dimension_numbers<[1], [0], [0], [1], [0, 0, 1, 1], [], []>} : vector<32x32xf32>, vector<32x32xf32>, vector<32x32xf32> -> vector<32x32xf32>
    %c13 = arith.constant 13 : index
    %c0_186 = arith.constant 0 : index
    %520 = vector.load %arg5[%c13, %c0_186] : memref<20x160xf32, #tpu.memory_space<vmem>>, vector<1x32xf32>
    %521 = vector.broadcast %520 : vector<1x32xf32> to vector<32x32xf32>
    %522 = arith.addf %519, %521 : vector<32x32xf32>
    %523 = tpu.concatenate %517, %522 in 1 : vector<32x32xf32>, vector<32x32xf32> -> vector<32x64xf32>
    %c0_187 = arith.constant 0 : index
    %c0_188 = arith.constant 0 : index
    %524 = vector.load %arg9[%c0_187, %c0_188] : memref<32x64xf32, #tpu.memory_space<vmem>>, vector<32x64xf32>
    tpu.vector_store %arg9[%c0_187, %c0_188], %523 {strides = array<i32>} : memref<32x64xf32, #tpu.memory_space<vmem>>, vector<32x64xf32>,
    return
  }
}

</mosaic_0001>

<bundles_post_ra>
// kernel: wan_vace_block_forward.1
= control target key start
LH: loop header
LB: loop body
LE: loop exit
PB: predicated region body
PF: predicated region fallthrough
CT: control target
= control target key end

     0   :  { %14 = vsyncpa [#allocation3], 0  ;;  %s5366_s0 = inlined_call_operand.hbm [shape: f32[32,32], index: 0, kind: input, shape index: {}]   ;;  %s5367_s1 = inlined_call_operand.hbm [shape: f32[32,32], index: 1, kind: input, shape index: {}]   ;;  %s5368_s2 = inlined_call_operand.hbm [shape: f32[16,32], index: 2, kind: input, shape index: {}]   ;;  %s5369_s3 = inlined_call_operand.vmem [shape: f32[12,32], index: 3, kind: input, shape index: {}]   ;;  %s5370_s4 = inlined_call_operand.hbm [shape: f32[32,64], index: 4, kind: input, shape index: {}]   ;;  %s5371_s5 = inlined_call_operand.vmem [shape: f32[20,160], index: 5, kind: input, shape index: {}]   ;;  %s5372_s6 = inlined_call_operand.vmem [shape: bf16[32,384], index: 6, kind: input, shape index: {}]   ;;  %s5373_s7 = inlined_call_operand.hbm [shape: f32[32,64], index: 7, kind: input, shape index: {}]   ;;  %s5374_s8 = inlined_call_operand.vmem [shape: bf16[64,32], index: 8, kind: input, shape index: {}]   ;;  %s5375_s9 = inlined_call_operand.vmem [shape: f32[32,64], index: 9, kind: output, shape index: {}]  }
   0x1   :  { %15 = vsyncpa [#allocation5], 0 }
   0x2   :  { %16 = vsyncpa [#allocation8], 0  ;;  %s34_s11 = sshll.u32 %s5367_s1, 4  ;;  %s3987_s12 = smov [#allocation4]   ;;  %s35_s11 = int_to_ptr.hbm [resolvable:$true] %s34_s11 }
   0x3   :  { %s36_s13 = sshll.u32 %s3987_s12, 4  ;;  %s62_s16 = sshll.u32 %s5370_s4, 4  ;;  %s37_s13 = int_to_ptr.vmem [resolvable:$true] %s36_s13  ;;  %s63_s16 = int_to_ptr.hbm [resolvable:$true] %s62_s16 }
   0x4   :  { %s3988_s17 = smov 128   ;;  %s3989_s18 = smov 8  }
   0x5   :  { %42 = dma.hbm_to_vmem [thread:$0]  %s35_s11, 512, %s37_s13, [#allocation5], %s3988_s17, %s3988_s17, %s3989_s18  }
   0x6   :  { %s3990_s19 = smov [#allocation7]   ;;  %s21_s23 = sshll.u32 %s5366_s0, 4  ;;  %s22_s23 = int_to_ptr.hbm [resolvable:$true] %s21_s23 }
   0x7   :  { %s64_s20 = sshll.u32 %s3990_s19, 4  ;;  %s47_s25 = sshll.u32 %s5368_s2, 4  ;;  %s65_s20 = int_to_ptr.vmem [resolvable:$true] %s64_s20  ;;  %s48_s25 = int_to_ptr.hbm [resolvable:$true] %s47_s25 }
   0x8   :  { %70 = dma.hbm_to_vmem [thread:$0]  %s63_s16, 512, %s65_s20, [#allocation8], %s3988_s17, %s3988_s17, %s3989_s18  }
   0x9   :  { %s3991_s4 = smov [#allocation2]   ;;  %s3992_s27 = smov [#allocation6]  }
   0xa   :  { %s23_s26 = sshll.u32 %s3991_s4, 4  ;;  %s49_s28 = sshll.u32 %s3992_s27, 4  ;;  %s24_s26 = int_to_ptr.vmem [resolvable:$true] %s23_s26  ;;  %s50_s28 = int_to_ptr.vmem [resolvable:$true] %s49_s28 }
   0xb   :  { %29 = dma.hbm_to_vmem [thread:$0]  %s22_s23, 512, %s24_s26, [#allocation3], %s3988_s17, %s3988_s17, %s3989_s18  }
   0xc   :  { %s79_s0 = sshll.u32 %s5373_s7, 4  ;;  %s3993_s10 = smov [#allocation9]   ;;  %s80_s0 = int_to_ptr.hbm [resolvable:$true] %s79_s0 }
   0xd   :  { %55 = dma.hbm_to_vmem [thread:$0]  %s48_s25, 256, %s50_s28, [#allocation5], %s3988_s17, %s3988_s17, %s3989_s18  }
   0xe   :  { %s81_s11 = sshll.u32 %s3993_s10, 4  ;;  %s82_s11 = int_to_ptr.vmem [resolvable:$true] %s81_s11 }
   0xf   :  { %87 = dma.hbm_to_vmem [thread:$0]  %s80_s0, 512, %s82_s11, [#allocation8], %s3988_s17, %s3988_s17, %s3989_s18  }
  0x10   :  { %3981 = dma.done.wait [#allocation3], 512  }
  0x11   :  { %3982 = vsyncadd [#allocation3], 4294966784 }
  0x12   :  { %3983 = dma.done.wait [#allocation5], 768  }
  0x13   :  { %3984 = vsyncadd [#allocation5], 4294966528 }
  0x14   :  { %3985 = dma.done.wait [#allocation8], 1024  }
  0x15   :  { %3986 = vsyncadd [#allocation8], 4294966272  ;;  %v4079_v0 = vld [vmem:[#allocation9 + $0x18] sm:$0xff]  ;;  %v4081_v1 = vld [vmem:[#allocation9 + $0x10] sm:$0xff]  ;;  %vm172_vm0 = vcmask 261120   ;;  %v3994_v19 = vmov 32.0  }
  0x16   :  { %197 = vmatpush.msra.mxu0 %v4079_v0  ;;  %v3661_v2 = vpack.i.bf16 %v4081_v1, %v4079_v0  ;;  %v4086_v3 = vld [vmem:[#allocation9 + $0x8] sm:$0xff]  ;;  %v4088_v4 = vld [vmem:[#allocation9] sm:$0xff]  ;;  %v115_v6 = vld [vmem:[#allocation4] sm:$0xff]  ;;  %3671 = vrcp.f32 %v3994_v19  ;;  %s3995_s27 = smov 64   ;;  %s3996_s16 = smov 96  }
  0x17   :  { %v3666_v5 = vpack.i.bf16 %v4088_v4, %v4086_v3  ;;  %v116_v7 = vld [vmem:[#allocation4 + $0x8] sm:$0xff]  ;;  %v4100_v8 = vld [vmem:[%s5371_s5 + $0x2] ss:$0 sm:$0xff]  ;;  %v117_v22 = vld [vmem:[#allocation4 + $0x10] sm:$0xff]  ;;  %s3997_s22 = smov 120   ;;  %s3998_s23 = smov 56  }
  0x18   :  { %198 = vmatpush.msra.mxu0 %v4081_v1  ;;  %v111_v9 = vld [vmem:[#allocation2] sm:$0xff]  ;;  %v112_v14 = vld [vmem:[#allocation2 + $0x8] sm:$0xff]  ;;  %v113_v39 = vld [vmem:[#allocation2 + $0x10] sm:$0xff]  ;;  %s3999_s1 = smov 48   ;;  %s4000_s24 = smov 40  }
  0x19   :  { %v3365_v42 = vld [vmem:[%s5372_s6 + $0x18] sm:$0xf]  ;;  %v3529_v43 = vld [vmem:[%s5372_s6 + $0x20] sm:$0xf0]  ;;  %v3528_v44 = vld [vmem:[%s5372_s6 + $0x1c] sm:$0xf] }
  0x1a   :  { %199 = vmatpush.msra.mxu0 %v4086_v3  ;;  %v3366_v45 = vor.u32 %v3529_v43, %v3365_v42  ;;  %v3367_v46 = vld [vmem:[%s5372_s6 + $0x24] sm:$0xf0]  ;;  %v3357_v47 = vld [vmem:[%s5372_s6] sm:$0xf]  ;;  %v3527_v48 = vld [vmem:[%s5372_s6 + $0x8] sm:$0xf0] }
  0x1b   :  { %v3370_v49 = vor.u32 %v3528_v44, %v3367_v46  ;;  %v3526_v50 = vld [vmem:[%s5372_s6 + $0x4] sm:$0xf]  ;;  %v3359_v51 = vld [vmem:[%s5372_s6 + $0xc] sm:$0xf0]  ;;  %v3358_v53 = vor.u32 %v3527_v48, %v3357_v47  ;;  %v4159_v57 = vld [vmem:[#allocation7 + $0x8] sm:$0xff]  ;;  %s4001_s25 = smov 112  }
  0x1c   :  { %200 = vmatpush.msra.mxu0 %v4088_v4  ;;  %v3672_v20 = vpop.eup %3671  ;;  %367 = vmatpush.bf16.msra.mxu1 %v3366_v45  ;;  %v3362_v55 = vor.u32 %v3526_v50, %v3359_v51  ;;  %v118_v58 = vld [vmem:[#allocation4 + $0x18] sm:$0xff]  ;;  %s4002_s4 = smov 104   ;;  %s4003_s26 = smov 16  }
  0x1d   :  { %3351 = vmatmul.msk.f32.vlgmr.msra.gmra.mxu0 %vm172_vm0, %v115_v6  ;;  %v231_v21 = vmul.f32 32.0, %v3672_v20  ;;  %vm235_vm1 = vweird.f32 %v3672_v20  ;;  %386 = vmatpush.bf16.msra.mxu2 %v3370_v49  ;;  %v114_v50 = vld [vmem:[#allocation2 + $0x18] sm:$0xff]  ;;  %s4004_s12 = smov 24   ;;  %s4005_s19 = smov 32  }
  0x1f   :  { %v232_v23 = vsub.f32 1.0, %v231_v21 }
  0x20   :  { %368 = vmatpush.bf16.msra.mxu1 %v3358_v53  ;;  %v4211_v53 = vld [vmem:[%s5371_s5 + $0x1] ss:$0 sm:$0xff] }
  0x21   :  { %v233_v24 = vmul.f32 %v3672_v20, %v232_v23  ;;  %387 = vmatpush.bf16.msra.mxu2 %v3362_v55  ;;  %v125_v23 = vld [vmem:[%s5369_s3] sm:$0x1] }
  0x23   :  { %v234_v25 = vadd.f32 %v3672_v20, %v233_v24  ;;  %v4184_v24 = vld [vmem:[%s5371_s5 + $0x16] ss:$0 sm:$0xff] }
  0x25   :  { %3352 = vmatmul.msk.f32.gmra.mxu0 %vm172_vm0, %v116_v7  ;;  %v4113_v26 = vsel %vm235_vm1, %v3672_v20, %v234_v25 }
  0x2d   :  { %3353 = vmatmul.msk.f32.gmra.mxu0 %vm172_vm0, %v117_v22 }
  0x35   :  { %3354 = vmatmul.msk.f32.gmra.mxu0 %vm172_vm0, %v118_v58 }
  0x9a   :  { %v202_v10 = vpop.f32.mrf.mxu0 }
  0x9b   :  { %v203_v11 = vadd.f32 %v202_v10, %v4100_v8  ;;  %v4171_v10 = vld [vmem:[%s5371_s5 + $0x17] ss:$0 sm:$0xff] }
  0x9d   :  { %v4103_v12 = vadd.f32 %v203_v11, %v111_v9  ;;  %v132_v9 = vld [vmem:[%s5369_s3 + $0x1] sm:$0x1] }
  0x9f   :  { %v218_v13 = vsel %vm172_vm0, %v4103_v12, 0.0 }
  0xa0   :  { %219 = vadd.xlane.f32.xlu0 %v218_v13 }
  0xa2   :  { %v205_v15 = vpop.f32.mrf.mxu0 }
  0xa3   :  { %v206_v16 = vadd.f32 %v205_v15, %v4100_v8  ;;  %v4174_v15 = vld [vmem:[#allocation7] sm:$0xff] }
  0xa5   :  { %v4108_v17 = vadd.f32 %v206_v16, %v112_v14  ;;  %v134_v14 = vadd.f32 %v4171_v10, %v132_v9 }
  0xa7   :  { %v221_v18 = vsel %vm172_vm0, %v4108_v17, 0.0  ;;  %v135_v20 = vperm.slane %v134_v14, 0 }
  0xa8   :  { %222 = vadd.xlane.f32.xlu0 %v221_v18 }
  0xaa   :  { %v208_v37 = vpop.f32.mrf.mxu0 }
  0xab   :  { %v209_v38 = vadd.f32 %v208_v37, %v4100_v8 }
  0xad   :  { %v4130_v40 = vadd.f32 %v209_v38, %v113_v39 }
  0xaf   :  { %v224_v41 = vsel %vm172_vm0, %v4130_v40, 0.0 }
  0xb2   :  { %v211_v48 = vpop.f32.mrf.mxu0 }
  0xb3   :  { %v212_v49 = vadd.f32 %v211_v48, %v4100_v8 }
  0xb5   :  { %v4204_v51 = vadd.f32 %v212_v49, %v114_v50 }
  0xbc   :  { %578 = vrot.lane.b32.xlu0 %v4159_v57, %s3995_s27 }
 0x113   :  { %v220_v27 = vpop.xlane.xlu0 %219 }
 0x114   :  { %v237_v28 = vmul.f32 %v4113_v26, %v220_v27  ;;  %v127_v27 = vadd.f32 %v4184_v24, %v125_v23 }
 0x116   :  { %v4117_v29 = vsub.f32 %v4103_v12, %v237_v28 }
 0x118   :  { %v245_v30 = vmul.f32 %v4117_v29, %v4117_v29 }
 0x11a   :  { %v249_v31 = vsel %vm172_vm0, %v245_v30, 0.0  ;;  %v313_v30 = vadd.f32 1.0, %v135_v20 }
 0x11b   :  { %250 = vadd.xlane.f32.xlu1 %v249_v31  ;;  %v223_v32 = vpop.xlane.xlu0 %222 }
 0x11c   :  { %v238_v33 = vmul.f32 %v4113_v26, %v223_v32 }
 0x11e   :  { %v4124_v34 = vsub.f32 %v4108_v17, %v238_v33  ;;  %v128_v33 = vperm.slane %v127_v27, 0 }
 0x120   :  { %v246_v35 = vmul.f32 %v4124_v34, %v4124_v34 }
 0x122   :  { %v252_v36 = vsel %vm172_vm0, %v246_v35, 0.0 }
 0x123   :  { %253 = vadd.xlane.f32.xlu1 %v252_v36 }
 0x12b   :  { %225 = vadd.xlane.f32.xlu1 %v224_v41 }
 0x12e   :  { %v579_v55 = vpop.permute.xlu0 %578 }
 0x144   :  { %576 = vrot.lane.b32.xlu1 %v4174_v15, %s3995_s27 }
 0x18e   :  { %v251_v52 = vpop.xlane.xlu1 %250 }
 0x18f   :  { %v261_v54 = vmul.f32 %v251_v52, %v4113_v26  ;;  %v227_v52 = vsel %vm172_vm0, %v4204_v51, 0.0 }
 0x191   :  { %v265_v56 = vadd.f32 1e-06, %v261_v54 }
 0x193   :  { %3673 = vrsqrt.f32 %v265_v56  ;;  %vm275_vm3 = vweird.f32 %v265_v56 }
 0x196   :  { %v254_v59 = vpop.xlane.xlu1 %253 }
 0x197   :  { %v262_v60 = vmul.f32 %v254_v59, %v4113_v26 }
 0x199   :  { %v3674_v61 = vpop.eup %3673  ;;  %v266_v62 = vadd.f32 1e-06, %v262_v60 }
 0x19a   :  { %v270_v63 = vmul.f32 %v3674_v61, %v265_v56  ;;  %vm276_vm2 = vweird.f32 %v3674_v61 }
 0x19b   :  { %3675 = vrsqrt.f32 %v266_v62  ;;  %vm277_vm4 = vmor %vm275_vm3, %vm276_vm2  ;;  %vm285_vm6 = vweird.f32 %v266_v62 }
 0x19c   :  { %v271_v6 = vmul.f32 %v3674_v61, %v270_v63 }
 0x19e   :  { %v272_v7 = vmul.f32 0.5, %v271_v6 }
 0x1a0   :  { %v273_v11 = vsub.f32 1.5, %v272_v7 }
 0x1a1   :  { %v3676_v13 = vpop.eup %3675 }
 0x1a2   :  { %v274_v16 = vmul.f32 %v3674_v61, %v273_v11  ;;  %v280_v18 = vmul.f32 %v3676_v13, %v266_v62  ;;  %vm286_vm5 = vweird.f32 %v3676_v13 }
 0x1a3   :  { %vm287_vm7 = vmor %vm285_vm6, %vm286_vm5  ;;  %vm627_vm5 = vcmask 64512  }
 0x1a4   :  { %v281_v19 = vmul.f32 %v3676_v13, %v280_v18  ;;  %v278_v21 = vsel %vm277_vm4, %v3674_v61, %v274_v16  ;;  %v226_v61 = vpop.xlane.xlu1 %225 }
 0x1a5   :  { %v309_v28 = vmul.f32 %v278_v21, %v4117_v29  ;;  %v4194_v29 = vld [vmem:[%s5371_s5] ss:$8 sm:$0x3]  ;;  %v239_v62 = vmul.f32 %v4113_v26, %v226_v61 }
 0x1a6   :  { %v282_v22 = vmul.f32 0.5, %v281_v19  ;;  %v4197_v42 = vperm.slane %v4194_v29, 0  ;;  %v4256_v61 = vld [vmem:[#allocation7 + $0x18] sm:$0xff] }
 0x1a7   :  { %v315_v36 = vmul.f32 %v313_v30, %v309_v28  ;;  %v4219_v63 = vsub.f32 %v4130_v40, %v239_v62 }
 0x1a8   :  { %v283_v25 = vsub.f32 1.5, %v282_v22 }
 0x1a9   :  { %v319_v38 = vadd.f32 %v315_v36, %v128_v33  ;;  %v247_v6 = vmul.f32 %v4219_v63, %v4219_v63 }
 0x1aa   :  { %v284_v31 = vmul.f32 %v3676_v13, %v283_v25 }
 0x1ab   :  { %v255_v7 = vsel %vm172_vm0, %v247_v6, 0.0 }
 0x1ac   :  { %v288_v32 = vsel %vm287_vm7, %v3676_v13, %v284_v31 }
 0x1ad   :  { %v310_v35 = vmul.f32 %v288_v32, %v4124_v34 }
 0x1af   :  { %v316_v37 = vmul.f32 %v313_v30, %v310_v35 }
 0x1b1   :  { %v320_v39 = vadd.f32 %v316_v37, %v128_v33 }
 0x1b3   :  { %v327_v41 = vpack.c.bf16 %v320_v39, %v319_v38 }
 0x1b5   :  { %3371 = vmatmul.msk.bf16.vlgmr.msra.gmra.mxu1 %vm172_vm0, %v327_v41  ;;  %3373 = vmatmul.msk.bf16.vlgmr.msra.gmra.mxu2 %vm172_vm0, %v327_v41 }
 0x1b6   :  { %v577_v11 = vpop.permute.xlu1 %576 }
 0x232   :  { %v370_v43 = vpop.f32.mrf.mxu1 }
 0x233   :  { %v371_v34 = vadd.f32 %v370_v43, %v4197_v42 }
 0x235   :  { %v399_v44 = vmul.f32 %v371_v34, %v371_v34  ;;  %v540_v9 = vmul.f32 %v4211_v53, %v371_v34 }
 0x237   :  { %467 = vrot.lane.b32.xlu2 %v399_v44, %s3995_s27  ;;  %v588_v13 = vmul.f32 %v577_v11, %v540_v9  ;;  %v4227_v14 = vmul.f32 %v540_v9, %v4174_v15  ;;  %v403_v16 = vsel %vm172_vm0, %v399_v44, 0.0 }
 0x23a   :  { %v372_v45 = vpop.f32.mrf.mxu1 }
 0x23b   :  { %v373_v46 = vadd.f32 %v372_v45, %v4197_v42 }
 0x23d   :  { %v400_v47 = vmul.f32 %v373_v46, %v373_v46  ;;  %v541_v54 = vmul.f32 %v4211_v53, %v373_v46 }
 0x23f   :  { %469 = vrot.lane.b32.xlu2 %v400_v47, %s3995_s27  ;;  %v589_v56 = vmul.f32 %v579_v55, %v541_v54  ;;  %v406_v15 = vsel %vm172_vm0, %v400_v47, 0.0  ;;  %v4241_v23 = vmul.f32 %v541_v54, %v4159_v57 }
 0x268   :  { %228 = vadd.xlane.f32.xlu2 %v227_v52 }
 0x280   :  { %598 = vrot.lane.b32.xlu2 %v589_v56, %s3996_s16 }
 0x291   :  { %v468_v8 = vpop.permute.xlu2 %467 }
 0x292   :  { %v479_v58 = vsel %vm172_vm0, %v468_v8, 0.0 }
 0x293   :  { %480 = vadd.xlane.f32.xlu1 %v479_v58 }
 0x299   :  { %v470_v59 = vpop.permute.xlu2 %469 }
 0x29a   :  { %v482_v60 = vsel %vm172_vm0, %v470_v59, 0.0 }
 0x29b   :  { %483 = vadd.xlane.f32.xlu0 %v482_v60 }
 0x2a9   :  { %256 = vadd.xlane.f32.xlu2 %v255_v7 }
 0x2af   :  { %596 = vrot.lane.b32.xlu0 %v588_v13, %s3996_s16 }
 0x2c1   :  { %552 = vrot.lane.b32.xlu2 %v4227_v14, %s3996_s16 }
 0x2d9   :  { %404 = vadd.xlane.f32.xlu0 %v403_v16 }
 0x2db   :  { %v229_v18 = vpop.xlane.xlu2 %228 }
 0x2dc   :  { %v240_v19 = vmul.f32 %v4113_v26, %v229_v18  ;;  %v136_v18 = vld [vmem:[%s5369_s3 + $0x7] sm:$0x1] }
 0x2de   :  { %v4234_v20 = vsub.f32 %v4204_v51, %v240_v19 }
 0x2e0   :  { %v248_v21 = vmul.f32 %v4234_v20, %v4234_v20 }
 0x2e2   :  { %v258_v22 = vsel %vm172_vm0, %v248_v21, 0.0  ;;  %v137_v21 = vadd.f32 %v136_v18, %v4171_v10 }
 0x2e3   :  { %259 = vadd.xlane.f32.xlu1 %v258_v22  ;;  %v599_v41 = vpop.permute.xlu2 %598 }
 0x2e4   :  { %v609_v45 = vadd.f32 %v599_v41, %v589_v56 }
 0x2eb   :  { %407 = vadd.xlane.f32.xlu1 %v406_v15 }
 0x2ed   :  { %554 = vrot.lane.b32.xlu0 %v4241_v23, %s3996_s16 }
 0x2f5   :  { %582 = vrot.lane.b32.xlu0 %v4256_v61, %s3995_s27 }
 0x306   :  { %v481_v25 = vpop.xlane.xlu1 %480 }
 0x307   :  { %v491_v27 = vmul.f32 %v481_v25, %v4113_v26 }
 0x309   :  { %v495_v28 = vadd.f32 1e-06, %v491_v27  ;;  %v138_v27 = vperm.slane %v137_v21, 0 }
 0x30b   :  { %3677 = vrsqrt.f32 %v495_v28  ;;  %vm505_vm12 = vweird.f32 %v495_v28  ;;  %v314_v10 = vadd.f32 1.0, %v138_v27 }
 0x30e   :  { %v484_v30 = vpop.xlane.xlu0 %483 }
 0x30f   :  { %v492_v31 = vmul.f32 %v484_v30, %v4113_v26 }
 0x311   :  { %v496_v32 = vadd.f32 1e-06, %v492_v31  ;;  %v3678_v33 = vpop.eup %3677  ;;  %v129_v31 = vld [vmem:[%s5369_s3 + $0x6] sm:$0x1] }
 0x312   :  { %v500_v35 = vmul.f32 %v3678_v33, %v495_v28  ;;  %vm506_vm11 = vweird.f32 %v3678_v33 }
 0x313   :  { %3679 = vrsqrt.f32 %v496_v32  ;;  %vm515_vm9 = vweird.f32 %v496_v32  ;;  %vm507_vm13 = vmor %vm505_vm12, %vm506_vm11  ;;  %vm661_vm12 = vcmask 130048  }
 0x314   :  { %v501_v38 = vmul.f32 %v3678_v33, %v500_v35 }
 0x316   :  { %v502_v43 = vmul.f32 0.5, %v501_v38 }
 0x318   :  { %v503_v46 = vsub.f32 1.5, %v502_v43 }
 0x319   :  { %v3680_v36 = vpop.eup %3679 }
 0x31a   :  { %v510_v37 = vmul.f32 %v3680_v36, %v496_v32  ;;  %vm516_vm8 = vweird.f32 %v3680_v36  ;;  %v504_v50 = vmul.f32 %v3678_v33, %v503_v46 }
 0x31b   :  { %vm517_vm10 = vmor %vm515_vm9, %vm516_vm8 }
 0x31c   :  { %v511_v57 = vmul.f32 %v3680_v36, %v510_v37  ;;  %v508_v54 = vsel %vm507_vm13, %v3678_v33, %v504_v50  ;;  %v257_v56 = vpop.xlane.xlu2 %256  ;;  %v130_v33 = vadd.f32 %v129_v31, %v4184_v24 }
 0x31d   :  { %v263_v8 = vmul.f32 %v257_v56, %v4113_v26  ;;  %v389_v56 = vpop.f32.mrf.mxu2 }
 0x31e   :  { %v512_v39 = vmul.f32 0.5, %v511_v57  ;;  %v131_v38 = vperm.slane %v130_v33, 0 }
 0x31f   :  { %v267_v58 = vadd.f32 1e-06, %v263_v8 }
 0x320   :  { %v513_v34 = vsub.f32 1.5, %v512_v39 }
 0x321   :  { %v597_v49 = vpop.permute.xlu0 %596  ;;  %3681 = vrsqrt.f32 %v267_v58  ;;  %vm295_vm15 = vweird.f32 %v267_v58 }
 0x322   :  { %v514_v44 = vmul.f32 %v3680_v36, %v513_v34  ;;  %v608_v52 = vadd.f32 %v597_v49, %v588_v13  ;;  %v4261_v13 = vld [vmem:[#allocation7 + $0x10] sm:$0xff] }
 0x323   :  { %580 = vrot.lane.b32.xlu0 %v4261_v13, %s3995_s27 }
 0x324   :  { %v518_v47 = vsel %vm517_vm10, %v3680_v36, %v514_v44  ;;  %v4251_v55 = vmul.f32 %v608_v52, %v508_v54 }
 0x325   :  { %v4247_v48 = vmul.f32 %v609_v45, %v518_v47 }
 0x327   :  { %625 = vrot.lane.b32.xlu1 %v4247_v48, %s3995_s27  ;;  %v3682_v59 = vpop.eup %3681 }
 0x328   :  { %v290_v60 = vmul.f32 %v3682_v59, %v267_v58  ;;  %vm296_vm14 = vweird.f32 %v3682_v59 }
 0x329   :  { %vm297_vm1 = vmor %vm295_vm15, %vm296_vm14 }
 0x32a   :  { %v291_v62 = vmul.f32 %v3682_v59, %v290_v60 }
 0x32c   :  { %v292_v11 = vmul.f32 0.5, %v291_v62 }
 0x32e   :  { %v293_v16 = vsub.f32 1.5, %v292_v11  ;;  %v553_v11 = vpop.permute.xlu2 %552 }
 0x32f   :  { %623 = vrot.lane.b32.xlu1 %v4251_v55, %s3995_s27 }
 0x330   :  { %v294_v22 = vmul.f32 %v3682_v59, %v293_v16  ;;  %v4281_v16 = vperm.slane %v4194_v29, 1 }
 0x332   :  { %v298_v28 = vsel %vm297_vm1, %v3682_v59, %v294_v22  ;;  %v564_v22 = vadd.f32 %v553_v11, %v4227_v14  ;;  %v4292_v27 = vadd.f32 %v389_v56, %v4281_v16 }
 0x333   :  { %v311_v35 = vmul.f32 %v298_v28, %v4219_v63 }
 0x335   :  { %v317_v39 = vmul.f32 %v314_v10, %v311_v35 }
 0x337   :  { %v321_v43 = vadd.f32 %v317_v39, %v131_v38 }
 0x34c   :  { %v405_v24 = vpop.xlane.xlu0 %404 }
 0x34d   :  { %v415_v63 = vmul.f32 %v405_v24, %v4113_v26 }
 0x34f   :  { %v419_v45 = vadd.f32 1e-06, %v415_v63 }
 0x351   :  { %vm429_vm7 = vweird.f32 %v419_v45 }
 0x356   :  { %v260_v6 = vpop.xlane.xlu1 %259 }
 0x357   :  { %v264_v7 = vmul.f32 %v260_v6, %v4113_v26 }
 0x359   :  { %v268_v9 = vadd.f32 1e-06, %v264_v7 }
 0x35b   :  { %3683 = vrsqrt.f32 %v268_v9  ;;  %vm305_vm3 = vweird.f32 %v268_v9 }
 0x35c   :  { %3685 = vrsqrt.f32 %v419_v45 }
 0x35e   :  { %v408_v46 = vpop.xlane.xlu1 %407 }
 0x35f   :  { %v416_v47 = vmul.f32 %v408_v46, %v4113_v26  ;;  %v555_v28 = vpop.permute.xlu0 %554 }
 0x361   :  { %v3684_v19 = vpop.eup %3683  ;;  %v420_v49 = vadd.f32 1e-06, %v416_v47 }
 0x362   :  { %v300_v15 = vmul.f32 %v3684_v19, %v268_v9  ;;  %vm306_vm2 = vweird.f32 %v3684_v19  ;;  %v3686_v50 = vpop.eup %3685  ;;  %v391_v9 = vpop.f32.mrf.mxu2 }
 0x363   :  { %vm307_vm4 = vmor %vm305_vm3, %vm306_vm2  ;;  %3687 = vrsqrt.f32 %v420_v49  ;;  %vm430_vm6 = vweird.f32 %v3686_v50  ;;  %v4284_v21 = vadd.f32 %v391_v9, %v4281_v16  ;;  %vm439_vm10 = vweird.f32 %v420_v49 }
 0x364   :  { %v301_v25 = vmul.f32 %v3684_v19, %v300_v15  ;;  %vm431_vm8 = vmor %vm429_vm7, %vm430_vm6 }
 0x366   :  { %v302_v30 = vmul.f32 0.5, %v301_v25 }
 0x368   :  { %v303_v32 = vsub.f32 1.5, %v302_v30  ;;  %v565_v30 = vadd.f32 %v555_v28, %v4241_v23 }
 0x369   :  { %v3688_v54 = vpop.eup %3687 }
 0x36a   :  { %v304_v36 = vmul.f32 %v3684_v19, %v303_v32  ;;  %v434_v58 = vmul.f32 %v3688_v54, %v420_v49  ;;  %vm440_vm9 = vweird.f32 %v3688_v54 }
 0x36b   :  { %vm441_vm11 = vmor %vm439_vm10, %vm440_vm9 }
 0x36c   :  { %v308_v37 = vsel %vm307_vm4, %v3684_v19, %v304_v36  ;;  %v435_v60 = vmul.f32 %v3688_v54, %v434_v58 }
 0x36d   :  { %v312_v57 = vmul.f32 %v308_v37, %v4234_v20  ;;  %v424_v20 = vmul.f32 %v3686_v50, %v419_v45 }
 0x36e   :  { %v436_v7 = vmul.f32 0.5, %v435_v60 }
 0x36f   :  { %v318_v41 = vmul.f32 %v314_v10, %v312_v57  ;;  %v425_v52 = vmul.f32 %v3686_v50, %v424_v20  ;;  %v583_v57 = vpop.permute.xlu0 %582 }
 0x370   :  { %v437_v18 = vsub.f32 1.5, %v436_v7 }
 0x371   :  { %v322_v34 = vadd.f32 %v318_v41, %v131_v38  ;;  %v426_v8 = vmul.f32 0.5, %v425_v52 }
 0x372   :  { %v438_v29 = vmul.f32 %v3688_v54, %v437_v18 }
 0x373   :  { %v328_v44 = vpack.c.bf16 %v322_v34, %v321_v43  ;;  %v427_v59 = vsub.f32 1.5, %v426_v8 }
 0x374   :  { %v442_v14 = vsel %vm441_vm11, %v3688_v54, %v438_v29 }
 0x375   :  { %3372 = vmatmul.msk.bf16.gmra.mxu1 %vm172_vm0, %v328_v44  ;;  %3374 = vmatmul.msk.bf16.gmra.mxu2 %vm172_vm0, %v328_v44  ;;  %v428_v6 = vmul.f32 %v3686_v50, %v427_v59  ;;  %v569_v31 = vmul.f32 %v565_v30, %v442_v14 }
 0x377   :  { %v432_v19 = vsel %vm431_vm8, %v3686_v50, %v428_v6 }
 0x378   :  { %v4289_v25 = vmul.f32 %v564_v22, %v432_v19 }
 0x395   :  { %v581_v63 = vpop.permute.xlu0 %580 }
 0x399   :  { %v626_v62 = vpop.permute.xlu1 %625 }
 0x39a   :  { %3375 = vmatpush.xpose.msk.msra.mxu3 %vm627_vm5, %v626_v62 }
 0x3a1   :  { %v624_v15 = vpop.permute.xlu1 %623 }
 0x3a2   :  { %3376 = vmatpush.xpose.msk.msra.mxu3 %vm627_vm5, %v624_v15 }
 0x3a5   :  { %3377 = vmatmul.msk.f32.vlgmr.msra.gmra.mxu3 %vm627_vm5, %v4289_v25 }
 0x3a6   :  { %730 = vmatpush.msrb.mxu3 %v4284_v21 }
 0x3a8   :  { %731 = vmatpush.msrb.mxu3 %v4292_v27 }
 0x3ad   :  { %3378 = vmatmul.msk.f32.gmra.mxu3 %vm627_vm5, %v569_v31 }
 0x3f2   :  { %v375_v32 = vpop.f32.mrf.mxu1 }
 0x3f3   :  { %v376_v33 = vadd.f32 %v375_v32, %v4197_v42 }
 0x3f5   :  { %v401_v35 = vmul.f32 %v376_v33, %v376_v33  ;;  %v542_v23 = vmul.f32 %v4211_v53, %v376_v33 }
 0x3f7   :  { %471 = vrot.lane.b32.xlu2 %v401_v35, %s3995_s27  ;;  %v4310_v41 = vmul.f32 %v542_v23, %v4261_v13  ;;  %v409_v24 = vsel %vm172_vm0, %v401_v35, 0.0  ;;  %v590_v46 = vmul.f32 %v581_v63, %v542_v23 }
 0x3fa   :  { %v377_v10 = vpop.f32.mrf.mxu1 }
 0x3fb   :  { %v378_v36 = vadd.f32 %v377_v10, %v4197_v42 }
 0x3fd   :  { %v402_v37 = vmul.f32 %v378_v36, %v378_v36  ;;  %v543_v38 = vmul.f32 %v4211_v53, %v378_v36 }
 0x3ff   :  { %473 = vrot.lane.b32.xlu1 %v402_v37, %s3995_s27  ;;  %v4304_v39 = vmul.f32 %v583_v57, %v543_v38  ;;  %v4315_v42 = vmul.f32 %v543_v38, %v4256_v61  ;;  %v412_v49 = vsel %vm172_vm0, %v402_v37, 0.0 }
 0x401   :  { %602 = vrot.lane.b32.xlu2 %v4304_v39, %s3996_s16 }
 0x409   :  { %556 = vrot.lane.b32.xlu2 %v4310_v41, %s3996_s16 }
 0x411   :  { %558 = vrot.lane.b32.xlu2 %v4315_v42, %s3996_s16 }
 0x419   :  { %739 = vrot.lane.b32.xlu2 %v4289_v25, %s3997_s22 }
 0x428   :  { %v655_v43 = vpop.f32.mrf.mxu3 }
 0x429   :  { %v662_v53 = vsel %vm661_vm12, %v655_v43, -inf }
 0x42a   :  { %663 = vmax.xlane.f32.xlu1 %v662_v53 }
 0x430   :  { %v4322_v13 = vpop.f32.mrf.mxu3 }
 0x431   :  { %v665_v34 = vsel %vm661_vm12, %v4322_v13, -inf }
 0x442   :  { %666 = vmax.xlane.f32.xlu2 %v665_v34 }
 0x451   :  { %v472_v61 = vpop.permute.xlu2 %471 }
 0x452   :  { %v485_v44 = vsel %vm172_vm0, %v472_v61, 0.0 }
 0x453   :  { %486 = vadd.xlane.f32.xlu1 %v485_v44 }
 0x45a   :  { %741 = vrot.lane.b32.xlu2 %v569_v31, %s3997_s22 }
 0x45b   :  { %410 = vadd.xlane.f32.xlu1 %v409_v24  ;;  %v603_v18 = vpop.permute.xlu2 %602 }
 0x463   :  { %v557_v14 = vpop.permute.xlu2 %556 }
 0x46b   :  { %v559_v53 = vpop.permute.xlu2 %558 }
 0x471   :  { %v474_v45 = vpop.permute.xlu1 %473 }
 0x472   :  { %v488_v47 = vsel %vm172_vm0, %v474_v45, 0.0 }
 0x473   :  { %489 = vadd.xlane.f32.xlu0 %v488_v47 }
 0x474   :  { %600 = vrot.lane.b32.xlu1 %v590_v46, %s3996_s16 }
 0x47b   :  { %413 = vadd.xlane.f32.xlu0 %v412_v49 }
 0x47c   :  { %745 = vrot.lane.b32.xlu1 %v4247_v48, %s3998_s23 }
 0x484   :  { %743 = vrot.lane.b32.xlu1 %v4251_v55, %s3998_s23 }
 0x48c   :  { %867 = vrot.lane.b32.xlu1 %v4251_v55, %s3999_s1 }
 0x48f   :  { %869 = vrot.lane.b32.xlu0 %v4247_v48, %s3999_s1 }
 0x494   :  { %991 = vrot.lane.b32.xlu1 %v4247_v48, %s4000_s24 }
 0x497   :  { %863 = vrot.lane.b32.xlu0 %v4289_v25, %s4001_s25 }
 0x49c   :  { %989 = vrot.lane.b32.xlu1 %v4251_v55, %s4000_s24 }
 0x49d   :  { %v664_v50 = vpop.xlane.xlu1 %663 }
 0x49e   :  { %v668_v20 = vsub.f32 %v655_v43, %v664_v50  ;;  %v566_v43 = vadd.f32 %v557_v14, %v4310_v41  ;;  %v740_v50 = vpop.permute.xlu2 %739 }
 0x4a0   :  { %v670_v52 = vmul.f32 1.442695, %v668_v20 }
 0x4a2   :  { %3689 = vpow2.f32 %v670_v52 }
 0x4a4   :  { %987 = vrot.lane.b32.xlu1 %v569_v31, %s4002_s4 }
 0x4a8   :  { %v4347_v54 = vpop.eup %3689 }
 0x4a9   :  { %v674_v56 = vsel %vm661_vm12, %v4347_v54, 0.0 }
 0x4aa   :  { %675 = vadd.xlane.f32.xlu2 %v674_v56  ;;  %v611_v56 = vadd.f32 %v603_v18, %v4304_v39 }
 0x4c2   :  { %865 = vrot.lane.b32.xlu2 %v569_v31, %s4001_s25 }
 0x4c6   :  { %v487_v48 = vpop.xlane.xlu1 %486 }
 0x4c7   :  { %v493_v8 = vmul.f32 %v487_v48, %v4113_v26 }
 0x4c9   :  { %v497_v58 = vadd.f32 1e-06, %v493_v8 }
 0x4ca   :  { %985 = vrot.lane.b32.xlu2 %v4289_v25, %s4002_s4 }
 0x4cb   :  { %3691 = vrsqrt.f32 %v497_v58  ;;  %vm525_vm14 = vweird.f32 %v497_v58 }
 0x4ce   :  { %v411_v55 = vpop.xlane.xlu1 %410 }
 0x4cf   :  { %v417_v59 = vmul.f32 %v411_v55, %v4113_v26 }
 0x4d1   :  { %v3692_v60 = vpop.eup %3691  ;;  %v421_v62 = vadd.f32 1e-06, %v417_v59 }
 0x4d2   :  { %v520_v6 = vmul.f32 %v3692_v60, %v497_v58  ;;  %vm526_vm13 = vweird.f32 %v3692_v60 }
 0x4d3   :  { %3693 = vrsqrt.f32 %v421_v62  ;;  %vm527_vm15 = vmor %vm525_vm14, %vm526_vm13  ;;  %vm449_vm2 = vweird.f32 %v421_v62 }
 0x4d4   :  { %v521_v7 = vmul.f32 %v3692_v60, %v520_v6 }
 0x4d6   :  { %v522_v19 = vmul.f32 0.5, %v521_v7  ;;  %v567_v7 = vadd.f32 %v559_v53, %v4315_v42 }
 0x4d8   :  { %v523_v15 = vsub.f32 1.5, %v522_v19  ;;  %v667_v19 = vpop.xlane.xlu2 %666 }
 0x4d9   :  { %v3694_v9 = vpop.eup %3693 }
 0x4da   :  { %v444_v11 = vmul.f32 %v3694_v9, %v421_v62  ;;  %v524_v28 = vmul.f32 %v3692_v60, %v523_v15  ;;  %vm450_vm1 = vweird.f32 %v3694_v9  ;;  %v669_v15 = vsub.f32 %v4322_v13, %v667_v19 }
 0x4db   :  { %vm451_vm3 = vmor %vm449_vm2, %vm450_vm1 }
 0x4dc   :  { %v445_v22 = vmul.f32 %v3694_v9, %v444_v11  ;;  %v528_v35 = vsel %vm527_vm15, %v3692_v60, %v524_v28 }
 0x4de   :  { %v446_v29 = vmul.f32 0.5, %v445_v22 }
 0x4e0   :  { %v447_v25 = vsub.f32 1.5, %v446_v29  ;;  %v4391_v22 = vpop.permute.xlu2 %741  ;;  %v672_v29 = vmul.f32 1.442695, %v669_v15 }
 0x4e2   :  { %v448_v37 = vmul.f32 %v3694_v9, %v447_v25 }
 0x4e4   :  { %v452_v23 = vsel %vm451_vm3, %v3694_v9, %v448_v37 }
 0x4e5   :  { %v4365_v24 = vmul.f32 %v566_v43, %v452_v23 }
 0x4e6   :  { %v601_v30 = vpop.permute.xlu1 %600  ;;  %v490_v31 = vpop.xlane.xlu0 %489 }
 0x4e7   :  { %v610_v32 = vadd.f32 %v601_v30, %v590_v46  ;;  %v494_v33 = vmul.f32 %v490_v31, %v4113_v26 }
 0x4e9   :  { %v4357_v10 = vmul.f32 %v610_v32, %v528_v35  ;;  %v498_v36 = vadd.f32 1e-06, %v494_v33 }
 0x4eb   :  { %3695 = vrsqrt.f32 %v498_v36  ;;  %1258 = vrot.lane.b32.xlu1 %v4357_v10, %s3998_s23  ;;  %vm535_vm6 = vweird.f32 %v498_v36 }
 0x4ee   :  { %v746_v38 = vpop.permute.xlu1 %745  ;;  %v414_v57 = vpop.xlane.xlu0 %413 }
 0x4ef   :  { %v418_v34 = vmul.f32 %v414_v57, %v4113_v26  ;;  %3381 = vmatpush.xpose.msk.msrb.mxu0 %vm627_vm5, %v746_v38  ;;  %3542 = vmatpush.xpose.msk.msra.mxu3 %vm627_vm5, %v746_v38 }
 0x4f1   :  { %v3696_v61 = vpop.eup %3695  ;;  %v422_v44 = vadd.f32 1e-06, %v418_v34 }
 0x4f2   :  { %v530_v63 = vmul.f32 %v3696_v61, %v498_v36  ;;  %vm536_vm4 = vweird.f32 %v3696_v61 }
 0x4f3   :  { %3697 = vrsqrt.f32 %v422_v44  ;;  %1378 = vrot.lane.b32.xlu1 %v4365_v24, %s4001_s25  ;;  %vm537_vm7 = vmor %vm535_vm6, %vm536_vm4  ;;  %vm459_vm9 = vweird.f32 %v422_v44 }
 0x4f4   :  { %v531_v45 = vmul.f32 %v3696_v61, %v530_v63 }
 0x4f6   :  { %v532_v46 = vmul.f32 0.5, %v531_v45  ;;  %v744_v47 = vpop.permute.xlu1 %743 }
 0x4f7   :  { %3382 = vmatpush.xpose.msk.msrb.mxu0 %vm627_vm5, %v744_v47  ;;  %3543 = vmatpush.xpose.msk.msra.mxu3 %vm627_vm5, %v744_v47  ;;  %v4422_v47 = vpop.f32.mrf.mxu2 }
 0x4f8   :  { %v533_v41 = vsub.f32 1.5, %v532_v46 }
 0x4f9   :  { %v3698_v49 = vpop.eup %3697 }
 0x4fa   :  { %v534_v20 = vmul.f32 %v3696_v61, %v533_v41  ;;  %v454_v52 = vmul.f32 %v3698_v49, %v422_v44  ;;  %3383 = vmatmul.msk.f32.vlgmr.msrb.gmra.mxu0 %vm627_vm5, %v740_v50  ;;  %vm460_vm8 = vweird.f32 %v3698_v49 }
 0x4fb   :  { %vm461_vm10 = vmor %vm459_vm9, %vm460_vm8 }
 0x4fc   :  { %v455_v48 = vmul.f32 %v3698_v49, %v454_v52  ;;  %v538_v8 = vsel %vm537_vm7, %v3696_v61, %v534_v20 }
 0x4fd   :  { %v615_v58 = vmul.f32 %v611_v56, %v538_v8 }
 0x4fe   :  { %v456_v55 = vmul.f32 0.5, %v455_v48  ;;  %v868_v59 = vpop.permute.xlu1 %867 }
 0x4ff   :  { %1260 = vrot.lane.b32.xlu2 %v615_v58, %s3998_s23  ;;  %1142 = vrot.lane.b32.xlu0 %v615_v58, %s3995_s27  ;;  %v4424_v41 = vpop.f32.mrf.mxu2 }
 0x500   :  { %v457_v60 = vsub.f32 1.5, %v456_v55 }
 0x501   :  { %v870_v62 = vpop.permute.xlu0 %869 }
 0x502   :  { %v458_v6 = vmul.f32 %v3698_v49, %v457_v60  ;;  %3387 = vmatpush.xpose.msk.msrb.mxu2 %vm627_vm5, %v870_v62 }
 0x504   :  { %v462_v39 = vsel %vm461_vm10, %v3698_v49, %v458_v6 }
 0x505   :  { %v4377_v9 = vmul.f32 %v567_v7, %v462_v39 }
 0x506   :  { %v992_v11 = vpop.permute.xlu1 %991  ;;  %3388 = vmatpush.xpose.msk.msrb.mxu2 %vm627_vm5, %v868_v59 }
 0x507   :  { %3393 = vmatpush.xpose.msk.msra.mxu0 %vm627_vm5, %v992_v11  ;;  %1254 = vrot.lane.b32.xlu2 %v4365_v24, %s3997_s22 }
 0x508   :  { %1380 = vrot.lane.b32.xlu1 %v4377_v9, %s4001_s25 }
 0x509   :  { %v864_v18 = vpop.permute.xlu0 %863 }
 0x50a   :  { %3389 = vmatmul.msk.f32.vlgmr.msrb.gmra.mxu2 %vm627_vm5, %v864_v18 }
 0x50e   :  { %v990_v42 = vpop.permute.xlu1 %989 }
 0x50f   :  { %3394 = vmatpush.xpose.msk.msra.mxu0 %vm627_vm5, %v990_v42  ;;  %1256 = vrot.lane.b32.xlu2 %v4377_v9, %s3997_s22 }
 0x510   :  { %1502 = vrot.lane.b32.xlu1 %v4377_v9, %s4002_s4 }
 0x516   :  { %v988_v34 = vpop.permute.xlu1 %987 }
 0x517   :  { %1504 = vrot.lane.b32.xlu2 %v4357_v10, %s4000_s24 }
 0x51d   :  { %v676_v28 = vpop.xlane.xlu2 %675 }
 0x51e   :  { %3699 = vrcp.f32 %v676_v28  ;;  %v691_v33 = vand.u32 2147483648, %v676_v28  ;;  %v689_v36 = vand.u32 2147483647, %v676_v28  ;;  %vm685_vm13 = vweird.f32 %v676_v28 }
 0x51f   :  { %3701 = vpow2.f32 %v672_v29 }
 0x520   :  { %v692_v38 = vor.u32 1.1754944e-38, %v691_v33  ;;  %vm690_vm15 = vcmp.eq.f32.partialorder %v689_v36, 8.507059e+37 }
 0x524   :  { %v3700_v14 = vpop.eup %3699 }
 0x525   :  { %v4396_v25 = vpop.eup %3701  ;;  %v681_v30 = vmul.f32 %v3700_v14, %v676_v28  ;;  %v866_v31 = vpop.permute.xlu2 %865  ;;  %vm686_vm11 = vweird.f32 %v3700_v14 }
 0x526   :  { %3390 = vmatmul.msk.f32.gmra.mxu2 %vm627_vm5, %v866_v31  ;;  %v677_v35 = vsel %vm661_vm12, %v4396_v25, 0.0  ;;  %vm687_vm14 = vmor %vm685_vm13, %vm686_vm11 }
 0x527   :  { %v682_v32 = vsub.f32 1.0, %v681_v30 }
 0x529   :  { %v683_v13 = vmul.f32 %v3700_v14, %v682_v32  ;;  %678 = vadd.xlane.f32.xlu0 %v677_v35 }
 0x52b   :  { %v684_v37 = vadd.f32 %v3700_v14, %v683_v13 }
 0x52d   :  { %v986_v57 = vpop.permute.xlu2 %985  ;;  %v688_v23 = vsel %vm687_vm14, %v3700_v14, %v684_v37 }
 0x52e   :  { %3395 = vmatmul.msk.f32.vlgmr.msra.gmra.mxu0 %vm627_vm5, %v986_v57  ;;  %v693_v43 = vsel %vm690_vm15, %v692_v38, %v688_v23 }
 0x52f   :  { %v694_v53 = vmul.f32 %v4347_v54, %v693_v43 }
 0x531   :  { %3379 = vmatmul.msk.f32.vlgmr.msrb.gmra.mxu3 %vm661_vm12, %v694_v53 }
 0x536   :  { %3396 = vmatmul.msk.f32.gmra.mxu0 %vm627_vm5, %v988_v34 }
 0x53d   :  { %1140 = vrot.lane.b32.xlu0 %v4357_v10, %s3995_s27 }
 0x545   :  { %1384 = vrot.lane.b32.xlu0 %v615_v58, %s3999_s1 }
 0x54d   :  { %1382 = vrot.lane.b32.xlu0 %v4357_v10, %s3999_s1 }
 0x555   :  { %1506 = vrot.lane.b32.xlu0 %v615_v58, %s4000_s24 }
 0x559   :  { %v1261_v61 = vpop.permute.xlu2 %1260 }
 0x55a   :  { %3405 = vmatpush.xpose.msk.msrb.mxu0 %vm627_vm5, %v1261_v61 }
 0x55d   :  { %v1259_v44 = vpop.permute.xlu1 %1258  ;;  %1500 = vrot.lane.b32.xlu0 %v4365_v24, %s4002_s4 }
 0x55e   :  { %3406 = vmatpush.xpose.msk.msrb.mxu0 %vm627_vm5, %v1259_v44 }
 0x561   :  { %v1255_v54 = vpop.permute.xlu2 %1254 }
 0x562   :  { %3407 = vmatmul.msk.f32.vlgmr.msrb.gmra.mxu0 %vm627_vm5, %v1255_v54 }
 0x569   :  { %v1257_v63 = vpop.permute.xlu2 %1256 }
 0x56a   :  { %3408 = vmatmul.msk.f32.gmra.mxu0 %vm627_vm5, %v1257_v63 }
 0x571   :  { %v1143_v45 = vpop.permute.xlu0 %1142  ;;  %v1505_v31 = vpop.permute.xlu2 %1504 }
 0x572   :  { %3399 = vmatpush.xpose.msk.msra.mxu2 %vm627_vm5, %v1143_v45 }
 0x577   :  { %v4418_v10 = vpop.f32.mrf.mxu0 }
 0x578   :  { %v778_v46 = vsel %vm661_vm12, %v4418_v10, -inf }
 0x579   :  { %779 = vmax.xlane.f32.xlu2 %v778_v46 }
 0x58d   :  { %v4426_v49 = vpop.f32.mrf.mxu2 }
 0x58e   :  { %v902_v50 = vsel %vm661_vm12, %v4426_v49, -inf }
 0x58f   :  { %903 = vmax.xlane.f32.xlu1 %v902_v50 }
 0x59c   :  { %v679_v20 = vpop.xlane.xlu0 %678 }
 0x59d   :  { %3703 = vrcp.f32 %v679_v20  ;;  %v706_v8 = vand.u32 2147483648, %v679_v20  ;;  %v704_v55 = vand.u32 2147483647, %v679_v20  ;;  %vm700_vm2 = vweird.f32 %v679_v20 }
 0x59f   :  { %v707_v7 = vor.u32 1.1754944e-38, %v706_v8  ;;  %vm705_vm4 = vcmp.eq.f32.partialorder %v704_v55, 8.507059e+37 }
 0x5a3   :  { %v3704_v52 = vpop.eup %3703 }
 0x5a4   :  { %v696_v56 = vmul.f32 %v3704_v52, %v679_v20  ;;  %vm701_vm1 = vweird.f32 %v3704_v52 }
 0x5a5   :  { %vm702_vm3 = vmor %vm700_vm2, %vm701_vm1 }
 0x5a6   :  { %v697_v48 = vsub.f32 1.0, %v696_v56 }
 0x5a8   :  { %v698_v58 = vmul.f32 %v3704_v52, %v697_v48 }
 0x5a9   :  { %v4430_v59 = vpop.f32.mrf.mxu2 }
 0x5aa   :  { %v905_v60 = vsel %vm661_vm12, %v4430_v59, -inf  ;;  %v699_v62 = vadd.f32 %v3704_v52, %v698_v58 }
 0x5ab   :  { %v4434_v6 = vpop.f32.mrf.mxu0  ;;  %906 = vmax.xlane.f32.xlu0 %v905_v60 }
 0x5ac   :  { %v1024_v39 = vsel %vm661_vm12, %v4434_v6, -inf  ;;  %v703_v11 = vsel %vm702_vm3, %v3704_v52, %v699_v62 }
 0x5ad   :  { %1025 = vmax.xlane.f32.xlu2 %v1024_v39  ;;  %v708_v18 = vsel %vm705_vm4, %v707_v7, %v703_v11 }
 0x5ae   :  { %v709_v19 = vmul.f32 %v4396_v25, %v708_v18  ;;  %v1379_v25 = vpop.permute.xlu1 %1378 }
 0x5af   :  { %v1141_v42 = vpop.permute.xlu0 %1140 }
 0x5b0   :  { %3380 = vmatmul.msk.f32.gmra.mxu3 %vm661_vm12, %v709_v19  ;;  %3400 = vmatpush.xpose.msk.msra.mxu2 %vm627_vm5, %v1141_v42 }
 0x5b3   :  { %v4441_v15 = vpop.f32.mrf.mxu0  ;;  %3401 = vmatmul.msk.f32.vlgmr.msra.gmra.mxu2 %vm627_vm5, %v4365_v24 }
 0x5b4   :  { %v1027_v29 = vsel %vm661_vm12, %v4441_v15, -inf  ;;  %v4495_v55 = vpop.f32.mrf.mxu3 }
 0x5b5   :  { %1028 = vmax.xlane.f32.xlu1 %v1027_v29 }
 0x5b6   :  { %v1381_v30 = vpop.permute.xlu1 %1380 }
 0x5b7   :  { %v1385_v28 = vpop.permute.xlu0 %1384 }
 0x5b8   :  { %3384 = vmatmul.msk.f32.vlgmr.msra.gmra.mxu3 %vm627_vm5, %v4391_v22  ;;  %3411 = vmatpush.xpose.msk.msrb.mxu2 %vm627_vm5, %v1385_v28 }
 0x5bb   :  { %3402 = vmatmul.msk.f32.gmra.mxu2 %vm627_vm5, %v4377_v9 }
 0x5be   :  { %v1503_v32 = vpop.permute.xlu1 %1502 }
 0x5bf   :  { %v1383_v14 = vpop.permute.xlu0 %1382 }
 0x5c0   :  { %3412 = vmatpush.xpose.msk.msrb.mxu2 %vm627_vm5, %v1383_v14 }
 0x5c3   :  { %3413 = vmatmul.msk.f32.vlgmr.msrb.gmra.mxu2 %vm627_vm5, %v1379_v25 }
 0x5c7   :  { %v1507_v24 = vpop.permute.xlu0 %1506 }
 0x5c8   :  { %3417 = vmatpush.xpose.msk.msra.mxu0 %vm627_vm5, %v1507_v24 }
 0x5cb   :  { %3414 = vmatmul.msk.f32.gmra.mxu2 %vm627_vm5, %v1381_v30  ;;  %v3566_v30 = vpack.i.bf16 %v4292_v27, %v4284_v21 }
 0x5cc   :  { %3418 = vmatpush.xpose.msk.msra.mxu0 %vm627_vm5, %v1505_v31 }
 0x5cf   :  { %v1501_v22 = vpop.permute.xlu0 %1500 }
 0x5d0   :  { %3419 = vmatmul.msk.f32.vlgmr.msra.gmra.mxu0 %vm627_vm5, %v1501_v22 }
 0x5d8   :  { %3420 = vmatmul.msk.f32.gmra.mxu0 %vm627_vm5, %v1503_v32 }
 0x5df   :  { %v4459_v9 = vpop.f32.mrf.mxu0 }
 0x5e0   :  { %v1293_v33 = vsel %vm661_vm12, %v4459_v9, -inf }
 0x5e1   :  { %1294 = vmax.xlane.f32.xlu0 %v1293_v33 }
 0x5e7   :  { %v4467_v37 = vpop.f32.mrf.mxu0 }
 0x5e8   :  { %v1296_v23 = vsel %vm661_vm12, %v4467_v37, -inf }
 0x5ec   :  { %v780_v36 = vpop.xlane.xlu2 %779 }
 0x5ed   :  { %v784_v38 = vsub.f32 %v4418_v10, %v780_v36 }
 0x5ef   :  { %v786_v53 = vmul.f32 1.442695, %v784_v38 }
 0x5f1   :  { %3705 = vpow2.f32 %v786_v53 }
 0x5f7   :  { %v4481_v46 = vpop.eup %3705 }
 0x5f8   :  { %v790_v48 = vsel %vm661_vm12, %v4481_v46, 0.0 }
 0x602   :  { %v904_v34 = vpop.xlane.xlu1 %903 }
 0x603   :  { %v908_v61 = vsub.f32 %v4426_v49, %v904_v34 }
 0x605   :  { %v910_v63 = vmul.f32 1.442695, %v908_v61 }
 0x607   :  { %3707 = vpow2.f32 %v910_v63 }
 0x61e   :  { %v907_v10 = vpop.xlane.xlu0 %906 }
 0x61f   :  { %v909_v52 = vsub.f32 %v4430_v59, %v907_v10  ;;  %v4497_v59 = vpop.eup %3707 }
 0x620   :  { %v1026_v45 = vpop.xlane.xlu2 %1025  ;;  %v914_v11 = vsel %vm661_vm12, %v4497_v59, 0.0 }
 0x621   :  { %v1030_v50 = vsub.f32 %v4434_v6, %v1026_v45  ;;  %v912_v60 = vmul.f32 1.442695, %v909_v52 }
 0x623   :  { %v1032_v58 = vmul.f32 1.442695, %v1030_v50 }
 0x625   :  { %3709 = vpow2.f32 %v1032_v58 }
 0x626   :  { %3711 = vpow2.f32 %v912_v60 }
 0x628   :  { %v1029_v62 = vpop.xlane.xlu1 %1028 }
 0x629   :  { %v1031_v6 = vsub.f32 %v4441_v15, %v1029_v62 }
 0x62b   :  { %v1034_v18 = vmul.f32 1.442695, %v1031_v6  ;;  %v4508_v42 = vpop.eup %3709 }
 0x62c   :  { %v4510_v29 = vpop.eup %3711  ;;  %v1036_v15 = vsel %vm661_vm12, %v4508_v42, 0.0 }
 0x62d   :  { %3713 = vpow2.f32 %v1034_v18  ;;  %v917_v28 = vsel %vm661_vm12, %v4510_v29, 0.0 }
 0x633   :  { %v4506_v19 = vpop.f32.mrf.mxu3  ;;  %v4516_v14 = vpop.eup %3713 }
 0x634   :  { %v1039_v24 = vsel %vm661_vm12, %v4516_v14, 0.0 }
 0x636   :  { %v4463_v35 = vpop.f32.mrf.mxu2 }
 0x637   :  { %v1177_v13 = vsel %vm661_vm12, %v4463_v35, -inf }
 0x638   :  { %1178 = vmax.xlane.f32.xlu2 %v1177_v13 }
 0x63b   :  { %v4518_v25 = vpop.f32.mrf.mxu3 }
 0x63c   :  { %v781_v31 = vsel %vm661_vm12, %v4518_v25, -inf }
 0x63e   :  { %v4470_v57 = vpop.f32.mrf.mxu2 }
 0x63f   :  { %v1180_v43 = vsel %vm661_vm12, %v4470_v57, -inf }
 0x640   :  { %1297 = vmax.xlane.f32.xlu2 %v1296_v23  ;;  %1181 = vmax.xlane.f32.xlu1 %v1180_v43 }
 0x646   :  { %v4477_v44 = vpop.f32.mrf.mxu2 }
 0x647   :  { %v1417_v54 = vsel %vm661_vm12, %v4477_v44, -inf }
 0x648   :  { %1418 = vmax.xlane.f32.xlu0 %v1417_v54 }
 0x64d   :  { %v4484_v20 = vpop.f32.mrf.mxu0 }
 0x64e   :  { %v4487_v56 = vpop.f32.mrf.mxu2  ;;  %v1539_v49 = vsel %vm661_vm12, %v4484_v20, -inf }
 0x64f   :  { %1540 = vmax.xlane.f32.xlu1 %v1539_v49  ;;  %v1420_v8 = vsel %vm661_vm12, %v4487_v56, -inf }
 0x650   :  { %791 = vadd.xlane.f32.xlu0 %v790_v48  ;;  %1421 = vmax.xlane.f32.xlu2 %v1420_v8 }
 0x654   :  { %v1295_v22 = vpop.xlane.xlu0 %1294 }
 0x655   :  { %v4500_v7 = vpop.f32.mrf.mxu0  ;;  %v1299_v13 = vsub.f32 %v4459_v9, %v1295_v22 }
 0x656   :  { %v1542_v39 = vsel %vm661_vm12, %v4500_v7, -inf }
 0x657   :  { %1543 = vmax.xlane.f32.xlu1 %v1542_v39  ;;  %v1301_v21 = vmul.f32 1.442695, %v1299_v13 }
 0x658   :  { %915 = vadd.xlane.f32.xlu0 %v914_v11 }
 0x65f   :  { %1037 = vadd.xlane.f32.xlu1 %v1036_v15 }
 0x660   :  { %918 = vadd.xlane.f32.xlu0 %v917_v28 }
 0x667   :  { %1040 = vadd.xlane.f32.xlu1 %v1039_v24 }
 0x668   :  { %3567 = vrot.lane.b32.xlu2 %v3566_v30, %s3997_s22  ;;  %782 = vmax.xlane.f32.xlu0 %v781_v31 }
 0x670   :  { %3577 = vrot.lane.b32.xlu2 %v3566_v30, %s4002_s4 }
 0x680   :  { %3572 = vrot.lane.b32.xlu1 %v3566_v30, %s4001_s25 }
 0x6ab   :  { %v1179_v32 = vpop.xlane.xlu2 %1178 }
 0x6ac   :  { %v1183_v33 = vsub.f32 %v4463_v35, %v1179_v32 }
 0x6ae   :  { %v1185_v36 = vmul.f32 1.442695, %v1183_v33 }
 0x6b0   :  { %3715 = vpow2.f32 %v1185_v36 }
 0x6b1   :  { %3717 = vpow2.f32 %v1301_v21 }
 0x6b3   :  { %v1182_v27 = vpop.xlane.xlu1 %1181  ;;  %v4536_v34 = vpop.xlane.xlu2 %1297 }
 0x6b4   :  { %v1184_v23 = vsub.f32 %v4470_v57, %v1182_v27 }
 0x6b6   :  { %v4531_v38 = vpop.eup %3715  ;;  %v1187_v53 = vmul.f32 1.442695, %v1184_v23 }
 0x6b7   :  { %v1189_v43 = vsel %vm661_vm12, %v4531_v38, 0.0  ;;  %v4538_v35 = vpop.eup %3717 }
 0x6b8   :  { %1190 = vadd.xlane.f32.xlu0 %v1189_v43  ;;  %3719 = vpow2.f32 %v1187_v53  ;;  %v1305_v54 = vsel %vm661_vm12, %v4538_v35, 0.0 }
 0x6bb   :  { %v1419_v61 = vpop.xlane.xlu0 %1418 }
 0x6bc   :  { %v1423_v9 = vsub.f32 %v4477_v44, %v1419_v61 }
 0x6be   :  { %v1425_v63 = vmul.f32 1.442695, %v1423_v9  ;;  %v4546_v52 = vpop.eup %3719 }
 0x6bf   :  { %v1192_v44 = vsel %vm661_vm12, %v4546_v52, 0.0 }
 0x6c0   :  { %1306 = vadd.xlane.f32.xlu0 %v1305_v54  ;;  %v397_v54 = vadd.f32 %v4424_v41, %v4281_v16 }
 0x6c2   :  { %v1541_v45 = vpop.xlane.xlu1 %1540 }
 0x6c3   :  { %v1545_v57 = vsub.f32 %v4484_v20, %v1541_v45  ;;  %v4544_v10 = vpop.xlane.xlu2 %1421  ;;  %v792_v50 = vpop.xlane.xlu0 %791 }
 0x6c4   :  { %3721 = vrcp.f32 %v792_v50  ;;  %v807_v24 = vand.u32 2147483648, %v792_v50  ;;  %v805_v31 = vand.u32 2147483647, %v792_v50  ;;  %vm801_vm7 = vweird.f32 %v792_v50 }
 0x6c5   :  { %v1547_v49 = vmul.f32 1.442695, %v1545_v57  ;;  %3723 = vpow2.f32 %v1425_v63  ;;  %v1300_v63 = vsub.f32 %v4467_v37, %v4536_v34  ;;  %v395_v57 = vadd.f32 %v4422_v47, %v4281_v16 }
 0x6c6   :  { %v808_v13 = vor.u32 1.1754944e-38, %v807_v24  ;;  %vm806_vm9 = vcmp.eq.f32.partialorder %v805_v31, 8.507059e+37 }
 0x6c7   :  { %3725 = vpow2.f32 %v1547_v49  ;;  %v1303_v49 = vmul.f32 1.442695, %v1300_v63  ;;  %v1424_v63 = vsub.f32 %v4487_v56, %v4544_v10 }
 0x6c8   :  { %1193 = vadd.xlane.f32.xlu0 %v1192_v44 }
 0x6ca   :  { %v3722_v48 = vpop.eup %3721  ;;  %v1544_v36 = vpop.xlane.xlu1 %1543 }
 0x6cb   :  { %v797_v8 = vmul.f32 %v3722_v48, %v792_v50  ;;  %v3568_v58 = vpop.permute.xlu2 %3567  ;;  %v4550_v60 = vpop.xlane.xlu0 %915  ;;  %vm802_vm6 = vweird.f32 %v3722_v48  ;;  %v1546_v37 = vsub.f32 %v4500_v7, %v1544_v36 }
 0x6cc   :  { %v4552_v62 = vpop.eup %3723  ;;  %v3569_v39 = vunpack.i.l.bf16 %v3568_v58  ;;  %v3570_v15 = vunpack.i.h.bf16 %v3568_v58  ;;  %vm803_vm8 = vmor %vm801_vm7, %vm802_vm6  ;;  %3727 = vrcp.f32 %v4550_v60  ;;  %vm925_vm11 = vweird.f32 %v4550_v60 }
 0x6cd   :  { %v4554_v20 = vpop.eup %3725  ;;  %v798_v6 = vsub.f32 1.0, %v797_v8  ;;  %v1429_v28 = vsel %vm661_vm12, %v4552_v62, 0.0  ;;  %v1549_v8 = vmul.f32 1.442695, %v1546_v37  ;;  %v929_v7 = vand.u32 2147483647, %v4550_v60 }
 0x6ce   :  { %v1551_v11 = vsel %vm661_vm12, %v4554_v20, 0.0  ;;  %854 = vmatpush.msrb.mxu1 %v3569_v39 }
 0x6cf   :  { %v799_v18 = vmul.f32 %v3722_v48, %v798_v6  ;;  %1552 = vadd.xlane.f32.xlu1 %v1551_v11  ;;  %vm930_vm14 = vcmp.eq.f32.partialorder %v929_v7, 8.507059e+37 }
 0x6d0   :  { %1430 = vadd.xlane.f32.xlu0 %v1429_v28  ;;  %855 = vmatpush.msrb.mxu1 %v3570_v15 }
 0x6d1   :  { %v800_v30 = vadd.f32 %v3722_v48, %v799_v18  ;;  %v931_v18 = vand.u32 2147483648, %v4550_v60 }
 0x6d2   :  { %v3728_v9 = vpop.eup %3727  ;;  %v4574_v50 = vpop.xlane.xlu1 %1037 }
 0x6d3   :  { %v3578_v22 = vpop.permute.xlu2 %3577  ;;  %v4560_v32 = vpop.xlane.xlu0 %918  ;;  %v804_v27 = vsel %vm803_vm8, %v3722_v48, %v800_v30  ;;  %vm926_vm10 = vweird.f32 %v3728_v9  ;;  %v932_v30 = vor.u32 1.1754944e-38, %v931_v18 }
 0x6d4   :  { %v3579_v33 = vunpack.i.l.bf16 %v3578_v22  ;;  %v3580_v21 = vunpack.i.h.bf16 %v3578_v22  ;;  %v809_v23 = vsel %vm806_vm9, %v808_v13, %v804_v27  ;;  %3729 = vrcp.f32 %v4560_v32  ;;  %vm927_vm13 = vmor %vm925_vm11, %vm926_vm10 }
 0x6d5   :  { %v810_v43 = vmul.f32 %v4481_v46, %v809_v23  ;;  %v921_v46 = vmul.f32 %v3728_v9, %v4550_v60  ;;  %vm940_vm1 = vweird.f32 %v4560_v32  ;;  %v944_v23 = vand.u32 2147483647, %v4560_v32 }
 0x6d6   :  { %1098 = vmatpush.msra.mxu1 %v3579_v33 }
 0x6d7   :  { %3385 = vmatmul.msk.f32.vlgmr.msrb.gmra.mxu1 %vm661_vm12, %v810_v43  ;;  %v922_v44 = vsub.f32 1.0, %v921_v46  ;;  %vm945_vm3 = vcmp.eq.f32.partialorder %v944_v23, 8.507059e+37 }
 0x6d8   :  { %1099 = vmatpush.msra.mxu1 %v3580_v21  ;;  %v946_v21 = vand.u32 2147483648, %v4560_v32 }
 0x6d9   :  { %v923_v16 = vmul.f32 %v3728_v9, %v922_v44 }
 0x6da   :  { %v3730_v41 = vpop.eup %3729  ;;  %v4584_v58 = vpop.xlane.xlu1 %1040 }
 0x6db   :  { %v783_v53 = vpop.xlane.xlu0 %782  ;;  %v936_v47 = vmul.f32 %v3730_v41, %v4560_v32  ;;  %v924_v39 = vadd.f32 %v3728_v9, %v923_v16  ;;  %vm941_vm15 = vweird.f32 %v3730_v41  ;;  %v1427_v32 = vmul.f32 1.442695, %v1424_v63 }
 0x6dc   :  { %v785_v61 = vsub.f32 %v4518_v25, %v783_v53  ;;  %v3581_v25 = vpack.i.bf16 %v395_v57, %v397_v54  ;;  %vm942_vm2 = vmor %vm940_vm1, %vm941_vm15 }
 0x6dd   :  { %v937_v11 = vsub.f32 1.0, %v936_v47  ;;  %v928_v28 = vsel %vm927_vm13, %v3728_v9, %v924_v39 }
 0x6de   :  { %v788_v45 = vmul.f32 1.442695, %v785_v61  ;;  %v933_v22 = vsel %vm930_vm14, %v932_v30, %v928_v28  ;;  %v947_v61 = vor.u32 1.1754944e-38, %v946_v21 }
 0x6df   :  { %v938_v24 = vmul.f32 %v3730_v41, %v937_v11  ;;  %v934_v60 = vmul.f32 %v4497_v59, %v933_v22 }
 0x6e0   :  { %3731 = vpow2.f32 %v788_v45 }
 0x6e1   :  { %3733 = vpow2.f32 %v1303_v49  ;;  %v939_v36 = vadd.f32 %v3730_v41, %v938_v24 }
 0x6e2   :  { %3735 = vpow2.f32 %v1549_v8 }
 0x6e3   :  { %v943_v53 = vsel %vm942_vm2, %v3730_v41, %v939_v36  ;;  %3737 = vpow2.f32 %v1427_v32 }
 0x6e4   :  { %3582 = vrot.lane.b32.xlu0 %v3581_v25, %s3997_s22  ;;  %v948_v9 = vsel %vm945_vm3, %v947_v61, %v943_v53 }
 0x6e5   :  { %v949_v59 = vmul.f32 %v4510_v29, %v948_v9 }
 0x6e6   :  { %v4577_v48 = vpop.eup %3731 }
 0x6e7   :  { %v793_v34 = vsel %vm661_vm12, %v4577_v48, 0.0  ;;  %v4586_v6 = vpop.eup %3733 }
 0x6e8   :  { %3587 = vrot.lane.b32.xlu1 %v3581_v25, %s4001_s25  ;;  %794 = vadd.xlane.f32.xlu2 %v793_v34  ;;  %v1308_v15 = vsel %vm661_vm12, %v4586_v6, 0.0  ;;  %v4593_v13 = vpop.eup %3735 }
 0x6e9   :  { %v1554_v43 = vsel %vm661_vm12, %v4593_v13, 0.0  ;;  %v4606_v45 = vpop.eup %3737 }
 0x6ea   :  { %v1432_v46 = vsel %vm661_vm12, %v4606_v45, 0.0 }
 0x6f0   :  { %1309 = vadd.xlane.f32.xlu2 %v1308_v15 }
 0x6f2   :  { %v3573_v31 = vpop.permute.xlu1 %3572 }
 0x6f3   :  { %v3574_v33 = vunpack.i.l.bf16 %v3573_v31  ;;  %v3575_v27 = vunpack.i.h.bf16 %v3573_v31 }
 0x6f5   :  { %976 = vmatpush.msrb.mxu3 %v3574_v33 }
 0x6f7   :  { %977 = vmatpush.msrb.mxu3 %v3575_v27 }
 0x6f8   :  { %3391 = vmatmul.msk.f32.vlgmr.msrb.gmra.mxu3 %vm661_vm12, %v934_v60  ;;  %1555 = vadd.xlane.f32.xlu2 %v1554_v43 }
 0x6f9   :  { %1245 = vmatpush.msra.mxu3 %v397_v54 }
 0x6fb   :  { %1246 = vmatpush.msra.mxu3 %v395_v57 }
 0x700   :  { %3392 = vmatmul.msk.f32.gmra.mxu3 %vm661_vm12, %v949_v59 }
 0x70e   :  { %1433 = vadd.xlane.f32.xlu0 %v1432_v46 }
 0x710   :  { %3592 = vrot.lane.b32.xlu2 %v3581_v25, %s4002_s4 }
 0x72b   :  { %v1191_v54 = vpop.xlane.xlu0 %1190 }
 0x72c   :  { %3739 = vrcp.f32 %v1191_v54  ;;  %v1206_v29 = vand.u32 2147483648, %v1191_v54  ;;  %v1204_v41 = vand.u32 2147483647, %v1191_v54  ;;  %vm1200_vm6 = vweird.f32 %v1191_v54 }
 0x72e   :  { %v1207_v34 = vor.u32 1.1754944e-38, %v1206_v29  ;;  %vm1205_vm8 = vcmp.eq.f32.partialorder %v1204_v41, 8.507059e+37 }
 0x732   :  { %v3740_v57 = vpop.eup %3739 }
 0x733   :  { %v1196_v49 = vmul.f32 %v3740_v57, %v1191_v54  ;;  %v4611_v44 = vpop.xlane.xlu0 %1306  ;;  %vm1201_vm4 = vweird.f32 %v3740_v57 }
 0x734   :  { %vm1202_vm7 = vmor %vm1200_vm6, %vm1201_vm4 }
 0x735   :  { %v1197_v56 = vsub.f32 1.0, %v1196_v49 }
 0x737   :  { %v1198_v10 = vmul.f32 %v3740_v57, %v1197_v56 }
 0x739   :  { %v1199_v37 = vadd.f32 %v3740_v57, %v1198_v10 }
 0x73b   :  { %v1203_v16 = vsel %vm1202_vm7, %v3740_v57, %v1199_v37  ;;  %v1194_v47 = vpop.xlane.xlu0 %1193 }
 0x73c   :  { %v1208_v8 = vsel %vm1205_vm8, %v1207_v34, %v1203_v16  ;;  %3741 = vrcp.f32 %v1194_v47  ;;  %v1221_v15 = vand.u32 2147483648, %v1194_v47  ;;  %v1219_v24 = vand.u32 2147483647, %v1194_v47 }
 0x73d   :  { %v1209_v25 = vmul.f32 %v4531_v38, %v1208_v8  ;;  %vm1215_vm10 = vweird.f32 %v1194_v47 }
 0x73e   :  { %v1222_v22 = vor.u32 1.1754944e-38, %v1221_v15  ;;  %vm1220_vm13 = vcmp.eq.f32.partialorder %v1219_v24, 8.507059e+37 }
 0x73f   :  { %3403 = vmatmul.msk.f32.vlgmr.msra.gmra.mxu3 %vm661_vm12, %v1209_v25 }
 0x742   :  { %v3742_v39 = vpop.eup %3741  ;;  %v4617_v23 = vpop.xlane.xlu1 %1552 }
 0x743   :  { %v1211_v11 = vmul.f32 %v3742_v39, %v1194_v47  ;;  %v1431_v18 = vpop.xlane.xlu0 %1430  ;;  %vm1216_vm9 = vweird.f32 %v3742_v39 }
 0x744   :  { %3743 = vrcp.f32 %v1431_v18  ;;  %vm1217_vm11 = vmor %vm1215_vm10, %vm1216_vm9  ;;  %v1446_v53 = vand.u32 2147483648, %v1431_v18  ;;  %vm1440_vm15 = vweird.f32 %v1431_v18  ;;  %v1444_v61 = vand.u32 2147483647, %v1431_v18 }
 0x745   :  { %v1212_v7 = vsub.f32 1.0, %v1211_v11  ;;  %3745 = vrcp.f32 %v4574_v50  ;;  %vm1047_vm9 = vweird.f32 %v4574_v50 }
 0x746   :  { %v1447_v32 = vor.u32 1.1754944e-38, %v1446_v53  ;;  %vm1445_vm2 = vcmp.eq.f32.partialorder %v1444_v61, 8.507059e+37 }
 0x747   :  { %v1213_v28 = vmul.f32 %v3742_v39, %v1212_v7 }
 0x749   :  { %v1214_v30 = vadd.f32 %v3742_v39, %v1213_v28 }
 0x74a   :  { %v3744_v31 = vpop.eup %3743 }
 0x74b   :  { %v1436_v33 = vmul.f32 %v3744_v31, %v1431_v18  ;;  %v1218_v36 = vsel %vm1217_vm11, %v3742_v39, %v1214_v30  ;;  %vm1441_vm14 = vweird.f32 %v3744_v31  ;;  %v3746_v54 = vpop.eup %3745 }
 0x74c   :  { %v1223_v38 = vsel %vm1220_vm13, %v1222_v22, %v1218_v36  ;;  %vm1442_vm1 = vmor %vm1440_vm15, %vm1441_vm14  ;;  %v1043_v10 = vmul.f32 %v3746_v54, %v4574_v50  ;;  %vm1048_vm6 = vweird.f32 %v3746_v54  ;;  %v1053_v36 = vand.u32 2147483648, %v4574_v50 }
 0x74d   :  { %v1437_v21 = vsub.f32 1.0, %v1436_v33  ;;  %v1224_v27 = vmul.f32 %v4546_v52, %v1223_v38  ;;  %vm1049_vm10 = vmor %vm1047_vm9, %vm1048_vm6  ;;  %vm1062_vm14 = vweird.f32 %v4584_v58 }
 0x74e   :  { %v1044_v34 = vsub.f32 1.0, %v1043_v10  ;;  %v1054_v61 = vor.u32 1.1754944e-38, %v1053_v36 }
 0x74f   :  { %3404 = vmatmul.msk.f32.gmra.mxu3 %vm661_vm12, %v1224_v27  ;;  %v1438_v60 = vmul.f32 %v3744_v31, %v1437_v21  ;;  %v1051_v21 = vand.u32 2147483647, %v4574_v50  ;;  %v1068_v50 = vand.u32 2147483648, %v4584_v58 }
 0x750   :  { %v1045_v39 = vmul.f32 %v3746_v54, %v1044_v34 }
 0x751   :  { %v1439_v43 = vadd.f32 %v3744_v31, %v1438_v60  ;;  %vm1052_vm11 = vcmp.eq.f32.partialorder %v1051_v21, 8.507059e+37 }
 0x752   :  { %v1046_v24 = vadd.f32 %v3746_v54, %v1045_v39 }
 0x753   :  { %v1443_v59 = vsel %vm1442_vm1, %v3744_v31, %v1439_v43 }
 0x754   :  { %v1448_v57 = vsel %vm1445_vm2, %v1447_v32, %v1443_v59  ;;  %v1050_v60 = vsel %vm1049_vm10, %v3746_v54, %v1046_v24  ;;  %v1066_v54 = vand.u32 2147483647, %v4584_v58 }
 0x755   :  { %v1449_v41 = vmul.f32 %v4552_v62, %v1448_v57 }
 0x756   :  { %v3583_v9 = vpop.permute.xlu0 %3582  ;;  %vm1067_vm1 = vcmp.eq.f32.partialorder %v1066_v54, 8.507059e+37 }
 0x757   :  { %v3584_v63 = vunpack.i.l.bf16 %v3583_v9  ;;  %v3585_v46 = vunpack.i.h.bf16 %v3583_v9  ;;  %v1055_v9 = vsel %vm1052_vm11, %v1054_v61, %v1050_v60 }
 0x759   :  { %1369 = vmatpush.msrb.mxu1 %v3584_v63 }
 0x75a   :  { %v3588_v52 = vpop.permute.xlu1 %3587 }
 0x75b   :  { %v3589_v49 = vunpack.i.l.bf16 %v3588_v52  ;;  %v795_v56 = vpop.xlane.xlu2 %794  ;;  %1370 = vmatpush.msrb.mxu1 %v3585_v46  ;;  %v3590_v29 = vunpack.i.h.bf16 %v3588_v52  ;;  %v1056_v52 = vmul.f32 %v4508_v42, %v1055_v9 }
 0x75c   :  { %3747 = vrcp.f32 %v795_v56  ;;  %v822_v11 = vand.u32 2147483648, %v795_v56  ;;  %v820_v15 = vand.u32 2147483647, %v795_v56  ;;  %vm816_vm4 = vweird.f32 %v795_v56 }
 0x75d   :  { %1491 = vmatpush.msrb.mxu3 %v3589_v49  ;;  %3749 = vrcp.f32 %v4584_v58 }
 0x75e   :  { %3751 = vrcp.f32 %v4611_v44  ;;  %v823_v28 = vor.u32 1.1754944e-38, %v822_v11  ;;  %vm821_vm8 = vcmp.eq.f32.partialorder %v820_v15, 8.507059e+37 }
 0x75f   :  { %1492 = vmatpush.msrb.mxu3 %v3590_v29  ;;  %v1069_v29 = vor.u32 1.1754944e-38, %v1068_v50 }
 0x760   :  { %3415 = vmatmul.msk.f32.vlgmr.msrb.gmra.mxu3 %vm661_vm12, %v1449_v41 }
 0x762   :  { %v3748_v37 = vpop.eup %3747 }
 0x763   :  { %v812_v16 = vmul.f32 %v3748_v37, %v795_v56  ;;  %v4624_v47 = vpop.xlane.xlu2 %1309  ;;  %v3750_v8 = vpop.eup %3749  ;;  %vm817_vm3 = vweird.f32 %v3748_v37 }
 0x764   :  { %v1058_v18 = vmul.f32 %v3750_v8, %v4584_v58  ;;  %vm818_vm7 = vmor %vm816_vm4, %vm817_vm3  ;;  %v3752_v33 = vpop.eup %3751  ;;  %3753 = vrcp.f32 %v4624_v47  ;;  %vm1063_vm13 = vweird.f32 %v3750_v8  ;;  %vm1316_vm3 = vweird.f32 %v4611_v44 }
 0x765   :  { %v813_v25 = vsub.f32 1.0, %v812_v16  ;;  %v1312_v53 = vmul.f32 %v3752_v33, %v4611_v44  ;;  %3755 = vrcp.f32 %v4617_v23  ;;  %vm1064_vm15 = vmor %vm1062_vm14, %vm1063_vm13  ;;  %vm1317_vm2 = vweird.f32 %v3752_v33 }
 0x766   :  { %v1059_v30 = vsub.f32 1.0, %v1058_v18  ;;  %v1322_v16 = vand.u32 2147483648, %v4611_v44  ;;  %vm1318_vm4 = vmor %vm1316_vm3, %vm1317_vm2  ;;  %v1335_v36 = vand.u32 2147483647, %v4624_v47  ;;  %vm1562_vm13 = vweird.f32 %v4617_v23 }
 0x767   :  { %v814_v7 = vmul.f32 %v3748_v37, %v813_v25  ;;  %v1313_v63 = vsub.f32 1.0, %v1312_v53  ;;  %v1320_v25 = vand.u32 2147483647, %v4611_v44 }
 0x768   :  { %v1060_v43 = vmul.f32 %v3750_v8, %v1059_v30  ;;  %v1337_v30 = vand.u32 2147483648, %v4624_v47  ;;  %vm1336_vm10 = vcmp.eq.f32.partialorder %v1335_v36, 8.507059e+37 }
 0x769   :  { %v815_v62 = vadd.f32 %v3748_v37, %v814_v7  ;;  %v1314_v57 = vmul.f32 %v3752_v33, %v1313_v63  ;;  %v1323_v7 = vor.u32 1.1754944e-38, %v1322_v16  ;;  %vm1321_vm6 = vcmp.eq.f32.partialorder %v1320_v25, 8.507059e+37 }
 0x76a   :  { %v1061_v32 = vadd.f32 %v3750_v8, %v1060_v43  ;;  %v3754_v46 = vpop.eup %3753  ;;  %v1338_v43 = vor.u32 1.1754944e-38, %v1337_v30  ;;  %v1566_v63 = vand.u32 2147483647, %v4617_v23 }
 0x76b   :  { %v4628_v31 = vpop.xlane.xlu2 %1555  ;;  %v819_v22 = vsel %vm818_vm7, %v3748_v37, %v815_v62  ;;  %v1327_v49 = vmul.f32 %v3754_v46, %v4624_v47  ;;  %v1315_v37 = vadd.f32 %v3752_v33, %v1314_v57  ;;  %v4644_v58 = vpop.eup %3755  ;;  %vm1332_vm7 = vweird.f32 %v3754_v46 }
 0x76c   :  { %v824_v38 = vsel %vm821_vm8, %v823_v28, %v819_v22  ;;  %v1065_v56 = vsel %vm1064_vm15, %v3750_v8, %v1061_v32  ;;  %3757 = vrcp.f32 %v4628_v31  ;;  %v1558_v11 = vmul.f32 %v4644_v58, %v4617_v23 }
 0x76d   :  { %v825_v27 = vmul.f32 %v4577_v48, %v824_v38  ;;  %v1070_v41 = vsel %vm1067_vm1, %v1069_v29, %v1065_v56  ;;  %v1328_v42 = vsub.f32 1.0, %v1327_v49  ;;  %v1319_v39 = vsel %vm1318_vm4, %v3752_v33, %v1315_v37 }
 0x76e   :  { %v1071_v8 = vmul.f32 %v4516_v14, %v1070_v41  ;;  %v1324_v62 = vsel %vm1321_vm6, %v1323_v7, %v1319_v39  ;;  %v1559_v28 = vsub.f32 1.0, %v1558_v11  ;;  %vm1331_vm8 = vweird.f32 %v4624_v47  ;;  %v857_v39 = vpop.f32.mrf.mxu1  ;;  %v3530_v7 = vld [vmem:[%s5372_s6 + $0xc] sm:$0xf0] }
 0x76f   :  { %3386 = vmatmul.msk.f32.gmra.mxu1 %vm661_vm12, %v825_v27  ;;  %v1329_v18 = vmul.f32 %v3754_v46, %v1328_v42  ;;  %v1325_v33 = vmul.f32 %v4538_v35, %v1324_v62  ;;  %vm1333_vm9 = vmor %vm1331_vm8, %vm1332_vm7  ;;  %vm1563_vm11 = vweird.f32 %v4644_v58  ;;  %vm1567_vm3 = vcmp.eq.f32.partialorder %v1566_v63, 8.507059e+37 }
 0x770   :  { %v1560_v38 = vmul.f32 %v4644_v58, %v1559_v28  ;;  %vm1564_vm15 = vmor %vm1562_vm13, %vm1563_vm11  ;;  %v1583_v37 = vand.u32 2147483648, %v4628_v31  ;;  %vm1577_vm7 = vweird.f32 %v4628_v31 }
 0x771   :  { %v1330_v44 = vadd.f32 %v3754_v46, %v1329_v18 }
 0x772   :  { %v3758_v14 = vpop.eup %3757  ;;  %v1561_v35 = vadd.f32 %v4644_v58, %v1560_v38  ;;  %v1584_v16 = vor.u32 1.1754944e-38, %v1583_v37 }
 0x773   :  { %v3593_v59 = vpop.permute.xlu2 %3592  ;;  %v1573_v21 = vmul.f32 %v3758_v14, %v4628_v31  ;;  %v1334_v27 = vsel %vm1333_vm9, %v3754_v46, %v1330_v44  ;;  %vm1578_vm6 = vweird.f32 %v3758_v14 }
 0x774   :  { %v3594_v48 = vunpack.i.l.bf16 %v3593_v59  ;;  %v3595_v10 = vunpack.i.h.bf16 %v3593_v59  ;;  %v1339_v61 = vsel %vm1336_vm10, %v1338_v43, %v1334_v27  ;;  %v1568_v59 = vand.u32 2147483648, %v4617_v23  ;;  %vm1579_vm8 = vmor %vm1577_vm7, %vm1578_vm6 }
 0x775   :  { %v1574_v47 = vsub.f32 1.0, %v1573_v21  ;;  %v1340_v46 = vmul.f32 %v4586_v6, %v1339_v61  ;;  %vm1135_vm10 = vcmask 195584  }
 0x776   :  { %v1569_v49 = vor.u32 1.1754944e-38, %v1568_v59 }
 0x777   :  { %3397 = vmatmul.msk.f32.vlgmr.msra.gmra.mxu1 %vm661_vm12, %v1056_v52  ;;  %v1565_v52 = vsel %vm1564_vm15, %v4644_v58, %v1561_v35  ;;  %v1575_v54 = vmul.f32 %v3758_v14, %v1574_v47 }
 0x778   :  { %1613 = vmatpush.msra.mxu1 %v3594_v48  ;;  %v1570_v23 = vsel %vm1567_vm3, %v1569_v49, %v1565_v52 }
 0x779   :  { %v1576_v41 = vadd.f32 %v3758_v14, %v1575_v54  ;;  %v1571_v42 = vmul.f32 %v4554_v20, %v1570_v23  ;;  %v3531_v20 = vld [vmem:[%s5372_s6 + $0x24] sm:$0xf0] }
 0x77a   :  { %1614 = vmatpush.msra.mxu1 %v3595_v10 }
 0x77b   :  { %v979_v34 = vpop.f32.mrf.mxu3  ;;  %v1580_v58 = vsel %vm1579_vm8, %v3758_v14, %v1576_v41 }
 0x77f   :  { %3398 = vmatmul.msk.f32.gmra.mxu1 %vm661_vm12, %v1071_v8  ;;  %v3429_v8 = vld [vmem:[%s5372_s6 + $0x1c] sm:$0xf] }
 0x781   :  { %v1434_v15 = vpop.xlane.xlu0 %1433 }
 0x782   :  { %3759 = vrcp.f32 %v1434_v15  ;;  %v1461_v32 = vand.u32 2147483648, %v1434_v15  ;;  %v1459_v48 = vand.u32 2147483647, %v1434_v15  ;;  %vm1455_vm1 = vweird.f32 %v1434_v15 }
 0x783   :  { %v982_v24 = vpop.f32.mrf.mxu3 }
 0x784   :  { %v3596_v22 = vpack.i.bf16 %v982_v24, %v979_v34  ;;  %v1462_v56 = vor.u32 1.1754944e-38, %v1461_v32  ;;  %vm1460_vm4 = vcmp.eq.f32.partialorder %v1459_v48, 8.507059e+37  ;;  %v1581_v34 = vand.u32 2147483647, %v4628_v31 }
 0x785   :  { %v4685_v31 = vor.u32 %v3531_v20, %v3429_v8 }
 0x786   :  { %3597 = vrot.lane.b32.xlu0 %v3596_v22, %s4003_s26  ;;  %vm1582_vm9 = vcmp.eq.f32.partialorder %v1581_v34, 8.507059e+37 }
 0x787   :  { %3409 = vmatmul.msk.f32.vlgmr.msrb.gmra.mxu1 %vm661_vm12, %v1325_v33  ;;  %v1585_v25 = vsel %vm1582_vm9, %v1584_v16, %v1580_v58  ;;  %1666 = vrot.lane.b32.xlu1 %v4685_v31, %s3996_s16 }
 0x788   :  { %v3760_v60 = vpop.eup %3759 }
 0x789   :  { %v1451_v53 = vmul.f32 %v3760_v60, %v1434_v15  ;;  %vm1456_vm14 = vweird.f32 %v3760_v60 }
 0x78a   :  { %vm1457_vm2 = vmor %vm1455_vm1, %vm1456_vm14 }
 0x78b   :  { %v1452_v9 = vsub.f32 1.0, %v1451_v53 }
 0x78d   :  { %v1453_v50 = vmul.f32 %v3760_v60, %v1452_v9 }
 0x78f   :  { %3410 = vmatmul.msk.f32.gmra.mxu1 %vm661_vm12, %v1340_v46  ;;  %v1454_v57 = vadd.f32 %v3760_v60, %v1453_v50 }
 0x791   :  { %v1458_v29 = vsel %vm1457_vm2, %v3760_v60, %v1454_v57 }
 0x792   :  { %v1463_v10 = vsel %vm1460_vm4, %v1462_v56, %v1458_v29 }
 0x793   :  { %v1464_v6 = vmul.f32 %v4606_v45, %v1463_v10  ;;  %v1586_v45 = vmul.f32 %v4593_v13, %v1585_v25  ;;  %v3425_v13 = vld [vmem:[%s5372_s6 + $0x4] sm:$0xf] }
 0x794   :  { %v4696_v15 = vor.u32 %v3530_v7, %v3425_v13 }
 0x795   :  { %3416 = vmatmul.msk.f32.gmra.mxu3 %vm661_vm12, %v1464_v6 }
 0x797   :  { %3421 = vmatmul.msk.f32.vlgmr.msra.gmra.mxu1 %vm661_vm12, %v1571_v42 }
 0x79f   :  { %3422 = vmatmul.msk.f32.gmra.mxu1 %vm661_vm12, %v1586_v45 }
 0x7c2   :  { %v1248_v44 = vpop.f32.mrf.mxu3 }
 0x7d2   :  { %v1251_v30 = vpop.f32.mrf.mxu3 }
 0x7e3   :  { %v1494_v36 = vpop.f32.mrf.mxu3 }
 0x7ec   :  { %v860_v11 = vpop.f32.mrf.mxu1 }
 0x7ed   :  { %v3601_v18 = vpack.i.bf16 %v860_v11, %v857_v39 }
 0x7ef   :  { %3602 = vrot.lane.b32.xlu2 %v3601_v18, %s3989_s18 }
 0x7f4   :  { %v1101_v62 = vpop.f32.mrf.mxu1 }
 0x7f7   :  { %1664 = vrot.lane.b32.xlu2 %v4696_v15, %s3996_s16 }
 0x7f8   :  { %v3598_v63 = vpop.permute.xlu0 %3597 }
 0x7f9   :  { %v1667_v61 = vpop.permute.xlu1 %1666  ;;  %v3600_v50 = vunpack.i.h.bf16 %v3598_v63  ;;  %v3599_v46 = vunpack.i.l.bf16 %v3598_v63 }
 0x7fa   :  { %1682 = vmatpush.bf16.msra.mxu2 %v1667_v61  ;;  %v143_v61 = vld [vmem:[%s5369_s3 + $0x8] sm:$0x1] }
 0x7fc   :  { %v1104_v28 = vpop.f32.mrf.mxu1 }
 0x7fd   :  { %v3606_v24 = vpack.i.bf16 %v1104_v28, %v1101_v62  ;;  %v139_v62 = vld [vmem:[%s5369_s3 + $0x2] sm:$0x1]  ;;  %v140_v28 = vld [vmem:[%s5371_s5 + $0x20] ss:$0 sm:$0xff] }
 0x7ff   :  { %3607 = vrot.lane.b32.xlu1 %v3606_v24, %s4004_s12  ;;  %v141_v24 = vadd.f32 %v140_v28, %v139_v62 }
 0x804   :  { %v1372_v14 = vpop.f32.mrf.mxu1 }
 0x80c   :  { %v1375_v22 = vpop.f32.mrf.mxu1 }
 0x80d   :  { %v3611_v33 = vpack.i.bf16 %v1375_v22, %v1372_v14  ;;  %v142_v14 = vperm.slane %v141_v24, 0 }
 0x80f   :  { %3612 = vrot.lane.b32.xlu1 %v3611_v33, %s3989_s18 }
 0x814   :  { %v1616_v38 = vpop.f32.mrf.mxu1 }
 0x818   :  { %v1497_v21 = vpop.f32.mrf.mxu3 }
 0x819   :  { %v3616_v27 = vpack.i.bf16 %v1497_v21, %v1494_v36 }
 0x81b   :  { %3617 = vrot.lane.b32.xlu2 %v3616_v27, %s4003_s26 }
 0x81c   :  { %v1619_v60 = vpop.f32.mrf.mxu1 }
 0x81d   :  { %v3621_v43 = vpack.i.bf16 %v1619_v60, %v1616_v38 }
 0x81f   :  { %3622 = vrot.lane.b32.xlu0 %v3621_v43, %s4004_s12 }
 0x849   :  { %v3603_v53 = vpop.permute.xlu2 %3602 }
 0x84a   :  { %v3605_v47 = vunpack.i.h.bf16 %v3603_v53  ;;  %v3604_v9 = vunpack.i.l.bf16 %v3603_v53 }
 0x84c   :  { %v1132_v59 = vsel %vm627_vm5, %v4506_v19, %v3605_v47  ;;  %v1131_v32 = vsel %vm627_vm5, %v4495_v55, %v3604_v9  ;;  %v3534_v55 = vld [vmem:[%s5372_s6 + $0x20] sm:$0xf]  ;;  %v3447_v19 = vld [vmem:[%s5372_s6 + $0x28] sm:$0xf0]  ;;  %v144_v47 = vadd.f32 %v143_v61, %v140_v28 }
 0x84d   :  { %v1133_v57 = vsel %vm661_vm12, %v1131_v32, %v3599_v46  ;;  %v1134_v49 = vsel %vm661_vm12, %v1132_v59, %v3600_v50  ;;  %v3450_v10 = vor.u32 %v3534_v55, %v3447_v19 }
 0x84f   :  { %1863 = vrot.lane.b32.xlu0 %v3450_v10, %s4005_s19 }
 0x851   :  { %v1665_v35 = vpop.permute.xlu2 %1664 }
 0x852   :  { %1683 = vmatpush.bf16.msra.mxu2 %v1665_v35  ;;  %v3535_v35 = vld [vmem:[%s5372_s6 + $0x24] sm:$0xf0] }
 0x871   :  { %v3608_v48 = vpop.permute.xlu1 %3607 }
 0x872   :  { %v3610_v52 = vunpack.i.h.bf16 %v3608_v48  ;;  %v3609_v54 = vunpack.i.l.bf16 %v3608_v48 }
 0x874   :  { %v1136_v56 = vsel %vm1135_vm10, %v1133_v57, %v3609_v54  ;;  %v1137_v29 = vsel %vm1135_vm10, %v1134_v49, %v3610_v52 }
 0x875   :  { %v1652_v23 = vpack.c.bf16 %v1137_v29, %v1136_v56  ;;  %v3618_v42 = vpop.permute.xlu2 %3617 }
 0x876   :  { %v3620_v16 = vunpack.i.h.bf16 %v3618_v42  ;;  %v3619_v25 = vunpack.i.l.bf16 %v3618_v42 }
 0x877   :  { %3431 = vmatmul.msk.bf16.vlgmr.msra.gmra.mxu2 %vm172_vm0, %v1652_v23 }
 0x881   :  { %v3613_v6 = vpop.permute.xlu1 %3612 }
 0x882   :  { %v3615_v41 = vunpack.i.h.bf16 %v3613_v6  ;;  %v3614_v37 = vunpack.i.l.bf16 %v3613_v6 }
 0x884   :  { %v1647_v34 = vsel %vm627_vm5, %v1251_v30, %v3615_v41  ;;  %v1646_v58 = vsel %vm627_vm5, %v1248_v44, %v3614_v37  ;;  %v620_v44 = vld [vmem:[%s5371_s5 + $0x3] ss:$0 sm:$0xff] }
 0x885   :  { %v1648_v39 = vsel %vm661_vm12, %v1646_v58, %v3619_v25  ;;  %v1649_v11 = vsel %vm661_vm12, %v1647_v34, %v3620_v16  ;;  %v3532_v34 = vld [vmem:[%s5372_s6 + $0x8] sm:$0xf]  ;;  %v3439_v58 = vld [vmem:[%s5372_s6 + $0x10] sm:$0xf0]  ;;  %v3437_v25 = vld [vmem:[%s5372_s6 + $0x4] sm:$0xf] }
 0x886   :  { %v3442_v16 = vor.u32 %v3532_v34, %v3439_v58 }
 0x891   :  { %v3623_v45 = vpop.permute.xlu0 %3622 }
 0x892   :  { %v3625_v8 = vunpack.i.h.bf16 %v3623_v45  ;;  %v3624_v20 = vunpack.i.l.bf16 %v3623_v45  ;;  %v3533_v45 = vld [vmem:[%s5372_s6 + $0xc] sm:$0xf0] }
 0x894   :  { %v1650_v18 = vsel %vm1135_vm10, %v1648_v39, %v3624_v20  ;;  %v1651_v13 = vsel %vm1135_vm10, %v1649_v11, %v3625_v8  ;;  %v3438_v20 = vor.u32 %v3533_v45, %v3437_v25 }
 0x895   :  { %v1653_v7 = vpack.c.bf16 %v1651_v13, %v1650_v18 }
 0x897   :  { %3432 = vmatmul.msk.bf16.gmra.mxu2 %vm172_vm0, %v1653_v7 }
 0x8c1   :  { %v1864_v41 = vpop.permute.xlu0 %1863 }
 0x8fa   :  { %v1685_v30 = vpop.f32.mrf.mxu2 }
 0x8fb   :  { %v1686_v22 = vadd.f32 %v1685_v30, %v620_v44 }
 0x8fd   :  { %v1695_v33 = vmul.f32 %v1686_v22, %v142_v14 }
 0x8ff   :  { %v4737_v36 = vadd.f32 %v1695_v33, %v4103_v12  ;;  %v3445_v12 = vld [vmem:[%s5372_s6 + $0x1c] sm:$0xf] }
 0x900   :  { %v3446_v9 = vor.u32 %v3535_v35, %v3445_v12 }
 0x901   :  { %v1703_v38 = vsel %vm172_vm0, %v4737_v36, 0.0 }
 0x902   :  { %v1687_v21 = vpop.f32.mrf.mxu2  ;;  %1704 = vadd.xlane.f32.xlu1 %v1703_v38 }
 0x903   :  { %v1688_v27 = vadd.f32 %v1687_v21, %v620_v44 }
 0x905   :  { %v1696_v60 = vmul.f32 %v1688_v27, %v142_v14 }
 0x907   :  { %v4742_v43 = vadd.f32 %v1696_v60, %v4108_v17  ;;  %v145_v17 = vperm.slane %v144_v47, 0 }
 0x909   :  { %v1706_v53 = vsel %vm172_vm0, %v4742_v43, 0.0 }
 0x90a   :  { %1707 = vadd.xlane.f32.xlu2 %v1706_v53 }
 0x91a   :  { %v1690_v63 = vpop.f32.mrf.mxu2 }
 0x91b   :  { %v1691_v59 = vadd.f32 %v1690_v63, %v620_v44  ;;  %1861 = vrot.lane.b32.xlu1 %v3446_v9, %s4005_s19 }
 0x91d   :  { %v1697_v32 = vmul.f32 %v1691_v59, %v145_v17 }
 0x91f   :  { %v4757_v50 = vadd.f32 %v1697_v32, %v4130_v40 }
 0x921   :  { %v1709_v46 = vsel %vm172_vm0, %v4757_v50, 0.0 }
 0x922   :  { %1806 = vrot.lane.b32.xlu2 %v4685_v31, %s3995_s27  ;;  %1710 = vadd.xlane.f32.xlu0 %v1709_v46  ;;  %v1692_v48 = vpop.f32.mrf.mxu2 }
 0x923   :  { %v1693_v52 = vadd.f32 %v1692_v48, %v620_v44  ;;  %v119_v48 = vld [vmem:[#allocation6] sm:$0xff] }
 0x925   :  { %v1698_v54 = vmul.f32 %v1693_v52, %v145_v17  ;;  %v120_v52 = vld [vmem:[#allocation6 + $0x8] sm:$0xff] }
 0x927   :  { %v4764_v57 = vadd.f32 %v1698_v54, %v4204_v51 }
 0x929   :  { %v1712_v49 = vsel %vm172_vm0, %v4764_v57, 0.0 }
 0x94b   :  { %1713 = vadd.xlane.f32.xlu2 %v1712_v49 }
 0x963   :  { %1804 = vrot.lane.b32.xlu2 %v4696_v15, %s3995_s27 }
 0x975   :  { %v1705_v40 = vpop.xlane.xlu1 %1704 }
 0x976   :  { %v1715_v56 = vmul.f32 %v1705_v40, %v4113_v26 }
 0x978   :  { %v4772_v29 = vsub.f32 %v4737_v36, %v1715_v56  ;;  %v1791_v56 = vld [vmem:[%s5371_s5 + $0x4] ss:$0 sm:$0xff] }
 0x97a   :  { %v1723_v31 = vmul.f32 %v4772_v29, %v4772_v29 }
 0x97c   :  { %v1727_v23 = vsel %vm172_vm0, %v1723_v31, 0.0 }
 0x97d   :  { %v1708_v51 = vpop.xlane.xlu2 %1707  ;;  %1728 = vadd.xlane.f32.xlu1 %v1727_v23 }
 0x97e   :  { %v1716_v55 = vmul.f32 %v1708_v51, %v4113_v26  ;;  %v1839_v51 = vpack.c.bf16 %v120_v52, %v119_v48 }
 0x980   :  { %v4779_v19 = vsub.f32 %v4742_v43, %v1716_v55 }
 0x982   :  { %v1724_v15 = vmul.f32 %v4779_v19, %v4779_v19 }
 0x984   :  { %v1730_v10 = vsel %vm172_vm0, %v1724_v15, 0.0 }
 0x985   :  { %1731 = vadd.xlane.f32.xlu0 %v1730_v10  ;;  %v1807_v6 = vpop.permute.xlu2 %1806 }
 0x986   :  { %1822 = vmatpush.bf16.msra.mxu3 %v1807_v6 }
 0x98d   :  { %v1862_v37 = vpop.permute.xlu1 %1861 }
 0x98e   :  { %v1867_v42 = vsel %vm172_vm0, %v1862_v37, %v1864_v41 }
 0x98f   :  { %1879 = vmatpush.bf16.msrb.mxu0 %v1867_v42 }
 0x995   :  { %v1711_v8 = vpop.xlane.xlu0 %1710 }
 0x996   :  { %v1717_v39 = vmul.f32 %v1711_v8, %v4113_v26  ;;  %1859 = vrot.lane.b32.xlu1 %v3442_v16, %s4005_s19 }
 0x998   :  { %v4800_v11 = vsub.f32 %v4757_v50, %v1717_v39 }
 0x999   :  { %1857 = vrot.lane.b32.xlu0 %v3438_v20, %s4005_s19 }
 0x99a   :  { %v1725_v18 = vmul.f32 %v4800_v11, %v4800_v11 }
 0x99c   :  { %v1733_v13 = vsel %vm172_vm0, %v1725_v18, 0.0 }
 0x99d   :  { %1734 = vadd.xlane.f32.xlu2 %v1733_v13 }
 0x9be   :  { %v1714_v7 = vpop.xlane.xlu2 %1713 }
 0x9bf   :  { %v1718_v62 = vmul.f32 %v1714_v7, %v4113_v26 }
 0x9c1   :  { %v4808_v28 = vsub.f32 %v4764_v57, %v1718_v62 }
 0x9c3   :  { %v1726_v24 = vmul.f32 %v4808_v28, %v4808_v28 }
 0x9c5   :  { %v1736_v44 = vsel %vm172_vm0, %v1726_v24, 0.0 }
 0x9c6   :  { %1737 = vadd.xlane.f32.xlu0 %v1736_v44  ;;  %v1805_v14 = vpop.permute.xlu2 %1804 }
 0x9c7   :  { %1823 = vmatpush.bf16.msra.mxu3 %v1805_v14 }
 0x9f0   :  { %v1729_v30 = vpop.xlane.xlu1 %1728 }
 0x9f1   :  { %v1739_v22 = vmul.f32 %v1729_v30, %v4113_v26 }
 0x9f3   :  { %v1743_v33 = vadd.f32 1e-06, %v1739_v22 }
 0x9f5   :  { %3761 = vrsqrt.f32 %v1743_v33  ;;  %vm1753_vm13 = vweird.f32 %v1743_v33 }
 0x9f8   :  { %v1732_v38 = vpop.xlane.xlu0 %1731 }
 0x9f9   :  { %v1740_v21 = vmul.f32 %v1732_v38, %v4113_v26 }
 0x9fb   :  { %v3762_v27 = vpop.eup %3761  ;;  %v1744_v60 = vadd.f32 1e-06, %v1740_v21 }
 0x9fc   :  { %v1748_v53 = vmul.f32 %v3762_v27, %v1743_v33  ;;  %vm1754_vm11 = vweird.f32 %v3762_v27 }
 0x9fd   :  { %3763 = vrsqrt.f32 %v1744_v60  ;;  %vm1755_vm14 = vmor %vm1753_vm13, %vm1754_vm11  ;;  %vm1763_vm1 = vweird.f32 %v1744_v60 }
 0x9fe   :  { %v1749_v61 = vmul.f32 %v3762_v27, %v1748_v53 }
 0xa00   :  { %v1750_v12 = vmul.f32 0.5, %v1749_v61 }
 0xa02   :  { %v1751_v35 = vsub.f32 1.5, %v1750_v12 }
 0xa03   :  { %v3764_v47 = vpop.eup %3763 }
 0xa04   :  { %v1752_v9 = vmul.f32 %v3762_v27, %v1751_v35  ;;  %v1758_v17 = vmul.f32 %v3764_v47, %v1744_v60  ;;  %vm1764_vm15 = vweird.f32 %v3764_v47 }
 0xa05   :  { %vm1765_vm2 = vmor %vm1763_vm1, %vm1764_vm15 }
 0xa06   :  { %v1759_v63 = vmul.f32 %v3764_v47, %v1758_v17  ;;  %v1756_v59 = vsel %vm1755_vm14, %v3762_v27, %v1752_v9 }
 0xa07   :  { %v1787_v49 = vmul.f32 %v1756_v59, %v4772_v29  ;;  %v1796_v29 = vld [vmem:[%s5371_s5 + $0x5] ss:$0 sm:$0xff] }
 0xa08   :  { %v1760_v32 = vmul.f32 0.5, %v1759_v63  ;;  %v1860_v46 = vpop.permute.xlu1 %1859 }
 0xa09   :  { %v1792_v15 = vmul.f32 %v1791_v56, %v1787_v49 }
 0xa0a   :  { %v1761_v54 = vsub.f32 1.5, %v1760_v32  ;;  %v1803_v32 = vld [vmem:[%s5371_s5 + $0x6] ss:$0 sm:$0xff] }
 0xa0b   :  { %v1858_v40 = vpop.permute.xlu0 %1857  ;;  %v1797_v41 = vadd.f32 %v1796_v29, %v1792_v15 }
 0xa0c   :  { %v1762_v31 = vmul.f32 %v3764_v47, %v1761_v54  ;;  %v1866_v23 = vsel %vm172_vm0, %v1858_v40, %v1860_v46 }
 0xa0d   :  { %1880 = vmatpush.bf16.msrb.mxu0 %v1866_v23 }
 0xa0e   :  { %v1766_v55 = vsel %vm1765_vm2, %v3764_v47, %v1762_v31  ;;  %v1840_v47 = vld [vmem:[%s5371_s5 + $0x7] ss:$0 sm:$0xff] }
 0xa0f   :  { %v1788_v10 = vmul.f32 %v1766_v55, %v4779_v19 }
 0xa10   :  { %3451 = vmatmul.msk.bf16.vlgmr.msrb.gmra.mxu0 %vm172_vm0, %v1839_v51  ;;  %v1735_v34 = vpop.xlane.xlu2 %1734 }
 0xa11   :  { %v1793_v6 = vmul.f32 %v1791_v56, %v1788_v10  ;;  %v1741_v58 = vmul.f32 %v1735_v34, %v4113_v26 }
 0xa13   :  { %v1798_v37 = vadd.f32 %v1796_v29, %v1793_v6  ;;  %v1745_v16 = vadd.f32 1e-06, %v1741_v58 }
 0xa15   :  { %v1801_v42 = vpack.c.bf16 %v1798_v37, %v1797_v41  ;;  %3765 = vrsqrt.f32 %v1745_v16  ;;  %vm1773_vm4 = vweird.f32 %v1745_v16 }
 0xa17   :  { %3433 = vmatmul.msk.bf16.vlgmr.msra.gmra.mxu3 %vm172_vm0, %v1801_v42 }
 0xa1b   :  { %v3766_v25 = vpop.eup %3765 }
 0xa1c   :  { %v1768_v45 = vmul.f32 %v3766_v25, %v1745_v16  ;;  %vm1774_vm3 = vweird.f32 %v3766_v25 }
 0xa1d   :  { %vm1775_vm6 = vmor %vm1773_vm4, %vm1774_vm3 }
 0xa1e   :  { %v1769_v19 = vmul.f32 %v3766_v25, %v1768_v45 }
 0xa20   :  { %v1770_v18 = vmul.f32 0.5, %v1769_v19 }
 0xa22   :  { %v1771_v13 = vsub.f32 1.5, %v1770_v18 }
 0xa24   :  { %v1772_v62 = vmul.f32 %v3766_v25, %v1771_v13 }
 0xa26   :  { %v1776_v14 = vsel %vm1775_vm6, %v3766_v25, %v1772_v62 }
 0xa27   :  { %v1789_v33 = vmul.f32 %v1776_v14, %v4800_v11 }
 0xa29   :  { %v1794_v60 = vmul.f32 %v1791_v56, %v1789_v33 }
 0xa2b   :  { %v1799_v61 = vadd.f32 %v1796_v29, %v1794_v60 }
 0xa39   :  { %v1738_v8 = vpop.xlane.xlu0 %1737 }
 0xa3a   :  { %v1742_v20 = vmul.f32 %v1738_v8, %v4113_v26 }
 0xa3c   :  { %v1746_v39 = vadd.f32 1e-06, %v1742_v20 }
 0xa3e   :  { %3767 = vrsqrt.f32 %v1746_v39  ;;  %vm1783_vm8 = vweird.f32 %v1746_v39 }
 0xa44   :  { %v3768_v7 = vpop.eup %3767 }
 0xa45   :  { %v1778_v24 = vmul.f32 %v3768_v7, %v1746_v39  ;;  %vm1784_vm7 = vweird.f32 %v3768_v7 }
 0xa46   :  { %vm1785_vm9 = vmor %vm1783_vm8, %vm1784_vm7 }
 0xa47   :  { %v1779_v44 = vmul.f32 %v3768_v7, %v1778_v24 }
 0xa49   :  { %v1780_v30 = vmul.f32 0.5, %v1779_v44 }
 0xa4b   :  { %v1781_v22 = vsub.f32 1.5, %v1780_v30 }
 0xa4d   :  { %v1782_v38 = vmul.f32 %v3768_v7, %v1781_v22 }
 0xa4f   :  { %v1786_v21 = vsel %vm1785_vm9, %v3768_v7, %v1782_v38 }
 0xa50   :  { %v1790_v27 = vmul.f32 %v1786_v21, %v4808_v28  ;;  %v1994_v21 = vld [vmem:[%s5371_s5 + $0x11] ss:$0 sm:$0xff] }
 0xa52   :  { %v1795_v53 = vmul.f32 %v1791_v56, %v1790_v27 }
 0xa54   :  { %v1800_v12 = vadd.f32 %v1796_v29, %v1795_v53 }
 0xa56   :  { %v1802_v35 = vpack.c.bf16 %v1800_v12, %v1799_v61 }
 0xa58   :  { %3434 = vmatmul.msk.bf16.gmra.mxu3 %vm172_vm0, %v1802_v35 }
 0xa8d   :  { %v1882_v9 = vpop.f32.mrf.mxu0 }
 0xa8e   :  { %v4834_v17 = vadd.f32 %v1882_v9, %v1840_v47 }
 0xa90   :  { %v1960_v11 = vmul.f32 %v4834_v17, %v4834_v17 }
 0xa92   :  { %v1962_v63 = vsel %vm172_vm0, %v1960_v11, 0.0 }
 0xa93   :  { %1963 = vadd.xlane.f32.xlu1 %v1962_v63 }
 0xa95   :  { %v1884_v28 = vpop.f32.mrf.mxu0 }
 0xa96   :  { %v4839_v59 = vadd.f32 %v1884_v28, %v1840_v47 }
 0xa98   :  { %v1961_v46 = vmul.f32 %v4839_v59, %v4839_v59 }
 0xa9a   :  { %v1825_v48 = vpop.f32.mrf.mxu3  ;;  %v1965_v52 = vsel %vm172_vm0, %v1961_v46, 0.0 }
 0xa9b   :  { %v4847_v54 = vadd.f32 %v1825_v48, %v1803_v32  ;;  %1966 = vadd.xlane.f32.xlu1 %v1965_v52  ;;  %v4881_v52 = vld [vmem:[%s5371_s5 + $0x10] ss:$0 sm:$0xff] }
 0xa9d   :  { %v1887_v49 = vmul.f32 %v4847_v54, %v4847_v54 }
 0xa9f   :  { %v1891_v40 = vsel %vm172_vm0, %v1887_v49, 0.0 }
 0xaa0   :  { %1892 = vadd.xlane.f32.xlu2 %v1891_v40 }
 0xaa2   :  { %v1827_v56 = vpop.f32.mrf.mxu3 }
 0xaa3   :  { %v4852_v31 = vadd.f32 %v1827_v56, %v1803_v32 }
 0xaa5   :  { %v1888_v23 = vmul.f32 %v4852_v31, %v4852_v31 }
 0xaa7   :  { %v1894_v51 = vsel %vm172_vm0, %v1888_v23, 0.0 }
 0xaa8   :  { %1895 = vadd.xlane.f32.xlu0 %v1894_v51 }
 0xadb   :  { %v1830_v55 = vpop.f32.mrf.mxu3 }
 0xadc   :  { %v4857_v15 = vadd.f32 %v1830_v55, %v1803_v32 }
 0xade   :  { %v1889_v10 = vmul.f32 %v4857_v15, %v4857_v15 }
 0xae0   :  { %v1897_v29 = vsel %vm172_vm0, %v1889_v10, 0.0 }
 0xae1   :  { %1898 = vadd.xlane.f32.xlu2 %v1897_v29 }
 0xae3   :  { %v1832_v6 = vpop.f32.mrf.mxu3 }
 0xae4   :  { %v4862_v41 = vadd.f32 %v1832_v6, %v1803_v32 }
 0xae6   :  { %v1890_v37 = vmul.f32 %v4862_v41, %v4862_v41 }
 0xae8   :  { %v1900_v42 = vsel %vm172_vm0, %v1890_v37, 0.0 }
 0xae9   :  { %1901 = vadd.xlane.f32.xlu0 %v1900_v42 }
 0xb06   :  { %v1964_v34 = vpop.xlane.xlu1 %1963 }
 0xb07   :  { %v1968_v58 = vmul.f32 %v1964_v34, %v4113_v26 }
 0xb09   :  { %v1970_v16 = vadd.f32 1e-06, %v1968_v58 }
 0xb0b   :  { %3769 = vrsqrt.f32 %v1970_v16  ;;  %vm1978_vm13 = vweird.f32 %v1970_v16 }
 0xb0e   :  { %v1967_v25 = vpop.xlane.xlu1 %1966 }
 0xb0f   :  { %v1969_v45 = vmul.f32 %v1967_v25, %v4113_v26 }
 0xb11   :  { %v3770_v19 = vpop.eup %3769  ;;  %v1971_v8 = vadd.f32 1e-06, %v1969_v45 }
 0xb12   :  { %v1973_v20 = vmul.f32 %v3770_v19, %v1970_v16  ;;  %vm1979_vm11 = vweird.f32 %v3770_v19 }
 0xb13   :  { %3771 = vrsqrt.f32 %v1971_v8  ;;  %v1893_v39 = vpop.xlane.xlu2 %1892  ;;  %vm1980_vm14 = vmor %vm1978_vm13, %vm1979_vm11  ;;  %vm1988_vm6 = vweird.f32 %v1971_v8 }
 0xb14   :  { %v1974_v18 = vmul.f32 %v3770_v19, %v1973_v20  ;;  %v1903_v13 = vmul.f32 %v1893_v39, %v4113_v26 }
 0xb16   :  { %v1975_v7 = vmul.f32 0.5, %v1974_v18  ;;  %v1907_v62 = vadd.f32 1e-06, %v1903_v13 }
 0xb18   :  { %v1976_v24 = vsub.f32 1.5, %v1975_v7  ;;  %3773 = vrsqrt.f32 %v1907_v62  ;;  %vm1917_vm1 = vweird.f32 %v1907_v62 }
 0xb19   :  { %v3772_v44 = vpop.eup %3771 }
 0xb1a   :  { %v1977_v14 = vmul.f32 %v3770_v19, %v1976_v24  ;;  %v1983_v33 = vmul.f32 %v3772_v44, %v1971_v8  ;;  %vm1989_vm3 = vweird.f32 %v3772_v44 }
 0xb1b   :  { %v1896_v30 = vpop.xlane.xlu0 %1895  ;;  %vm1990_vm7 = vmor %vm1988_vm6, %vm1989_vm3 }
 0xb1c   :  { %v1981_v22 = vsel %vm1980_vm14, %v3770_v19, %v1977_v14  ;;  %v1904_v38 = vmul.f32 %v1896_v30, %v4113_v26  ;;  %v1984_v35 = vmul.f32 %v3772_v44, %v1983_v33 }
 0xb1d   :  { %v1992_v27 = vmul.f32 %v1981_v22, %v4834_v17 }
 0xb1e   :  { %v3774_v60 = vpop.eup %3773  ;;  %v1908_v53 = vadd.f32 1e-06, %v1904_v38  ;;  %v1985_v11 = vmul.f32 0.5, %v1984_v35 }
 0xb1f   :  { %v1912_v61 = vmul.f32 %v3774_v60, %v1907_v62  ;;  %v1995_v12 = vmul.f32 %v1994_v21, %v1992_v27  ;;  %vm1918_vm15 = vweird.f32 %v3774_v60 }
 0xb20   :  { %3775 = vrsqrt.f32 %v1908_v53  ;;  %v1986_v48 = vsub.f32 1.5, %v1985_v11  ;;  %vm1919_vm2 = vmor %vm1917_vm1, %vm1918_vm15  ;;  %vm1927_vm8 = vweird.f32 %v1908_v53 }
 0xb21   :  { %v1913_v47 = vmul.f32 %v3774_v60, %v1912_v61  ;;  %2119 = vrot.lane.b32.xlu1 %v1995_v12, %s3997_s22  ;;  %3452 = vmatpush.xpose.msk.msrb.mxu1 %vm627_vm5, %v1995_v12 }
 0xb22   :  { %2349 = vrot.lane.b32.xlu0 %v1995_v12, %s4002_s4  ;;  %v1987_v51 = vmul.f32 %v3772_v44, %v1986_v48 }
 0xb23   :  { %v1914_v9 = vmul.f32 0.5, %v1913_v47 }
 0xb24   :  { %v1991_v6 = vsel %vm1990_vm7, %v3772_v44, %v1987_v51 }
 0xb25   :  { %v1915_v63 = vsub.f32 1.5, %v1914_v9  ;;  %v1993_v42 = vmul.f32 %v1991_v6, %v4839_v59 }
 0xb26   :  { %v3776_v28 = vpop.eup %3775 }
 0xb27   :  { %v1916_v32 = vmul.f32 %v3774_v60, %v1915_v63  ;;  %v1922_v46 = vmul.f32 %v3776_v28, %v1908_v53  ;;  %vm1928_vm4 = vweird.f32 %v3776_v28  ;;  %v1996_v58 = vmul.f32 %v1994_v21, %v1993_v42 }
 0xb28   :  { %vm1929_vm9 = vmor %vm1927_vm8, %vm1928_vm4 }
 0xb29   :  { %v1920_v49 = vsel %vm1919_vm2, %v3774_v60, %v1916_v32  ;;  %v1923_v40 = vmul.f32 %v3776_v28, %v1922_v46  ;;  %2234 = vrot.lane.b32.xlu1 %v1995_v12, %s4001_s25 }
 0xb2a   :  { %v1951_v56 = vmul.f32 %v1920_v49, %v4847_v54 }
 0xb2b   :  { %v1924_v23 = vmul.f32 0.5, %v1923_v40 }
 0xb2c   :  { %v1956_v55 = vmul.f32 %v4881_v52, %v1951_v56 }
 0xb2d   :  { %v1925_v10 = vsub.f32 1.5, %v1924_v23 }
 0xb2e   :  { %3453 = vmatmul.msk.f32.vlgmr.msrb.gmra.mxu1 %vm627_vm5, %v1956_v55  ;;  %2115 = vrot.lane.b32.xlu2 %v1956_v55, %s3997_s22 }
 0xb2f   :  { %v1926_v29 = vmul.f32 %v3776_v28, %v1925_v10 }
 0xb31   :  { %v1930_v37 = vsel %vm1929_vm9, %v3776_v28, %v1926_v29  ;;  %2345 = vrot.lane.b32.xlu1 %v1956_v55, %s4002_s4 }
 0xb32   :  { %v1952_v54 = vmul.f32 %v1930_v37, %v4852_v31 }
 0xb34   :  { %v1957_v34 = vmul.f32 %v4881_v52, %v1952_v54 }
 0xb36   :  { %2230 = vrot.lane.b32.xlu2 %v1956_v55, %s4001_s25  ;;  %2117 = vrot.lane.b32.xlu0 %v1957_v34, %s3997_s22 }
 0xb37   :  { %3454 = vmatmul.msk.f32.gmra.mxu1 %vm627_vm5, %v1957_v34 }
 0xb39   :  { %2607 = vrot.lane.b32.xlu1 %v1996_v58, %s3997_s22 }
 0xb3e   :  { %2347 = vrot.lane.b32.xlu2 %v1957_v34, %s4002_s4  ;;  %2232 = vrot.lane.b32.xlu0 %v1957_v34, %s4001_s25 }
 0xb41   :  { %2722 = vrot.lane.b32.xlu1 %v1996_v58, %s4001_s25 }
 0xb46   :  { %2837 = vrot.lane.b32.xlu0 %v1996_v58, %s4002_s4 }
 0xb54   :  { %v1899_v31 = vpop.xlane.xlu2 %1898 }
 0xb55   :  { %v1905_v16 = vmul.f32 %v1899_v31, %v4113_v26 }
 0xb57   :  { %v1909_v25 = vadd.f32 1e-06, %v1905_v16 }
 0xb59   :  { %3777 = vrsqrt.f32 %v1909_v25  ;;  %vm1937_vm13 = vweird.f32 %v1909_v25 }
 0xb5c   :  { %v1902_v45 = vpop.xlane.xlu0 %1901 }
 0xb5d   :  { %v1906_v19 = vmul.f32 %v1902_v45, %v4113_v26 }
 0xb5f   :  { %v3778_v8 = vpop.eup %3777  ;;  %v1910_v20 = vadd.f32 1e-06, %v1906_v19 }
 0xb60   :  { %v1932_v39 = vmul.f32 %v3778_v8, %v1909_v25  ;;  %vm1938_vm11 = vweird.f32 %v3778_v8 }
 0xb61   :  { %3779 = vrsqrt.f32 %v1910_v20  ;;  %vm1939_vm14 = vmor %vm1937_vm13, %vm1938_vm11  ;;  %vm1947_vm1 = vweird.f32 %v1910_v20 }
 0xb62   :  { %v1933_v18 = vmul.f32 %v3778_v8, %v1932_v39 }
 0xb64   :  { %v1934_v13 = vmul.f32 0.5, %v1933_v18 }
 0xb66   :  { %v1935_v7 = vsub.f32 1.5, %v1934_v13 }
 0xb67   :  { %v3780_v62 = vpop.eup %3779 }
 0xb68   :  { %v1936_v24 = vmul.f32 %v3778_v8, %v1935_v7  ;;  %v1942_v44 = vmul.f32 %v3780_v62, %v1910_v20  ;;  %vm1948_vm15 = vweird.f32 %v3780_v62  ;;  %v3626_v20 = vpack.i.bf16 %v4839_v59, %v4834_v17 }
 0xb69   :  { %vm1949_vm2 = vmor %vm1947_vm1, %vm1948_vm15 }
 0xb6a   :  { %v1940_v14 = vsel %vm1939_vm14, %v3778_v8, %v1936_v24  ;;  %v1943_v30 = vmul.f32 %v3780_v62, %v1942_v44 }
 0xb6b   :  { %v1953_v22 = vmul.f32 %v1940_v14, %v4857_v15 }
 0xb6c   :  { %v1944_v33 = vmul.f32 0.5, %v1943_v30 }
 0xb6d   :  { %v1958_v38 = vmul.f32 %v4881_v52, %v1953_v22 }
 0xb6e   :  { %v1945_v21 = vsub.f32 1.5, %v1944_v33 }
 0xb6f   :  { %2833 = vrot.lane.b32.xlu1 %v1958_v38, %s4002_s4  ;;  %2603 = vrot.lane.b32.xlu0 %v1958_v38, %s3997_s22 }
 0xb70   :  { %v1946_v27 = vmul.f32 %v3780_v62, %v1945_v21 }
 0xb72   :  { %v1950_v60 = vsel %vm1949_vm2, %v3780_v62, %v1946_v27 }
 0xb73   :  { %v1954_v53 = vmul.f32 %v1950_v60, %v4862_v41 }
 0xb75   :  { %v1959_v61 = vmul.f32 %v4881_v52, %v1954_v53 }
 0xb77   :  { %2720 = vrot.lane.b32.xlu0 %v1959_v61, %s4001_s25  ;;  %2605 = vrot.lane.b32.xlu2 %v1959_v61, %s3997_s22  ;;  %s4006_s22 = smov 72  }
 0xb7f   :  { %2718 = vrot.lane.b32.xlu2 %v1958_v38, %s4001_s25  ;;  %s4007_s25 = smov 88  }
 0xb87   :  { %2835 = vrot.lane.b32.xlu2 %v1959_v61, %s4002_s4  ;;  %s4008_s4 = smov 80  }
 0xb88   :  { %v2116_v12 = vpop.permute.xlu2 %2115 }
 0xb90   :  { %v2231_v47 = vpop.permute.xlu2 %2230 }
 0xb93   :  { %v2120_v15 = vpop.permute.xlu1 %2119 }
 0xb94   :  { %v2350_v35 = vpop.permute.xlu0 %2349  ;;  %3457 = vmatpush.xpose.msk.msra.mxu1 %vm627_vm5, %v2120_v15 }
 0xb97   :  { %3458 = vmatmul.msk.f32.vlgmr.msra.gmra.mxu1 %vm627_vm5, %v2116_v12 }
 0xb98   :  { %3467 = vmatpush.xpose.msk.msrb.mxu1 %vm627_vm5, %v2350_v35  ;;  %v2348_v40 = vpop.permute.xlu2 %2347 }
 0xb9b   :  { %v2235_v41 = vpop.permute.xlu1 %2234 }
 0xb9c   :  { %3462 = vmatpush.xpose.msk.msrb.mxu3 %vm627_vm5, %v2235_v41 }
 0xb9f   :  { %3463 = vmatmul.msk.f32.vlgmr.msrb.gmra.mxu3 %vm627_vm5, %v2231_v47 }
 0xba0   :  { %3472 = vmatpush.xpose.msk.msra.mxu3 %vm627_vm5, %v1996_v58 }
 0xba3   :  { %v2346_v9 = vpop.permute.xlu1 %2345 }
 0xba8   :  { %v2118_v11 = vpop.permute.xlu0 %2117 }
 0xba9   :  { %3459 = vmatmul.msk.f32.gmra.mxu1 %vm627_vm5, %v2118_v11 }
 0xbab   :  { %v2028_v63 = vpop.f32.mrf.mxu1  ;;  %v2608_v28 = vpop.permute.xlu1 %2607 }
 0xbac   :  { %3477 = vmatpush.xpose.msk.msra.mxu1 %vm627_vm5, %v2608_v28  ;;  %v2034_v32 = vsel %vm627_vm5, %v2028_v63, -inf }
 0xbad   :  { %2035 = vmax.xlane.f32.xlu0 %v2034_v32 }
 0xbb0   :  { %v2233_v46 = vpop.permute.xlu0 %2232 }
 0xbb1   :  { %3464 = vmatmul.msk.f32.gmra.mxu3 %vm627_vm5, %v2233_v46  ;;  %3468 = vmatmul.msk.f32.vlgmr.msrb.gmra.mxu1 %vm627_vm5, %v2346_v9 }
 0xbb3   :  { %v2723_v48 = vpop.permute.xlu1 %2722 }
 0xbb4   :  { %v4923_v52 = vpop.f32.mrf.mxu1  ;;  %3482 = vmatpush.xpose.msk.msrb.mxu3 %vm627_vm5, %v2723_v48 }
 0xbb5   :  { %v2037_v49 = vsel %vm627_vm5, %v4923_v52, -inf }
 0xbb6   :  { %2038 = vmax.xlane.f32.xlu1 %v2037_v49 }
 0xbb8   :  { %v2838_v56 = vpop.permute.xlu0 %2837 }
 0xbb9   :  { %3469 = vmatmul.msk.f32.gmra.mxu1 %vm627_vm5, %v2348_v40  ;;  %3473 = vmatmul.msk.f32.vlgmr.msra.gmra.mxu3 %vm627_vm5, %v1958_v38 }
 0xbba   :  { %3487 = vmatpush.xpose.msk.msrb.mxu1 %vm627_vm5, %v2838_v56 }
 0xbc1   :  { %2428 = vrot.lane.b32.xlu0 %v4834_v17, %s4006_s22  ;;  %3474 = vmatmul.msk.f32.gmra.mxu3 %vm627_vm5, %v1959_v61 }
 0xbd1   :  { %v2606_v23 = vpop.permute.xlu2 %2605 }
 0xbd9   :  { %v2719_v51 = vpop.permute.xlu2 %2718 }
 0xbda   :  { %3483 = vmatmul.msk.f32.vlgmr.msrb.gmra.mxu3 %vm627_vm5, %v2719_v51 }
 0xbe1   :  { %v2604_v55 = vpop.permute.xlu0 %2603  ;;  %v2834_v29 = vpop.permute.xlu1 %2833 }
 0xbe2   :  { %3478 = vmatmul.msk.f32.vlgmr.msra.gmra.mxu1 %vm627_vm5, %v2604_v55  ;;  %v2836_v6 = vpop.permute.xlu2 %2835 }
 0xbe9   :  { %v2721_v10 = vpop.permute.xlu0 %2720 }
 0xbea   :  { %3479 = vmatmul.msk.f32.gmra.mxu1 %vm627_vm5, %v2606_v23  ;;  %3484 = vmatmul.msk.f32.gmra.mxu3 %vm627_vm5, %v2721_v10 }
 0xbf2   :  { %3488 = vmatmul.msk.f32.vlgmr.msrb.gmra.mxu1 %vm627_vm5, %v2834_v29 }
 0xbfa   :  { %3489 = vmatmul.msk.f32.gmra.mxu1 %vm627_vm5, %v2836_v6 }
 0xc14   :  { %v4940_v37 = vpop.f32.mrf.mxu1 }
 0xc15   :  { %v2150_v54 = vsel %vm627_vm5, %v4940_v37, -inf }
 0xc16   :  { %2151 = vmax.xlane.f32.xlu1 %v2150_v54 }
 0xc20   :  { %v2036_v42 = vpop.xlane.xlu0 %2035 }
 0xc21   :  { %v2040_v34 = vsub.f32 %v2028_v63, %v2036_v42 }
 0xc22   :  { %v4944_v58 = vpop.f32.mrf.mxu3 }
 0xc23   :  { %v2042_v31 = vmul.f32 1.442695, %v2040_v34  ;;  %v2265_v16 = vsel %vm627_vm5, %v4944_v58, -inf }
 0xc24   :  { %2266 = vmax.xlane.f32.xlu2 %v2265_v16 }
 0xc25   :  { %3781 = vpow2.f32 %v2042_v31 }
 0xc26   :  { %v4948_v25 = vpop.f32.mrf.mxu1 }
 0xc27   :  { %v2153_v19 = vsel %vm627_vm5, %v4948_v25, -inf }
 0xc29   :  { %v2039_v38 = vpop.xlane.xlu1 %2038 }
 0xc2a   :  { %v2041_v21 = vsub.f32 %v4923_v52, %v2039_v38 }
 0xc2b   :  { %v4950_v45 = vpop.eup %3781 }
 0xc2c   :  { %2154 = vmax.xlane.f32.xlu2 %v2153_v19  ;;  %v2046_v8 = vsel %vm627_vm5, %v4950_v45, 0.0  ;;  %v2044_v60 = vmul.f32 1.442695, %v2041_v21 }
 0xc2d   :  { %2047 = vadd.xlane.f32.xlu0 %v2046_v8 }
 0xc2e   :  { %v4962_v13 = vpop.f32.mrf.mxu1  ;;  %3783 = vpow2.f32 %v2044_v60 }
 0xc2f   :  { %3627 = vrot.lane.b32.xlu1 %v3626_v20, %s4007_s25  ;;  %v2380_v7 = vsel %vm627_vm5, %v4962_v13, -inf }
 0xc33   :  { %v2429_v56 = vpop.permute.xlu0 %2428 }
 0xc34   :  { %v4958_v39 = vpop.f32.mrf.mxu3  ;;  %v4999_v41 = vpop.eup %3783 }
 0xc35   :  { %v2268_v18 = vsel %vm627_vm5, %v4958_v39, -inf  ;;  %v2049_v47 = vsel %vm627_vm5, %v4999_v41, 0.0 }
 0xc36   :  { %2269 = vmax.xlane.f32.xlu0 %v2268_v18  ;;  %v4972_v24 = vpop.f32.mrf.mxu1 }
 0xc37   :  { %v2383_v22 = vsel %vm627_vm5, %v4972_v24, -inf }
 0xc3c   :  { %v4970_v62 = vpop.f32.mrf.mxu3 }
 0xc3d   :  { %v2522_v44 = vsel %vm627_vm5, %v4970_v62, -inf }
 0xc3e   :  { %2381 = vmax.xlane.f32.xlu0 %v2380_v7 }
 0xc44   :  { %2083 = vrot.lane.b32.xlu2 %v4834_v17, %s3996_s16  ;;  %v4976_v14 = vpop.f32.mrf.mxu3 }
 0xc45   :  { %v2525_v27 = vsel %vm627_vm5, %v4976_v14, -inf }
 0xc52   :  { %2313 = vrot.lane.b32.xlu0 %v4834_v17, %s4008_s4 }
 0xc59   :  { %2523 = vmax.xlane.f32.xlu1 %v2522_v44 }
 0xc5d   :  { %v4982_v33 = vpop.f32.mrf.mxu3 }
 0xc5e   :  { %v2753_v11 = vsel %vm627_vm5, %v4982_v33, -inf }
 0xc5f   :  { %v4978_v30 = vpop.f32.mrf.mxu1 }
 0xc60   :  { %v2638_v12 = vsel %vm627_vm5, %v4978_v30, -inf }
 0xc61   :  { %2384 = vmax.xlane.f32.xlu1 %v2383_v22 }
 0xc67   :  { %v4984_v17 = vpop.f32.mrf.mxu1 }
 0xc68   :  { %v2641_v28 = vsel %vm627_vm5, %v4984_v17, -inf }
 0xc6d   :  { %2526 = vmax.xlane.f32.xlu2 %v2525_v27  ;;  %v4989_v53 = vpop.f32.mrf.mxu3 }
 0xc6e   :  { %v2756_v61 = vsel %vm627_vm5, %v4989_v53, -inf }
 0xc6f   :  { %2757 = vmax.xlane.f32.xlu1 %v2756_v61  ;;  %v4993_v15 = vpop.f32.mrf.mxu1 }
 0xc70   :  { %v2868_v35 = vsel %vm627_vm5, %v4993_v15, -inf }
 0xc75   :  { %2639 = vmax.xlane.f32.xlu2 %v2638_v12 }
 0xc77   :  { %2869 = vmax.xlane.f32.xlu1 %v2868_v35  ;;  %v5003_v9 = vpop.f32.mrf.mxu1 }
 0xc78   :  { %v2871_v63 = vsel %vm627_vm5, %v5003_v9, -inf }
 0xc7c   :  { %2050 = vadd.xlane.f32.xlu0 %v2049_v47 }
 0xc7d   :  { %2754 = vmax.xlane.f32.xlu2 %v2753_v11 }
 0xc7f   :  { %2872 = vmax.xlane.f32.xlu1 %v2871_v63 }
 0xc84   :  { %2642 = vmax.xlane.f32.xlu0 %v2641_v28 }
 0xc89   :  { %v2152_v32 = vpop.xlane.xlu1 %2151 }
 0xc8a   :  { %v2156_v46 = vsub.f32 %v4940_v37, %v2152_v32 }
 0xc8c   :  { %v2158_v48 = vmul.f32 1.442695, %v2156_v46 }
 0xc8e   :  { %3785 = vpow2.f32 %v2158_v48 }
 0xc94   :  { %v5012_v52 = vpop.eup %3785 }
 0xc95   :  { %v2162_v49 = vsel %vm627_vm5, %v5012_v52, 0.0 }
 0xc96   :  { %2163 = vadd.xlane.f32.xlu0 %v2162_v49 }
 0xc97   :  { %v2267_v40 = vpop.xlane.xlu2 %2266 }
 0xc98   :  { %v2271_v23 = vsub.f32 %v4944_v58, %v2267_v40 }
 0xc9a   :  { %v2273_v51 = vmul.f32 1.442695, %v2271_v23 }
 0xc9c   :  { %3787 = vpow2.f32 %v2273_v51 }
 0xc9f   :  { %v2155_v55 = vpop.xlane.xlu2 %2154 }
 0xca0   :  { %v2157_v10 = vsub.f32 %v4948_v25, %v2155_v55  ;;  %v2048_v29 = vpop.xlane.xlu0 %2047 }
 0xca1   :  { %3789 = vrcp.f32 %v2048_v29  ;;  %v5018_v6 = vpop.permute.xlu1 %3627  ;;  %v2063_v18 = vand.u32 2147483648, %v2048_v29  ;;  %v2061_v22 = vand.u32 2147483647, %v2048_v29  ;;  %vm2057_vm4 = vweird.f32 %v2048_v29 }
 0xca2   :  { %v5020_v37 = vpop.eup %3787  ;;  %v2160_v54 = vmul.f32 1.442695, %v2157_v10  ;;  %v3629_v42 = vunpack.i.l.bf16 %v5018_v6 }
 0xca3   :  { %v2277_v34 = vsel %vm627_vm5, %v5020_v37, 0.0  ;;  %v2064_v27 = vor.u32 1.1754944e-38, %v2063_v18  ;;  %vm2062_vm7 = vcmp.eq.f32.partialorder %v2061_v22, 8.507059e+37 }
 0xca4   :  { %3791 = vpow2.f32 %v2160_v54  ;;  %2222 = vmatpush.msrb.mxu2 %v3629_v42  ;;  %2278 = vadd.xlane.f32.xlu0 %v2277_v34 }
 0xca6   :  { %2452 = vmatpush.msra.mxu2 %v2429_v56 }
 0xca7   :  { %v3790_v58 = vpop.eup %3789  ;;  %v2084_v31 = vpop.permute.xlu2 %2083 }
 0xca8   :  { %v2053_v16 = vmul.f32 %v3790_v58, %v2048_v29  ;;  %2107 = vmatpush.msra.mxu0 %v2084_v31  ;;  %vm2058_vm3 = vweird.f32 %v3790_v58 }
 0xca9   :  { %v2270_v25 = vpop.xlane.xlu0 %2269  ;;  %vm2059_vm6 = vmor %vm2057_vm4, %vm2058_vm3 }
 0xcaa   :  { %v5025_v19 = vpop.eup %3791  ;;  %v2054_v8 = vsub.f32 1.0, %v2053_v16  ;;  %v2272_v20 = vsub.f32 %v4958_v39, %v2270_v25 }
 0xcab   :  { %v2165_v7 = vsel %vm627_vm5, %v5025_v19, 0.0 }
 0xcac   :  { %v2055_v44 = vmul.f32 %v3790_v58, %v2054_v8  ;;  %v2275_v38 = vmul.f32 1.442695, %v2272_v20  ;;  %2166 = vadd.xlane.f32.xlu2 %v2165_v7 }
 0xcae   :  { %v2056_v21 = vadd.f32 %v3790_v58, %v2055_v44  ;;  %3793 = vpow2.f32 %v2275_v38 }
 0xcb0   :  { %v2060_v60 = vsel %vm2059_vm6, %v3790_v58, %v2056_v21 }
 0xcb1   :  { %v2065_v61 = vsel %vm2062_vm7, %v2064_v27, %v2060_v60  ;;  %v2382_v12 = vpop.xlane.xlu0 %2381 }
 0xcb2   :  { %v2386_v39 = vsub.f32 %v4962_v13, %v2382_v12  ;;  %v2066_v35 = vmul.f32 %v4950_v45, %v2065_v61 }
 0xcb4   :  { %v5032_v47 = vpop.eup %3793  ;;  %v2388_v11 = vmul.f32 1.442695, %v2386_v39  ;;  %3455 = vmatmul.msk.f32.vlgmr.msra.gmra.mxu0 %vm627_vm5, %v2066_v35 }
 0xcb5   :  { %v2280_v63 = vsel %vm627_vm5, %v5032_v47, 0.0 }
 0xcb6   :  { %3795 = vpow2.f32 %v2388_v11  ;;  %2281 = vadd.xlane.f32.xlu0 %v2280_v63 }
 0xcbc   :  { %v5037_v28 = vpop.eup %3795 }
 0xcbd   :  { %v2392_v32 = vsel %vm627_vm5, %v5037_v28, 0.0 }
 0xcbe   :  { %2393 = vadd.xlane.f32.xlu2 %v2392_v32 }
 0xcc4   :  { %v2314_v46 = vpop.permute.xlu0 %2313 }
 0xcc5   :  { %2337 = vmatpush.msrb.mxu0 %v2314_v46 }
 0xccc   :  { %v2524_v13 = vpop.xlane.xlu1 %2523 }
 0xccd   :  { %v2528_v45 = vsub.f32 %v4970_v62, %v2524_v13 }
 0xccf   :  { %v2530_v48 = vmul.f32 1.442695, %v2528_v45 }
 0xcd1   :  { %3797 = vpow2.f32 %v2530_v48 }
 0xcd4   :  { %v2385_v49 = vpop.xlane.xlu1 %2384 }
 0xcd5   :  { %v2387_v40 = vsub.f32 %v4972_v24, %v2385_v49 }
 0xcd7   :  { %v5043_v56 = vpop.eup %3797  ;;  %v2390_v23 = vmul.f32 1.442695, %v2387_v40 }
 0xcd8   :  { %v2534_v51 = vsel %vm627_vm5, %v5043_v56, 0.0 }
 0xcd9   :  { %3799 = vpow2.f32 %v2390_v23  ;;  %2535 = vadd.xlane.f32.xlu2 %v2534_v51 }
 0xcdf   :  { %v5047_v55 = vpop.eup %3799 }
 0xce0   :  { %v2527_v10 = vpop.xlane.xlu2 %2526  ;;  %v2395_v29 = vsel %vm627_vm5, %v5047_v55, 0.0 }
 0xce1   :  { %v2529_v62 = vsub.f32 %v4976_v14, %v2527_v10  ;;  %2396 = vadd.xlane.f32.xlu0 %v2395_v29 }
 0xce2   :  { %v2758_v42 = vpop.xlane.xlu1 %2757 }
 0xce3   :  { %v2532_v54 = vmul.f32 1.442695, %v2529_v62 }
 0xce5   :  { %3801 = vpow2.f32 %v2532_v54 }
 0xce8   :  { %v2640_v24 = vpop.xlane.xlu2 %2639 }
 0xce9   :  { %v2644_v34 = vsub.f32 %v4978_v30, %v2640_v24  ;;  %v2760_v30 = vsub.f32 %v4989_v53, %v2758_v42 }
 0xcea   :  { %v2870_v16 = vpop.xlane.xlu1 %2869 }
 0xceb   :  { %v5053_v58 = vpop.eup %3801  ;;  %v2646_v31 = vmul.f32 1.442695, %v2644_v34  ;;  %v2874_v25 = vsub.f32 %v4993_v15, %v2870_v16  ;;  %v2763_v27 = vmul.f32 1.442695, %v2760_v30 }
 0xcec   :  { %v2537_v8 = vsel %vm627_vm5, %v5053_v58, 0.0 }
 0xced   :  { %3803 = vpow2.f32 %v2646_v31  ;;  %2538 = vadd.xlane.f32.xlu1 %v2537_v8  ;;  %v2876_v20 = vmul.f32 1.442695, %v2874_v25 }
 0xcef   :  { %v2051_v14 = vpop.xlane.xlu0 %2050  ;;  %3805 = vpow2.f32 %v2876_v20 }
 0xcf0   :  { %v2755_v18 = vpop.xlane.xlu2 %2754  ;;  %3807 = vrcp.f32 %v2051_v14  ;;  %v2078_v63 = vand.u32 2147483648, %v2051_v14  ;;  %v2076_v46 = vand.u32 2147483647, %v2051_v14  ;;  %vm2072_vm9 = vweird.f32 %v2051_v14 }
 0xcf1   :  { %v2759_v7 = vsub.f32 %v4982_v33, %v2755_v18 }
 0xcf2   :  { %v2873_v33 = vpop.xlane.xlu1 %2872  ;;  %v2079_v49 = vor.u32 1.1754944e-38, %v2078_v63  ;;  %vm2077_vm13 = vcmp.eq.f32.partialorder %v2076_v46, 8.507059e+37 }
 0xcf3   :  { %v5059_v44 = vpop.eup %3803  ;;  %v2761_v22 = vmul.f32 1.442695, %v2759_v7  ;;  %v2875_v32 = vsub.f32 %v5003_v9, %v2873_v33 }
 0xcf4   :  { %v2650_v15 = vsel %vm627_vm5, %v5059_v44, 0.0 }
 0xcf5   :  { %3809 = vpow2.f32 %v2761_v22  ;;  %2651 = vadd.xlane.f32.xlu1 %v2650_v15  ;;  %v5064_v38 = vpop.eup %3805  ;;  %v3630_v15 = vunpack.i.h.bf16 %v5018_v6 }
 0xcf6   :  { %v3808_v21 = vpop.eup %3807  ;;  %v2880_v60 = vsel %vm627_vm5, %v5064_v38, 0.0  ;;  %3811 = vpow2.f32 %v2763_v27 }
 0xcf7   :  { %v2643_v61 = vpop.xlane.xlu0 %2642  ;;  %v2068_v12 = vmul.f32 %v3808_v21, %v2051_v14  ;;  %2881 = vadd.xlane.f32.xlu2 %v2880_v60  ;;  %vm2073_vm8 = vweird.f32 %v3808_v21 }
 0xcf8   :  { %v2645_v39 = vsub.f32 %v4984_v17, %v2643_v61  ;;  %v2878_v17 = vmul.f32 1.442695, %v2875_v32  ;;  %vm2074_vm11 = vmor %vm2072_vm9, %vm2073_vm8 }
 0xcf9   :  { %v2069_v53 = vsub.f32 1.0, %v2068_v12 }
 0xcfa   :  { %v2648_v35 = vmul.f32 1.442695, %v2645_v39 }
 0xcfb   :  { %v5069_v11 = vpop.eup %3809  ;;  %v2070_v13 = vmul.f32 %v3808_v21, %v2069_v53 }
 0xcfc   :  { %3813 = vpow2.f32 %v2648_v35  ;;  %v2765_v45 = vsel %vm627_vm5, %v5069_v11, 0.0  ;;  %v5074_v23 = vpop.eup %3811 }
 0xcfd   :  { %2766 = vadd.xlane.f32.xlu1 %v2765_v45  ;;  %v2071_v48 = vadd.f32 %v3808_v21, %v2070_v13  ;;  %3815 = vpow2.f32 %v2878_v17  ;;  %v2768_v62 = vsel %vm627_vm5, %v5074_v23, 0.0 }
 0xcff   :  { %v2075_v40 = vsel %vm2074_vm11, %v3808_v21, %v2071_v48 }
 0xd00   :  { %v2080_v51 = vsel %vm2077_vm13, %v2079_v49, %v2075_v40 }
 0xd01   :  { %v2081_v9 = vmul.f32 %v4999_v41, %v2080_v51 }
 0xd02   :  { %v5076_v10 = vpop.eup %3813 }
 0xd03   :  { %v2653_v29 = vsel %vm627_vm5, %v5076_v10, 0.0  ;;  %3456 = vmatmul.msk.f32.gmra.mxu0 %vm627_vm5, %v2081_v9  ;;  %v5084_v54 = vpop.eup %3815 }
 0xd04   :  { %2654 = vadd.xlane.f32.xlu0 %v2653_v29  ;;  %v2883_v24 = vsel %vm627_vm5, %v5084_v54, 0.0 }
 0xd05   :  { %2769 = vadd.xlane.f32.xlu1 %v2768_v62 }
 0xd09   :  { %v2164_v42 = vpop.xlane.xlu0 %2163 }
 0xd0a   :  { %3817 = vrcp.f32 %v2164_v42  ;;  %v2179_v16 = vand.u32 2147483648, %v2164_v42  ;;  %v2177_v8 = vand.u32 2147483647, %v2164_v42  ;;  %vm2173_vm15 = vweird.f32 %v2164_v42 }
 0xd0c   :  { %v2180_v18 = vor.u32 1.1754944e-38, %v2179_v16  ;;  %vm2178_vm2 = vcmp.eq.f32.partialorder %v2177_v8, 8.507059e+37 }
 0xd0d   :  { %2884 = vadd.xlane.f32.xlu1 %v2883_v24 }
 0xd0f   :  { %2571 = vrot.lane.b32.xlu2 %v4839_v59, %s3996_s16 }
 0xd10   :  { %v3818_v41 = vpop.eup %3817 }
 0xd11   :  { %v2169_v34 = vmul.f32 %v3818_v41, %v2164_v42  ;;  %vm2174_vm14 = vweird.f32 %v3818_v41 }
 0xd12   :  { %vm2175_vm1 = vmor %vm2173_vm15, %vm2174_vm14 }
 0xd13   :  { %v2170_v31 = vsub.f32 1.0, %v2169_v34 }
 0xd15   :  { %v2171_v25 = vmul.f32 %v3818_v41, %v2170_v31 }
 0xd17   :  { %v2172_v20 = vadd.f32 %v3818_v41, %v2171_v25  ;;  %v2279_v14 = vpop.xlane.xlu0 %2278 }
 0xd18   :  { %3819 = vrcp.f32 %v2279_v14  ;;  %2916 = vrot.lane.b32.xlu0 %v4839_v59, %s4006_s22  ;;  %v2294_v12 = vand.u32 2147483648, %v2279_v14  ;;  %v2292_v39 = vand.u32 2147483647, %v2279_v14  ;;  %vm2288_vm4 = vweird.f32 %v2279_v14 }
 0xd19   :  { %v2176_v7 = vsel %vm2175_vm1, %v3818_v41, %v2172_v20 }
 0xd1a   :  { %v2181_v30 = vsel %vm2178_vm2, %v2180_v18, %v2176_v7  ;;  %v2295_v63 = vor.u32 1.1754944e-38, %v2294_v12  ;;  %vm2293_vm7 = vcmp.eq.f32.partialorder %v2292_v39, 8.507059e+37 }
 0xd1b   :  { %v2182_v22 = vmul.f32 %v5012_v52, %v2181_v30 }
 0xd1d   :  { %3460 = vmatmul.msk.f32.vlgmr.msrb.gmra.mxu2 %vm627_vm5, %v2182_v22 }
 0xd1e   :  { %v3820_v21 = vpop.eup %3819  ;;  %2710 = vmatpush.msrb.mxu2 %v3630_v15 }
 0xd1f   :  { %v2284_v27 = vmul.f32 %v3820_v21, %v2279_v14  ;;  %v2167_v60 = vpop.xlane.xlu2 %2166  ;;  %vm2289_vm3 = vweird.f32 %v3820_v21 }
 0xd20   :  { %3821 = vrcp.f32 %v2167_v60  ;;  %vm2290_vm6 = vmor %vm2288_vm4, %vm2289_vm3  ;;  %v2194_v48 = vand.u32 2147483648, %v2167_v60  ;;  %v2192_v17 = vand.u32 2147483647, %v2167_v60  ;;  %vm2188_vm9 = vweird.f32 %v2167_v60 }
 0xd21   :  { %v2285_v61 = vsub.f32 1.0, %v2284_v27 }
 0xd22   :  { %v2195_v51 = vor.u32 1.1754944e-38, %v2194_v48  ;;  %vm2193_vm13 = vcmp.eq.f32.partialorder %v2192_v17, 8.507059e+37 }
 0xd23   :  { %v2286_v33 = vmul.f32 %v3820_v21, %v2285_v61 }
 0xd25   :  { %v2287_v53 = vadd.f32 %v3820_v21, %v2286_v33 }
 0xd26   :  { %v3822_v35 = vpop.eup %3821  ;;  %2801 = vrot.lane.b32.xlu1 %v4839_v59, %s4008_s4 }
 0xd27   :  { %v2291_v52 = vsel %vm2290_vm6, %v3820_v21, %v2287_v53  ;;  %v2184_v6 = vmul.f32 %v3822_v35, %v2167_v60  ;;  %vm2189_vm8 = vweird.f32 %v3822_v35 }
 0xd28   :  { %v2296_v32 = vsel %vm2293_vm7, %v2295_v63, %v2291_v52  ;;  %vm2190_vm11 = vmor %vm2188_vm9, %vm2189_vm8 }
 0xd29   :  { %v2185_v46 = vsub.f32 1.0, %v2184_v6  ;;  %v2282_v13 = vpop.xlane.xlu0 %2281  ;;  %v2297_v45 = vmul.f32 %v5020_v37, %v2296_v32 }
 0xd2a   :  { %3823 = vrcp.f32 %v2282_v13  ;;  %v2309_v41 = vand.u32 2147483648, %v2282_v13  ;;  %v2307_v31 = vand.u32 2147483647, %v2282_v13  ;;  %vm2303_vm15 = vweird.f32 %v2282_v13 }
 0xd2b   :  { %v2186_v49 = vmul.f32 %v3822_v35, %v2185_v46  ;;  %3465 = vmatmul.msk.f32.vlgmr.msrb.gmra.mxu0 %vm627_vm5, %v2297_v45 }
 0xd2c   :  { %v2310_v8 = vor.u32 1.1754944e-38, %v2309_v41  ;;  %vm2308_vm2 = vcmp.eq.f32.partialorder %v2307_v31, 8.507059e+37 }
 0xd2d   :  { %v2187_v40 = vadd.f32 %v3822_v35, %v2186_v49 }
 0xd2f   :  { %v2191_v59 = vsel %vm2190_vm11, %v3822_v35, %v2187_v40 }
 0xd30   :  { %v3824_v9 = vpop.eup %3823  ;;  %v2196_v29 = vsel %vm2193_vm13, %v2195_v51, %v2191_v59 }
 0xd31   :  { %v2299_v62 = vmul.f32 %v3824_v9, %v2282_v13  ;;  %v2394_v42 = vpop.xlane.xlu2 %2393  ;;  %v2197_v24 = vmul.f32 %v5025_v19, %v2196_v29  ;;  %vm2304_vm14 = vweird.f32 %v3824_v9 }
 0xd32   :  { %3825 = vrcp.f32 %v2394_v42  ;;  %vm2305_vm1 = vmor %vm2303_vm15, %vm2304_vm14  ;;  %v2409_v30 = vand.u32 2147483648, %v2394_v42  ;;  %v2407_v15 = vand.u32 2147483647, %v2394_v42  ;;  %vm2403_vm4 = vweird.f32 %v2394_v42 }
 0xd33   :  { %v2300_v37 = vsub.f32 1.0, %v2299_v62  ;;  %3461 = vmatmul.msk.f32.gmra.mxu2 %vm627_vm5, %v2197_v24 }
 0xd34   :  { %v2410_v27 = vor.u32 1.1754944e-38, %v2409_v30  ;;  %vm2408_vm7 = vcmp.eq.f32.partialorder %v2407_v15, 8.507059e+37 }
 0xd35   :  { %v2301_v34 = vmul.f32 %v3824_v9, %v2300_v37 }
 0xd37   :  { %v2302_v16 = vadd.f32 %v3824_v9, %v2301_v34 }
 0xd38   :  { %v3826_v25 = vpop.eup %3825 }
 0xd39   :  { %v2399_v20 = vmul.f32 %v3826_v25, %v2394_v42  ;;  %v2306_v14 = vsel %vm2305_vm1, %v3824_v9, %v2302_v16  ;;  %vm2404_vm3 = vweird.f32 %v3826_v25 }
 0xd3a   :  { %v2311_v18 = vsel %vm2308_vm2, %v2310_v8, %v2306_v14  ;;  %vm2405_vm6 = vmor %vm2403_vm4, %vm2404_vm3 }
 0xd3b   :  { %v2400_v7 = vsub.f32 1.0, %v2399_v20  ;;  %v2312_v19 = vmul.f32 %v5032_v47, %v2311_v18 }
 0xd3d   :  { %v2401_v22 = vmul.f32 %v3826_v25, %v2400_v7  ;;  %3466 = vmatmul.msk.f32.gmra.mxu0 %vm627_vm5, %v2312_v19 }
 0xd3f   :  { %v2402_v21 = vadd.f32 %v3826_v25, %v2401_v22 }
 0xd41   :  { %v2406_v60 = vsel %vm2405_vm6, %v3826_v25, %v2402_v21 }
 0xd42   :  { %v2411_v61 = vsel %vm2408_vm7, %v2410_v27, %v2406_v60 }
 0xd43   :  { %v2412_v12 = vmul.f32 %v5037_v28, %v2411_v61 }
 0xd45   :  { %3470 = vmatmul.msk.f32.vlgmr.msra.gmra.mxu2 %vm627_vm5, %v2412_v12 }
 0xd4c   :  { %v2536_v33 = vpop.xlane.xlu2 %2535 }
 0xd4d   :  { %3827 = vrcp.f32 %v2536_v33  ;;  %v2551_v42 = vand.u32 2147483648, %v2536_v33  ;;  %vm2545_vm15 = vweird.f32 %v2536_v33  ;;  %v2549_v37 = vand.u32 2147483647, %v2536_v33 }
 0xd4f   :  { %v2552_v16 = vor.u32 1.1754944e-38, %v2551_v42  ;;  %vm2550_vm2 = vcmp.eq.f32.partialorder %v2549_v37, 8.507059e+37 }
 0xd53   :  { %v3828_v39 = vpop.eup %3827 }
 0xd54   :  { %v2397_v47 = vpop.xlane.xlu0 %2396  ;;  %v2541_v63 = vmul.f32 %v3828_v39, %v2536_v33  ;;  %vm2546_vm14 = vweird.f32 %v3828_v39 }
 0xd55   :  { %3829 = vrcp.f32 %v2397_v47  ;;  %v2424_v6 = vand.u32 2147483648, %v2397_v47  ;;  %v2422_v13 = vand.u32 2147483647, %v2397_v47  ;;  %vm2418_vm9 = vweird.f32 %v2397_v47  ;;  %vm2547_vm1 = vmor %vm2545_vm15, %vm2546_vm14 }
 0xd56   :  { %v2542_v45 = vsub.f32 1.0, %v2541_v63 }
 0xd57   :  { %v2425_v48 = vor.u32 1.1754944e-38, %v2424_v6  ;;  %vm2423_vm13 = vcmp.eq.f32.partialorder %v2422_v13, 8.507059e+37 }
 0xd58   :  { %v2543_v17 = vmul.f32 %v3828_v39, %v2542_v45 }
 0xd5a   :  { %v2544_v62 = vadd.f32 %v3828_v39, %v2543_v17 }
 0xd5b   :  { %v3830_v53 = vpop.eup %3829 }
 0xd5c   :  { %v2414_v35 = vmul.f32 %v3830_v53, %v2397_v47  ;;  %vm2419_vm8 = vweird.f32 %v3830_v53  ;;  %v2548_v34 = vsel %vm2547_vm1, %v3828_v39, %v2544_v62 }
 0xd5d   :  { %vm2420_vm11 = vmor %vm2418_vm9, %vm2419_vm8 }
 0xd5e   :  { %v2415_v52 = vsub.f32 1.0, %v2414_v35 }
 0xd60   :  { %v2416_v32 = vmul.f32 %v3830_v53, %v2415_v52  ;;  %v2539_v46 = vpop.xlane.xlu1 %2538 }
 0xd61   :  { %3831 = vrcp.f32 %v2539_v46  ;;  %v2566_v18 = vand.u32 2147483648, %v2539_v46  ;;  %vm2560_vm4 = vweird.f32 %v2539_v46  ;;  %v2564_v15 = vand.u32 2147483647, %v2539_v46 }
 0xd62   :  { %v2417_v28 = vadd.f32 %v3830_v53, %v2416_v32 }
 0xd63   :  { %v2567_v12 = vor.u32 1.1754944e-38, %v2566_v18 }
 0xd64   :  { %v2421_v49 = vsel %vm2420_vm11, %v3830_v53, %v2417_v28  ;;  %vm2565_vm11 = vcmp.eq.f32.partialorder %v2564_v15, 8.507059e+37 }
 0xd65   :  { %v2426_v40 = vsel %vm2423_vm13, %v2425_v48, %v2421_v49 }
 0xd66   :  { %v2427_v51 = vmul.f32 %v5047_v55, %v2426_v40  ;;  %v2553_v55 = vsel %vm2550_vm2, %v2552_v16, %v2548_v34 }
 0xd67   :  { %v3832_v59 = vpop.eup %3831  ;;  %v2554_v22 = vmul.f32 %v5043_v56, %v2553_v55  ;;  %v3498_v55 = vld [vmem:[%s5372_s6 + $0x20] sm:$0xf] }
 0xd68   :  { %v2556_v9 = vmul.f32 %v3832_v59, %v2539_v46  ;;  %v2652_v29 = vpop.xlane.xlu1 %2651  ;;  %3471 = vmatmul.msk.f32.gmra.mxu2 %vm627_vm5, %v2427_v51  ;;  %vm2561_vm3 = vweird.f32 %v3832_v59 }
 0xd69   :  { %3833 = vrcp.f32 %v2652_v29  ;;  %v2667_v19 = vand.u32 2147483648, %v2652_v29  ;;  %v2665_v27 = vand.u32 2147483647, %v2652_v29  ;;  %vm5113_vm7 = vmor %vm2560_vm4, %vm2561_vm3  ;;  %vm2661_vm8 = vweird.f32 %v2652_v29 }
 0xd6a   :  { %v2557_v24 = vsub.f32 1.0, %v2556_v9  ;;  %v5107_v41 = vpop.xlane.xlu2 %2881 }
 0xd6b   :  { %3835 = vrcp.f32 %v5107_v41  ;;  %v2668_v47 = vor.u32 1.1754944e-38, %v2667_v19  ;;  %vm2666_vm13 = vcmp.eq.f32.partialorder %v2665_v27, 8.507059e+37  ;;  %vm2891_vm4 = vweird.f32 %v5107_v41 }
 0xd6c   :  { %v2558_v31 = vmul.f32 %v3832_v59, %v2557_v24 }
 0xd6e   :  { %v2559_v14 = vadd.f32 %v3832_v59, %v2558_v31  ;;  %v2897_v31 = vand.u32 2147483648, %v5107_v41 }
 0xd6f   :  { %v3834_v25 = vpop.eup %3833 }
 0xd70   :  { %v2657_v8 = vmul.f32 %v3834_v25, %v2652_v29  ;;  %v5109_v20 = vpop.xlane.xlu1 %2766  ;;  %vm2662_vm6 = vweird.f32 %v3834_v25  ;;  %v2563_v61 = vsel %vm5113_vm7, %v3832_v59, %v2559_v14  ;;  %v2895_v14 = vand.u32 2147483647, %v5107_v41 }
 0xd71   :  { %vm2663_vm9 = vmor %vm2661_vm8, %vm2662_vm6  ;;  %v3836_v39 = vpop.eup %3835  ;;  %v2568_v63 = vsel %vm2565_vm11, %v2567_v12, %v2563_v61  ;;  %v2898_v27 = vor.u32 1.1754944e-38, %v2897_v31  ;;  %v2782_v12 = vand.u32 2147483648, %v5109_v20  ;;  %vm2776_vm11 = vweird.f32 %v5109_v20 }
 0xd72   :  { %v2658_v7 = vsub.f32 1.0, %v2657_v8  ;;  %v2572_v30 = vpop.permute.xlu2 %2571  ;;  %v2887_v6 = vmul.f32 %v3836_v39, %v5107_v41  ;;  %v2569_v32 = vmul.f32 %v5053_v58, %v2568_v63  ;;  %vm2892_vm2 = vweird.f32 %v3836_v39  ;;  %v3537_v8 = vld [vmem:[%s5372_s6 + $0x28] sm:$0xf0] }
 0xd73   :  { %2595 = vmatpush.msra.mxu0 %v2572_v30  ;;  %vm2893_vm6 = vmor %vm2891_vm4, %vm2892_vm2  ;;  %vm2896_vm7 = vcmp.eq.f32.partialorder %v2895_v14, 8.507059e+37 }
 0xd74   :  { %v2659_v21 = vmul.f32 %v3834_v25, %v2658_v7  ;;  %3475 = vmatmul.msk.f32.vlgmr.msra.gmra.mxu0 %vm627_vm5, %v2554_v22  ;;  %v2888_v28 = vsub.f32 1.0, %v2887_v6  ;;  %v5149_v7 = vor.u32 %v3537_v8, %v3498_v55  ;;  %v2783_v6 = vor.u32 1.1754944e-38, %v2782_v12 }
 0xd76   :  { %v2660_v33 = vadd.f32 %v3834_v25, %v2659_v21  ;;  %v2889_v40 = vmul.f32 %v3836_v39, %v2888_v28  ;;  %2992 = vrot.lane.b32.xlu2 %v5149_v7, %s3996_s16 }
 0xd77   :  { %v2655_v56 = vpop.xlane.xlu0 %2654 }
 0xd78   :  { %v2664_v53 = vsel %vm2663_vm9, %v3834_v25, %v2660_v33  ;;  %3837 = vrcp.f32 %v2655_v56  ;;  %v5120_v35 = vpop.xlane.xlu1 %2769  ;;  %v2680_v59 = vand.u32 2147483647, %v2655_v56  ;;  %vm2676_vm15 = vweird.f32 %v2655_v56 }
 0xd79   :  { %v2669_v52 = vsel %vm2666_vm13, %v2668_v47, %v2664_v53  ;;  %3839 = vrcp.f32 %v5109_v20  ;;  %v2890_v37 = vadd.f32 %v3836_v39, %v2889_v40  ;;  %v2780_v47 = vand.u32 2147483647, %v5109_v20 }
 0xd7a   :  { %v2670_v46 = vmul.f32 %v5059_v44, %v2669_v52  ;;  %3841 = vrcp.f32 %v5120_v35  ;;  %v2682_v44 = vand.u32 2147483648, %v2655_v56  ;;  %vm2681_vm3 = vcmp.eq.f32.partialorder %v2680_v59, 8.507059e+37 }
 0xd7b   :  { %v2894_v21 = vsel %vm2893_vm6, %v3836_v39, %v2890_v37  ;;  %vm2791_vm4 = vweird.f32 %v5120_v35 }
 0xd7c   :  { %3476 = vmatmul.msk.f32.gmra.mxu0 %vm627_vm5, %v2569_v32  ;;  %3480 = vmatmul.msk.f32.vlgmr.msrb.gmra.mxu2 %vm627_vm5, %v2670_v46  ;;  %v2683_v42 = vor.u32 1.1754944e-38, %v2682_v44 }
 0xd7e   :  { %v3838_v13 = vpop.eup %3837 }
 0xd7f   :  { %v5128_v45 = vpop.eup %3839  ;;  %v2672_v48 = vmul.f32 %v3838_v13, %v2655_v56  ;;  %vm2677_vm14 = vweird.f32 %v3838_v13 }
 0xd80   :  { %v5131_v49 = vpop.xlane.xlu1 %2884  ;;  %v2772_v58 = vmul.f32 %v5128_v45, %v5109_v20  ;;  %v5136_v29 = vpop.eup %3841  ;;  %vm2678_vm1 = vmor %vm2676_vm15, %vm2677_vm14  ;;  %vm2777_vm8 = vweird.f32 %v5128_v45 }
 0xd81   :  { %v2673_v17 = vsub.f32 1.0, %v2672_v48  ;;  %3843 = vrcp.f32 %v5131_v49  ;;  %v2787_v30 = vmul.f32 %v5136_v29, %v5120_v35  ;;  %v2912_v56 = vand.u32 2147483648, %v5131_v49  ;;  %vm2778_vm13 = vmor %vm2776_vm11, %vm2777_vm8 }
 0xd82   :  { %v2773_v62 = vsub.f32 1.0, %v2772_v58  ;;  %vm2906_vm14 = vweird.f32 %v5131_v49  ;;  %v2910_v53 = vand.u32 2147483647, %v5131_v49 }
 0xd83   :  { %v2674_v51 = vmul.f32 %v3838_v13, %v2673_v17  ;;  %v2788_v61 = vsub.f32 1.0, %v2787_v30  ;;  %v2913_v20 = vor.u32 1.1754944e-38, %v2912_v56 }
 0xd84   :  { %v2774_v19 = vmul.f32 %v5128_v45, %v2773_v62  ;;  %vm2911_vm2 = vcmp.eq.f32.partialorder %v2910_v53, 8.507059e+37 }
 0xd85   :  { %v2675_v9 = vadd.f32 %v3838_v13, %v2674_v51  ;;  %v2789_v52 = vmul.f32 %v5136_v29, %v2788_v61 }
 0xd86   :  { %v2775_v60 = vadd.f32 %v5128_v45, %v2774_v19 }
 0xd87   :  { %v3844_v24 = vpop.eup %3843  ;;  %v2679_v34 = vsel %vm2678_vm1, %v3838_v13, %v2675_v9  ;;  %vm2781_vm1 = vcmp.eq.f32.partialorder %v2780_v47, 8.507059e+37  ;;  %v2790_v28 = vadd.f32 %v5136_v29, %v2789_v52 }
 0xd88   :  { %v2902_v16 = vmul.f32 %v3844_v24, %v5131_v49  ;;  %v2684_v25 = vsel %vm2681_vm3, %v2683_v42, %v2679_v34  ;;  %vm2907_vm9 = vweird.f32 %v3844_v24  ;;  %v2779_v63 = vsel %vm2778_vm13, %v5128_v45, %v2775_v60 }
 0xd89   :  { %v2685_v18 = vmul.f32 %v5076_v10, %v2684_v25  ;;  %v2899_v10 = vsel %vm2896_vm7, %v2898_v27, %v2894_v21  ;;  %vm2908_vm15 = vmor %vm2906_vm14, %vm2907_vm9  ;;  %v2784_v46 = vsel %vm2781_vm1, %v2783_v6, %v2779_v63  ;;  %vm2792_vm3 = vweird.f32 %v5136_v29 }
 0xd8a   :  { %v2903_v22 = vsub.f32 1.0, %v2902_v16  ;;  %v2917_v15 = vpop.permute.xlu0 %2916  ;;  %v2900_v39 = vmul.f32 %v5064_v38, %v2899_v10  ;;  %v2797_v38 = vand.u32 2147483648, %v5120_v35  ;;  %v2785_v48 = vmul.f32 %v5069_v11, %v2784_v46  ;;  %vm2793_vm6 = vmor %vm2791_vm4, %vm2792_vm3  ;;  %v2109_v11 = vpop.f32.mrf.mxu0 }
 0xd8b   :  { %3481 = vmatmul.msk.f32.gmra.mxu2 %vm627_vm5, %v2685_v18  ;;  %v2795_v49 = vand.u32 2147483647, %v5120_v35  ;;  %v2794_v58 = vsel %vm2793_vm6, %v5136_v29, %v2790_v28  ;;  %v3494_v29 = vld [vmem:[%s5372_s6 + $0x8] sm:$0xf]  ;;  %vm3228_vm4 = vcmask 523264  }
 0xd8c   :  { %v2904_v41 = vmul.f32 %v3844_v24, %v2903_v22  ;;  %2940 = vmatpush.msra.mxu2 %v2917_v15  ;;  %v2798_v44 = vor.u32 1.1754944e-38, %v2797_v38 }
 0xd8d   :  { %vm2796_vm7 = vcmp.eq.f32.partialorder %v2795_v49, 8.507059e+37 }
 0xd8e   :  { %v2905_v33 = vadd.f32 %v3844_v24, %v2904_v41  ;;  %v2799_v40 = vsel %vm2796_vm7, %v2798_v44, %v2794_v58 }
 0xd8f   :  { %v2800_v51 = vmul.f32 %v5074_v23, %v2799_v40  ;;  %v3536_v23 = vld [vmem:[%s5372_s6 + $0x10] sm:$0xf0] }
 0xd90   :  { %v2909_v32 = vsel %vm2908_vm15, %v3844_v24, %v2905_v33  ;;  %v5189_v37 = vor.u32 %v3536_v23, %v3494_v29 }
 0xd91   :  { %v2914_v13 = vsel %vm2911_vm2, %v2913_v20, %v2909_v32 }
 0xd92   :  { %v2915_v17 = vmul.f32 %v5084_v54, %v2914_v13  ;;  %v2112_v59 = vpop.f32.mrf.mxu0  ;;  %2990 = vrot.lane.b32.xlu1 %v5189_v37, %s3996_s16 }
 0xd93   :  { %3490 = vmatmul.msk.f32.vlgmr.msra.gmra.mxu2 %vm627_vm5, %v2900_v39 }
 0xd98   :  { %v2802_v45 = vpop.permute.xlu1 %2801 }
 0xd99   :  { %2825 = vmatpush.msrb.mxu0 %v2802_v45 }
 0xd9a   :  { %3485 = vmatmul.msk.f32.vlgmr.msrb.gmra.mxu0 %vm627_vm5, %v2785_v48 }
 0xd9b   :  { %3491 = vmatmul.msk.f32.gmra.mxu2 %vm627_vm5, %v2915_v17 }
 0xda0   :  { %v2224_v35 = vpop.f32.mrf.mxu2 }
 0xda2   :  { %3486 = vmatmul.msk.f32.gmra.mxu0 %vm627_vm5, %v2800_v51 }
 0xda8   :  { %v2339_v9 = vpop.f32.mrf.mxu0 }
 0xdb6   :  { %v2227_v62 = vpop.f32.mrf.mxu2 }
 0xdb7   :  { %v3631_v54 = vpack.i.bf16 %v2227_v62, %v2224_v35 }
 0xdb9   :  { %3632 = vrot.lane.b32.xlu2 %v3631_v54, %s3989_s18 }
 0xdba   :  { %v2342_v42 = vpop.f32.mrf.mxu0 }
 0xdbb   :  { %v3636_v24 = vpack.i.bf16 %v2342_v42, %v2339_v9 }
 0xdc1   :  { %3637 = vrot.lane.b32.xlu2 %v3636_v24, %s4003_s26  ;;  %v2001_v24 = vld [vmem:[%s5371_s5 + $0x12] ss:$0 sm:$0xff] }
 0xdc8   :  { %v2454_v34 = vpop.f32.mrf.mxu2 }
 0xdd0   :  { %v2993_v31 = vpop.permute.xlu2 %2992 }
 0xdd1   :  { %3008 = vmatpush.bf16.msra.mxu3 %v2993_v31 }
 0xdeb   :  { %v2457_v16 = vpop.f32.mrf.mxu2 }
 0xdec   :  { %v3641_v25 = vpack.i.bf16 %v2457_v16, %v2454_v34 }
 0xdee   :  { %3642 = vrot.lane.b32.xlu0 %v3641_v25, %s4004_s12 }
 0xdf1   :  { %v2597_v55 = vpop.f32.mrf.mxu0 }
 0xdf9   :  { %v2600_v18 = vpop.f32.mrf.mxu0 }
 0xdff   :  { %v2712_v8 = vpop.f32.mrf.mxu2 }
 0xe04   :  { %v2991_v10 = vpop.permute.xlu1 %2990 }
 0xe05   :  { %3009 = vmatpush.bf16.msra.mxu3 %v2991_v10 }
 0xe0e   :  { %v2715_v14 = vpop.f32.mrf.mxu2 }
 0xe0f   :  { %v3646_v19 = vpack.i.bf16 %v2715_v14, %v2712_v8 }
 0xe11   :  { %3647 = vrot.lane.b32.xlu2 %v3646_v19, %s3989_s18 }
 0xe13   :  { %v3633_v60 = vpop.permute.xlu2 %3632 }
 0xe14   :  { %v3635_v12 = vunpack.i.h.bf16 %v3633_v60  ;;  %v3634_v33 = vunpack.i.l.bf16 %v3633_v60 }
 0xe16   :  { %v2942_v30 = vpop.f32.mrf.mxu2  ;;  %v2485_v53 = vsel %vm627_vm5, %v2112_v59, %v3635_v12  ;;  %v2484_v63 = vsel %vm627_vm5, %v2109_v11, %v3634_v33 }
 0xe17   :  { %v2827_v22 = vpop.f32.mrf.mxu0 }
 0xe1b   :  { %v3638_v61 = vpop.permute.xlu2 %3637 }
 0xe1c   :  { %v3640_v47 = vunpack.i.h.bf16 %v3638_v61  ;;  %v3639_v56 = vunpack.i.l.bf16 %v3638_v61 }
 0xe1e   :  { %v2945_v15 = vpop.f32.mrf.mxu2  ;;  %v2487_v32 = vsel %vm661_vm12, %v2485_v53, %v3640_v47  ;;  %v2486_v20 = vsel %vm661_vm12, %v2484_v63, %v3639_v56 }
 0xe1f   :  { %v3656_v21 = vpack.i.bf16 %v2945_v15, %v2942_v30  ;;  %v2830_v27 = vpop.f32.mrf.mxu0 }
 0xe20   :  { %v3651_v41 = vpack.i.bf16 %v2830_v27, %v2827_v22 }
 0xe21   :  { %3657 = vrot.lane.b32.xlu1 %v3656_v21, %s4004_s12 }
 0xe22   :  { %3652 = vrot.lane.b32.xlu0 %v3651_v41, %s4003_s26 }
 0xe60   :  { %v3643_v39 = vpop.permute.xlu0 %3642 }
 0xe61   :  { %v3645_v52 = vunpack.i.h.bf16 %v3643_v39  ;;  %v3644_v6 = vunpack.i.l.bf16 %v3643_v39 }
 0xe63   :  { %v2489_v46 = vsel %vm1135_vm10, %v2487_v32, %v3645_v52  ;;  %v2488_v13 = vsel %vm1135_vm10, %v2486_v20, %v3644_v6 }
 0xe64   :  { %v2978_v28 = vpack.c.bf16 %v2489_v46, %v2488_v13 }
 0xe66   :  { %3500 = vmatmul.msk.bf16.vlgmr.msra.gmra.mxu3 %vm172_vm0, %v2978_v28 }
 0xe6b   :  { %v3648_v38 = vpop.permute.xlu2 %3647 }
 0xe6c   :  { %v3650_v45 = vunpack.i.h.bf16 %v3648_v38  ;;  %v3649_v48 = vunpack.i.l.bf16 %v3648_v38 }
 0xe6e   :  { %v2973_v40 = vsel %vm627_vm5, %v2600_v18, %v3650_v45  ;;  %v2972_v51 = vsel %vm627_vm5, %v2597_v55, %v3649_v48 }
 0xe93   :  { %v3658_v49 = vpop.permute.xlu1 %3657 }
 0xe94   :  { %v3653_v17 = vpop.permute.xlu0 %3652  ;;  %v3660_v11 = vunpack.i.h.bf16 %v3658_v49  ;;  %v3659_v59 = vunpack.i.l.bf16 %v3658_v49 }
 0xe95   :  { %v3655_v58 = vunpack.i.h.bf16 %v3653_v17  ;;  %v3654_v44 = vunpack.i.l.bf16 %v3653_v17 }
 0xe97   :  { %v2975_v35 = vsel %vm661_vm12, %v2973_v40, %v3655_v58  ;;  %v2974_v9 = vsel %vm661_vm12, %v2972_v51, %v3654_v44 }
 0xe98   :  { %v2976_v62 = vsel %vm1135_vm10, %v2974_v9, %v3659_v59  ;;  %v2977_v54 = vsel %vm1135_vm10, %v2975_v35, %v3660_v11  ;;  %v153_v11 = vld [vmem:[%s5369_s3 + $0x4] sm:$0x1]  ;;  %v154_v59 = vld [vmem:[%s5371_s5 + $0x22] ss:$0 sm:$0xff] }
 0xe99   :  { %v2979_v42 = vpack.c.bf16 %v2977_v54, %v2976_v62  ;;  %v155_v62 = vadd.f32 %v154_v59, %v153_v11 }
 0xe9b   :  { %3501 = vmatmul.msk.bf16.gmra.mxu3 %vm172_vm0, %v2979_v42 }
 0xee9   :  { %v3011_v29 = vpop.f32.mrf.mxu3 }
 0xeea   :  { %v3012_v23 = vadd.f32 %v3011_v29, %v2001_v24 }
 0xeec   :  { %v5215_v34 = vadd.f32 %v3012_v23, %v4737_v36 }
 0xeee   :  { %v3025_v31 = vsel %vm172_vm0, %v5215_v34, 0.0 }
 0xeef   :  { %3026 = vadd.xlane.f32.xlu2 %v3025_v31 }
 0xef1   :  { %v3013_v16 = vpop.f32.mrf.mxu3 }
 0xef2   :  { %v3014_v25 = vadd.f32 %v3013_v16, %v2001_v24  ;;  %v156_v16 = vperm.slane %v155_v62, 0 }
 0xef4   :  { %v5220_v55 = vadd.f32 %v3014_v25, %v4742_v43 }
 0xef6   :  { %v3028_v8 = vsel %vm172_vm0, %v5220_v55, 0.0 }
 0xef7   :  { %3029 = vadd.xlane.f32.xlu0 %v3028_v8  ;;  %v146_v8 = vld [vmem:[%s5369_s3 + $0x3] sm:$0x1] }
 0xf1e   :  { %v3016_v14 = vpop.f32.mrf.mxu3 }
 0xf1f   :  { %v3017_v18 = vadd.f32 %v3016_v14, %v2001_v24  ;;  %v147_v14 = vld [vmem:[%s5371_s5 + $0x21] ss:$0 sm:$0xff] }
 0xf21   :  { %v5225_v19 = vadd.f32 %v3017_v18, %v4757_v50 }
 0xf23   :  { %v3031_v36 = vsel %vm172_vm0, %v5225_v19, 0.0 }
 0xf24   :  { %3032 = vadd.xlane.f32.xlu1 %v3031_v36 }
 0xf26   :  { %v3018_v30 = vpop.f32.mrf.mxu3 }
 0xf27   :  { %v3019_v22 = vadd.f32 %v3018_v30, %v2001_v24  ;;  %v148_v30 = vadd.f32 %v147_v14, %v146_v8 }
 0xf29   :  { %v5230_v15 = vadd.f32 %v3019_v22, %v4764_v57  ;;  %v3113_v22 = vadd.f32 1.0, %v156_v16 }
 0xf2b   :  { %v3034_v43 = vsel %vm172_vm0, %v5230_v15, 0.0 }
 0xf2c   :  { %3035 = vadd.xlane.f32.xlu2 %v3034_v43 }
 0xf62   :  { %v3027_v21 = vpop.xlane.xlu2 %3026 }
 0xf63   :  { %v3037_v27 = vmul.f32 %v3027_v21, %v4113_v26 }
 0xf65   :  { %v5236_v41 = vsub.f32 %v5215_v34, %v3037_v27 }
 0xf67   :  { %v3045_v50 = vmul.f32 %v5236_v41, %v5236_v41 }
 0xf69   :  { %v3049_v10 = vsel %vm172_vm0, %v3045_v50, 0.0 }
 0xf6a   :  { %v3030_v60 = vpop.xlane.xlu0 %3029  ;;  %3050 = vadd.xlane.f32.xlu0 %v3049_v10  ;;  %v149_v10 = vperm.slane %v148_v30, 0 }
 0xf6b   :  { %v3038_v57 = vmul.f32 %v3030_v60, %v4113_v26 }
 0xf6d   :  { %v5243_v61 = vsub.f32 %v5220_v55, %v3038_v57 }
 0xf6f   :  { %v3046_v12 = vmul.f32 %v5243_v61, %v5243_v61 }
 0xf71   :  { %v3052_v33 = vsel %vm172_vm0, %v3046_v12, 0.0 }
 0xf72   :  { %3053 = vadd.xlane.f32.xlu2 %v3052_v33  ;;  %v157_v33 = vld [vmem:[%s5369_s3 + $0xa] sm:$0x1] }
 0xf8a   :  { %3128 = vrot.lane.b32.xlu2 %v5149_v7, %s3995_s27 }
 0xf97   :  { %v3033_v47 = vpop.xlane.xlu1 %3032 }
 0xf98   :  { %v3039_v56 = vmul.f32 %v3033_v47, %v4113_v26 }
 0xf9a   :  { %v5252_v39 = vsub.f32 %v5225_v19, %v3039_v56 }
 0xf9c   :  { %v3047_v53 = vmul.f32 %v5252_v39, %v5252_v39 }
 0xf9e   :  { %v3055_v63 = vsel %vm172_vm0, %v3047_v53, 0.0 }
 0xf9f   :  { %3056 = vadd.xlane.f32.xlu1 %v3055_v63  ;;  %v3036_v52 = vpop.xlane.xlu2 %3035 }
 0xfa0   :  { %v3040_v6 = vmul.f32 %v3036_v52, %v4113_v26  ;;  %v158_v52 = vadd.f32 %v157_v33, %v154_v59 }
 0xfa2   :  { %v5259_v32 = vsub.f32 %v5230_v15, %v3040_v6 }
 0xfa4   :  { %v3048_v7 = vmul.f32 %v5259_v32, %v5259_v32 }
 0xfa6   :  { %v3058_v20 = vsel %vm172_vm0, %v3048_v7, 0.0 }
 0xfa7   :  { %3059 = vadd.xlane.f32.xlu0 %v3058_v20 }
 0xfb8   :  { %3126 = vrot.lane.b32.xlu1 %v5189_v37, %s3995_s27 }
 0xfbb   :  { %3662 = vrot.lane.b32.xlu0 %v3661_v2, %s3996_s16 }
 0xfc3   :  { %3667 = vrot.lane.b32.xlu0 %v3666_v5, %s3996_s16 }
 0xfdd   :  { %v3051_v13 = vpop.xlane.xlu0 %3050 }
 0xfde   :  { %v3061_v38 = vmul.f32 %v3051_v13, %v4113_v26 }
 0xfe0   :  { %v3065_v48 = vadd.f32 1e-06, %v3061_v38 }
 0xfe2   :  { %vm3075_vm9 = vweird.f32 %v3065_v48 }
 0xfe5   :  { %v3054_v46 = vpop.xlane.xlu2 %3053 }
 0xfe6   :  { %v3062_v28 = vmul.f32 %v3054_v46, %v4113_v26  ;;  %v159_v46 = vperm.slane %v158_v52, 0 }
 0xfe8   :  { %v3066_v45 = vadd.f32 1e-06, %v3062_v28  ;;  %v150_v28 = vld [vmem:[%s5369_s3 + $0x9] sm:$0x1] }
 0xfea   :  { %3845 = vrsqrt.f32 %v3066_v45  ;;  %vm3085_vm10 = vweird.f32 %v3066_v45 }
 0xfeb   :  { %3847 = vrsqrt.f32 %v3065_v48 }
 0xfed   :  { %v3129_v0 = vpop.permute.xlu2 %3128 }
 0xfee   :  { %3144 = vmatpush.bf16.msra.mxu0 %v3129_v0 }
 0xff0   :  { %v3846_v37 = vpop.eup %3845 }
 0xff1   :  { %v3848_v49 = vpop.eup %3847  ;;  %v3080_v17 = vmul.f32 %v3846_v37, %v3066_v45  ;;  %vm3086_vm5 = vweird.f32 %v3846_v37 }
 0xff2   :  { %v3070_v1 = vmul.f32 %v3848_v49, %v3065_v48  ;;  %vm3076_vm12 = vweird.f32 %v3848_v49  ;;  %vm3087_vm8 = vmor %vm3085_vm10, %vm3086_vm5 }
 0xff3   :  { %v3081_v2 = vmul.f32 %v3846_v37, %v3080_v17  ;;  %vm3077_vm11 = vmor %vm3075_vm9, %vm3076_vm12 }
 0xff4   :  { %v3071_v58 = vmul.f32 %v3848_v49, %v3070_v1 }
 0xff5   :  { %v3082_v3 = vmul.f32 0.5, %v3081_v2 }
 0xff6   :  { %v3072_v5 = vmul.f32 0.5, %v3071_v58 }
 0xff7   :  { %v3083_v40 = vsub.f32 1.5, %v3082_v3 }
 0xff8   :  { %v3073_v35 = vsub.f32 1.5, %v3072_v5  ;;  %v3125_v5 = vld [vmem:[%s5371_s5 + $0x13] ss:$0 sm:$0xff] }
 0xff9   :  { %v3084_v9 = vmul.f32 %v3846_v37, %v3083_v40  ;;  %v3538_v40 = vld [vmem:[%s5374_s8] sm:$0xff] }
 0xffa   :  { %v3074_v42 = vmul.f32 %v3848_v49, %v3073_v35 }
 0xffb   :  { %v3088_v23 = vsel %vm3087_vm8, %v3846_v37, %v3084_v9  ;;  %v151_v37 = vadd.f32 %v150_v28, %v147_v14 }
 0xffc   :  { %v3078_v18 = vsel %vm3077_vm11, %v3848_v49, %v3074_v42  ;;  %v3114_v49 = vadd.f32 1.0, %v159_v46 }
 0xffd   :  { %v3109_v43 = vmul.f32 %v3078_v18, %v5236_v41  ;;  %v152_v0 = vperm.slane %v151_v37, 0 }
 0xfff   :  { %v3115_v60 = vmul.f32 %v3113_v22, %v3109_v43 }
0x1001   :  { %v3119_v53 = vadd.f32 %v3115_v60, %v149_v10 }
0x1012   :  { %v3057_v4 = vpop.xlane.xlu1 %3056 }
0x1013   :  { %v3063_v44 = vmul.f32 %v3057_v4, %v4113_v26  ;;  %v3541_v4 = vld [vmem:[%s5374_s8 + $0x18] sm:$0xff] }
0x1014   :  { %3239 = vmatpush.bf16.msra.mxu1 %v3541_v4  ;;  %v3203_v4 = vld [vmem:[%s5371_s5 + $0x14] ss:$0 sm:$0xff] }
0x1015   :  { %v3067_v51 = vadd.f32 1e-06, %v3063_v44 }
0x1017   :  { %3849 = vrsqrt.f32 %v3067_v51  ;;  %vm3095_vm15 = vweird.f32 %v3067_v51 }
0x101a   :  { %v3060_v54 = vpop.xlane.xlu0 %3059 }
0x101b   :  { %v3064_v24 = vmul.f32 %v3060_v54, %v4113_v26  ;;  %v3110_v26 = vmul.f32 %v3088_v23, %v5243_v61 }
0x101d   :  { %v3850_v29 = vpop.eup %3849  ;;  %v3068_v31 = vadd.f32 1e-06, %v3064_v24  ;;  %v3116_v27 = vmul.f32 %v3113_v22, %v3110_v26 }
0x101e   :  { %v3090_v25 = vmul.f32 %v3850_v29, %v3067_v51  ;;  %vm3096_vm13 = vweird.f32 %v3850_v29 }
0x101f   :  { %3851 = vrsqrt.f32 %v3068_v31  ;;  %v3120_v47 = vadd.f32 %v3116_v27, %v149_v10  ;;  %vm3097_vm1 = vmor %vm3095_vm15, %vm3096_vm13  ;;  %vm3105_vm2 = vweird.f32 %v3068_v31 }
0x1020   :  { %v3091_v36 = vmul.f32 %v3850_v29, %v3090_v25 }
0x1021   :  { %v3123_v7 = vpack.c.bf16 %v3120_v47, %v3119_v53 }
0x1022   :  { %v3092_v21 = vmul.f32 0.5, %v3091_v36 }
0x1024   :  { %v3093_v12 = vsub.f32 1.5, %v3092_v21 }
0x1025   :  { %v3852_v50 = vpop.eup %3851 }
0x1026   :  { %v3100_v57 = vmul.f32 %v3852_v50, %v3068_v31  ;;  %v3094_v6 = vmul.f32 %v3850_v29, %v3093_v12  ;;  %vm3106_vm14 = vweird.f32 %v3852_v50 }
0x1027   :  { %vm3107_vm3 = vmor %vm3105_vm2, %vm3106_vm14 }
0x1028   :  { %v3101_v56 = vmul.f32 %v3852_v50, %v3100_v57  ;;  %v3098_v13 = vsel %vm3097_vm1, %v3850_v29, %v3094_v6 }
0x1029   :  { %v3111_v48 = vmul.f32 %v3098_v13, %v5252_v39  ;;  %v3539_v39 = vld [vmem:[%s5374_s8 + $0x8] sm:$0xff] }
0x102a   :  { %v3102_v61 = vmul.f32 0.5, %v3101_v56  ;;  %v3127_v63 = vpop.permute.xlu1 %3126 }
0x102b   :  { %3145 = vmatpush.bf16.msra.mxu0 %v3127_v63  ;;  %v3117_v1 = vmul.f32 %v3114_v49, %v3111_v48 }
0x102c   :  { %v3103_v41 = vsub.f32 1.5, %v3102_v61 }
0x102d   :  { %v3121_v58 = vadd.f32 %v3117_v1, %v152_v0  ;;  %v3663_v8 = vpop.permute.xlu0 %3662 }
0x102e   :  { %v3104_v20 = vmul.f32 %v3852_v50, %v3103_v41  ;;  %3502 = vmatmul.msk.bf16.vlgmr.msra.gmra.mxu0 %vm172_vm0, %v3123_v7  ;;  %v3665_v26 = vunpack.i.h.bf16 %v3663_v8  ;;  %v3664_v36 = vunpack.i.l.bf16 %v3663_v8 }
0x1030   :  { %v3108_v38 = vsel %vm3107_vm3, %v3852_v50, %v3104_v20  ;;  %3303 = vmatpush.msrb.mxu2 %v3664_v36 }
0x1031   :  { %v3112_v45 = vmul.f32 %v3108_v38, %v5259_v32  ;;  %v3540_v32 = vld [vmem:[%s5374_s8 + $0x10] sm:$0xff] }
0x1032   :  { %3240 = vmatpush.bf16.msra.mxu1 %v3540_v32  ;;  %3304 = vmatpush.msrb.mxu2 %v3665_v26 }
0x1033   :  { %v3118_v17 = vmul.f32 %v3114_v49, %v3112_v45 }
0x1035   :  { %v3122_v2 = vadd.f32 %v3118_v17, %v152_v0  ;;  %v3668_v17 = vpop.permute.xlu0 %3667 }
0x1036   :  { %3241 = vmatpush.bf16.msra.mxu1 %v3539_v39  ;;  %v3669_v0 = vunpack.i.l.bf16 %v3668_v17  ;;  %v3670_v1 = vunpack.i.h.bf16 %v3668_v17 }
0x1037   :  { %v3124_v3 = vpack.c.bf16 %v3122_v2, %v3121_v58  ;;  %v160_v2 = vld [vmem:[%s5369_s3 + $0x5] sm:$0x1]  ;;  %v161_v58 = vld [vmem:[%s5371_s5 + $0x23] ss:$0 sm:$0xff] }
0x1038   :  { %3305 = vmatpush.msrb.mxu2 %v3669_v0 }
0x103a   :  { %3242 = vmatpush.bf16.msra.mxu1 %v3538_v40  ;;  %3306 = vmatpush.msrb.mxu2 %v3670_v1 }
0x103e   :  { %3503 = vmatmul.msk.bf16.gmra.mxu0 %vm172_vm0, %v3124_v3  ;;  %v162_v3 = vadd.f32 %v161_v58, %v160_v2 }
0x1040   :  { %v163_v32 = vperm.slane %v162_v3, 0 }
0x10ab   :  { %v3147_v44 = vpop.f32.mrf.mxu0 }
0x10ac   :  { %v3148_v51 = vadd.f32 %v3147_v44, %v3125_v5 }
0x10ae   :  { %v3161_v11 = vmul.f32 %v3148_v51, %v3148_v51  ;;  %v3157_v12 = vmul.f32 0.5, %v3148_v51 }
0x10b0   :  { %v3165_v59 = vmul.f32 %v3161_v11, %v3148_v51  ;;  %v164_v11 = vld [vmem:[%s5369_s3 + $0xb] sm:$0x1] }
0x10b2   :  { %v3169_v35 = vmul.f32 0.044715, %v3165_v59 }
0x10b3   :  { %v3149_v9 = vpop.f32.mrf.mxu0 }
0x10b4   :  { %v3173_v62 = vadd.f32 %v3169_v35, %v3148_v51  ;;  %v3150_v54 = vadd.f32 %v3149_v9, %v3125_v5  ;;  %v165_v9 = vadd.f32 %v164_v11, %v161_v58 }
0x10b6   :  { %v3162_v42 = vmul.f32 %v3150_v54, %v3150_v54  ;;  %v3177_v24 = vmul.f32 0.7978846, %v3173_v62  ;;  %v3158_v33 = vmul.f32 0.5, %v3150_v54 }
0x10b8   :  { %v3166_v29 = vmul.f32 %v3162_v42, %v3150_v54  ;;  %3853 = vtanh.f32 %v3177_v24 }
0x10ba   :  { %v3170_v23 = vmul.f32 0.044715, %v3166_v29 }
0x10bb   :  { %v3152_v31 = vpop.f32.mrf.mxu0 }
0x10bc   :  { %v3174_v16 = vadd.f32 %v3170_v23, %v3150_v54  ;;  %v3153_v25 = vadd.f32 %v3152_v31, %v3125_v5  ;;  %v166_v54 = vperm.slane %v165_v9, 0 }
0x10be   :  { %v3178_v14 = vmul.f32 0.7978846, %v3174_v16  ;;  %v3163_v18 = vmul.f32 %v3153_v25, %v3153_v25  ;;  %v3854_v22 = vpop.eup %3853  ;;  %v3159_v28 = vmul.f32 0.5, %v3153_v25 }
0x10bf   :  { %v3185_v10 = vadd.f32 1.0, %v3854_v22 }
0x10c0   :  { %3855 = vtanh.f32 %v3178_v14  ;;  %v3167_v30 = vmul.f32 %v3163_v18, %v3153_v25 }
0x10c1   :  { %v3189_v61 = vmul.f32 %v3185_v10, %v3157_v12 }
0x10c2   :  { %v3171_v43 = vmul.f32 0.044715, %v3167_v30 }
0x10c3   :  { %v3154_v21 = vpop.f32.mrf.mxu0 }
0x10c4   :  { %v3175_v27 = vadd.f32 %v3171_v43, %v3153_v25  ;;  %v3155_v50 = vadd.f32 %v3154_v21, %v3125_v5 }
0x10c6   :  { %v3856_v60 = vpop.eup %3855  ;;  %v3164_v57 = vmul.f32 %v3155_v50, %v3155_v50  ;;  %v3179_v56 = vmul.f32 0.7978846, %v3175_v27  ;;  %v3160_v38 = vmul.f32 0.5, %v3155_v50 }
0x10c7   :  { %v3186_v47 = vadd.f32 1.0, %v3856_v60 }
0x10c8   :  { %v3168_v53 = vmul.f32 %v3164_v57, %v3155_v50  ;;  %3857 = vtanh.f32 %v3179_v56 }
0x10c9   :  { %v3190_v63 = vmul.f32 %v3186_v47, %v3158_v33 }
0x10ca   :  { %v3172_v52 = vmul.f32 0.044715, %v3168_v53 }
0x10cb   :  { %v3201_v6 = vpack.c.bf16 %v3190_v63, %v3189_v61 }
0x10cc   :  { %v3176_v41 = vadd.f32 %v3172_v52, %v3155_v50 }
0x10cd   :  { %3520 = vmatmul.msk.bf16.vlgmr.msra.gmra.mxu1 %vm3228_vm4, %v3201_v6 }
0x10ce   :  { %v3180_v7 = vmul.f32 0.7978846, %v3176_v41  ;;  %v3858_v20 = vpop.eup %3857 }
0x10cf   :  { %v3187_v46 = vadd.f32 1.0, %v3858_v20 }
0x10d0   :  { %3859 = vtanh.f32 %v3180_v7 }
0x10d1   :  { %v3191_v48 = vmul.f32 %v3187_v46, %v3159_v28 }
0x10d6   :  { %v3860_v13 = vpop.eup %3859 }
0x10d7   :  { %v3188_v45 = vadd.f32 1.0, %v3860_v13 }
0x10d9   :  { %v3192_v37 = vmul.f32 %v3188_v45, %v3160_v38 }
0x10db   :  { %v3202_v49 = vpack.c.bf16 %v3192_v37, %v3191_v48 }
0x10dd   :  { %3521 = vmatmul.msk.bf16.gmra.mxu1 %vm3228_vm4, %v3202_v49 }
0x114a   :  { %v3244_v39 = vpop.f32.mrf.mxu1 }
0x114b   :  { %v3245_v5 = vadd.f32 %v3244_v39, %v3203_v4 }
0x114d   :  { %v3254_v44 = vmul.f32 %v3245_v5, %v163_v32 }
0x114f   :  { %v3258_v40 = vadd.f32 %v3254_v44, %v5215_v34 }
0x1151   :  { %3522 = vmatmul.msk.f32.vlgmr.msrb.gmra.mxu2 %vm172_vm0, %v3258_v40 }
0x1152   :  { %v3246_v51 = vpop.f32.mrf.mxu1 }
0x1153   :  { %v3247_v59 = vadd.f32 %v3246_v51, %v3203_v4 }
0x1155   :  { %v3255_v35 = vmul.f32 %v3247_v59, %v163_v32 }
0x1157   :  { %v3259_v62 = vadd.f32 %v3255_v35, %v5220_v55  ;;  %v3262_v55 = vld [vmem:[%s5371_s5 + $0x15] ss:$0 sm:$0xff] }
0x1159   :  { %3523 = vmatmul.msk.f32.gmra.mxu2 %vm172_vm0, %v3259_v62 }
0x115a   :  { %v3249_v42 = vpop.f32.mrf.mxu1 }
0x115b   :  { %v3250_v24 = vadd.f32 %v3249_v42, %v3203_v4 }
0x115d   :  { %v3256_v29 = vmul.f32 %v3250_v24, %v166_v54 }
0x115f   :  { %v3260_v34 = vadd.f32 %v3256_v29, %v5225_v19 }
0x1161   :  { %3524 = vmatmul.msk.f32.gmra.mxu2 %vm172_vm0, %v3260_v34 }
0x1162   :  { %v3251_v23 = vpop.f32.mrf.mxu1 }
0x1163   :  { %v3252_v31 = vadd.f32 %v3251_v23, %v3203_v4 }
0x1165   :  { %v3257_v16 = vmul.f32 %v3252_v31, %v166_v54 }
0x1167   :  { %v3261_v25 = vadd.f32 %v3257_v16, %v5230_v15 }
0x1169   :  { %3525 = vmatmul.msk.f32.gmra.mxu2 %vm172_vm0, %v3261_v25 }
0x11d4   :  { %v3308_v8 = vpop.f32.mrf.mxu2 }
0x11d5   :  { %v3309_v14 = vadd.f32 %v3308_v8, %v3262_v55 }
0x11d7   :  { %3324 = vrot.lane.b32.xlu2 %v3309_v14, %s4005_s19 }
0x11dc   :  { %v3311_v18 = vpop.f32.mrf.mxu2 }
0x11dd   :  { %v3312_v26 = vadd.f32 %v3311_v18, %v3262_v55 }
0x11df   :  { %3326 = vrot.lane.b32.xlu1 %v3312_v26, %s4005_s19 }
0x11e4   :  { %v3314_v19 = vpop.f32.mrf.mxu2 }
0x11e5   :  { %v3315_v36 = vadd.f32 %v3314_v19, %v3262_v55 }
0x11e7   :  { %3328 = vrot.lane.b32.xlu0 %v3315_v36, %s4005_s19 }
0x11ec   :  { %v3317_v30 = vpop.f32.mrf.mxu2 }
0x11ed   :  { %v3318_v15 = vadd.f32 %v3317_v30, %v3262_v55 }
0x11ef   :  { %3330 = vrot.lane.b32.xlu2 %v3318_v15, %s4005_s19 }
0x1231   :  { %v3325_v22 = vpop.permute.xlu2 %3324 }
0x1232   :  { %v3336_v43 = vsel %vm172_vm0, %v3258_v40, %v3325_v22 }
0x1233   :  { %3340 = vst.msk [vmem:[%s5375_s9] sm:$0xff] %vm3228_vm4, %v3336_v43 }
0x1249   :  { %v3331_v21 = vpop.permute.xlu2 %3330 }
0x124a   :  { %v3339_v27 = vsel %vm172_vm0, %v3261_v25, %v3331_v21 }
0x124b   :  { %3343 = vst.msk [vmem:[%s5375_s9 + $0x18] sm:$0xff] %vm3228_vm4, %v3339_v27 }
0x1251   :  { %v3327_v50 = vpop.permute.xlu1 %3326 }
0x1252   :  { %v3337_v10 = vsel %vm172_vm0, %v3259_v62, %v3327_v50 }
0x1253   :  { %3341 = vst.msk [vmem:[%s5375_s9 + $0x8] sm:$0xff] %vm3228_vm4, %v3337_v10 }
0x1259   :  { %v3329_v60 = vpop.permute.xlu0 %3328 }
0x125a   :  { %v3338_v57 = vsel %vm172_vm0, %v3260_v34, %v3329_v60 }
0x125b   :  { %3342 = vst.msk [vmem:[%s5375_s9 + $0x10] sm:$0xff] %vm3228_vm4, %v3338_v57 }
0x125c   :  { %3348 = vsyncpa [#allocation3], 1 }
0x125d   :  { %3349 = vsyncpa [#allocation5], 1 }
0x125e   :  { %3350 = vsyncpa [#allocation8], 1 }

</bundles_post_ra>
